<compile_context>
chip_gen: v5e
topology: v5e:2x2
jax: 0.10.0
libtpu: 0.0.40
codegen_flags: <defaults>
</compile_context>

<pallas_src>
import functools
import math

import jax
import jax.numpy as jnp
from jax.experimental import pallas as pl
from jax.experimental.pallas import tpu as pltpu


# ----------------------------- packed bias / LayerNorm vector order --------------------------

VEC_ORDER = ["bq1", "bo1", "g1", "be1",
             "bq2", "bo2", "g2", "be2",
             "bf2", "g3", "be3"]
VEC_IDX = {name: i for i, name in enumerate(VEC_ORDER)}


# ----------------------------- in-kernel math helpers ----------------------------------------

def _layernorm(x, gamma, beta, eps=1e-5):
    mu = jnp.mean(x, axis=-1, keepdims=True)
    var = jnp.mean((x - mu) ** 2, axis=-1, keepdims=True)
    return (x - mu) * jax.lax.rsqrt(var + eps) * gamma + beta


def _mha(q_in, kT, vh, mask, wq, bq, wo_h, bo, n_head):
    """Multi-head attention with pre-projected, pre-head-split K/V.

    q_in : (nq, d)     f32   query rows (Q projected in-kernel)
    kT   : (h, dh, nk) bf16  K projection, head-split + transposed (done in the wrapper)
    vh   : (h, nk, dh) bf16  V projection, head-split (done in the wrapper)
    mask : (nq, nk)    f32   additive mask
    wq   : (d, d) bf16, bq (1, d) f32
    wo_h : (h, dh, d) bf16 per-head output projection, bo (1, d) f32
    """
    d = wq.shape[1]
    dh = d // n_head
    nq = q_in.shape[0]
    scale = 1.0 / math.sqrt(dh)

    q = jnp.dot(q_in.astype(jnp.bfloat16), wq, preferred_element_type=jnp.float32) + bq
    qh = (q * scale).reshape(nq, n_head, dh).transpose(1, 0, 2).astype(jnp.bfloat16)  # (h,nq,dh)

    # scores + additive mask; softmax elementwise math kept in f32
    s = jnp.einsum("hqd,hdk->hqk", qh, kT,
                   preferred_element_type=jnp.float32) + mask[None]                   # (h,nq,nk)
    s = s - jnp.max(s, axis=-1, keepdims=True)
    p = jnp.exp(s)
    l = jnp.sum(p, axis=-1, keepdims=True)                                            # (h,nq,1)

    # unnormalized PV product, then deferred normalization on the (h,nq,dh) output
    o = jnp.einsum("hqk,hkd->hqd", p.astype(jnp.bfloat16), vh,
                   preferred_element_type=jnp.float32)                                # (h,nq,dh)
    o = o * pl.reciprocal(l, approx=True)

    # per-head output projection (batched matmul), then reduce over heads.
    # This equals concat(o_heads) @ Wo without the transpose+reshape relayout.
    proj = jnp.einsum("hqd,hdf->hqf", o.astype(jnp.bfloat16), wo_h,
                      preferred_element_type=jnp.float32)                             # (h,nq,d)
    out = proj[0]
    for i in range(1, n_head):                    # small unrolled VPU adds (reduce over heads)
        out = out + proj[i]
    return out + bo


# ----------------------------- Pallas kernel -------------------------------------------------

def decoder_layer_kernel(n_head,
                         xq_ref, k1_ref, v1_ref, k2_ref, v2_ref,
                         smask_ref, cmask_ref,
                         wq1_ref, wo1_ref, wq2_ref, wo2_ref, wf1_ref, wf2_ref,
                         vec_ref, bf1_ref,
                         out_ref):
    xq = xq_ref[0]                                   # (tq, D) f32 query tile (also residual)
    smask = smask_ref[0].astype(jnp.float32)         # (tq, n) additive
    cmask = cmask_ref[0].astype(jnp.float32)         # (tq, m) additive
    vec = vec_ref[...]                               # (11, D) packed biases + LN params (f32)

    def vrow(name):
        i = VEC_IDX[name]
        return vec[i:i + 1]

    # 1) masked self-attention (+ dropout1 == identity) -> add & norm1
    a1 = _mha(xq, k1_ref[0], v1_ref[0], smask,
              wq1_ref[...], vrow("bq1"), wo1_ref[...], vrow("bo1"), n_head)
    x1 = _layernorm(xq + a1, vrow("g1"), vrow("be1"))

    # 2) context (cross) attention (+ dropout2 == identity) -> add & norm2
    a2 = _mha(x1, k2_ref[0], v2_ref[0], cmask,
              wq2_ref[...], vrow("bq2"), wo2_ref[...], vrow("bo2"), n_head)
    x2 = _layernorm(x1 + a2, vrow("g2"), vrow("be2"))

    # 3) position-wise FFN: Linear -> ReLU -> Linear -> add & norm3
    h = jnp.maximum(
        jnp.dot(x2.astype(jnp.bfloat16), wf1_ref[...],
                preferred_element_type=jnp.float32) + bf1_ref[...], 0.0)
    ff = jnp.dot(h.astype(jnp.bfloat16), wf2_ref[...],
                 preferred_element_type=jnp.float32) + vrow("bf2")

    out_ref[0] = _layernorm(x2 + ff, vrow("g3"), vrow("be3")).astype(out_ref.dtype)


# ----------------------------- VMEM budget ----------------------------------------------------

def _padded_bytes(shape, dtype):
    s = list(shape)
    if len(s) >= 1:
        s[-1] = -(-s[-1] // 128) * 128
    if len(s) >= 2:
        s[-2] = -(-s[-2] // 8) * 8
    return math.prod(s) * jnp.dtype(dtype).itemsize


def _vmem_capacity_bytes():
    try:
        return int(pltpu.get_tpu_info().vmem_capacity_bytes)
    except Exception:
        return 64 * 1024 * 1024            # conservative: v7x per-core VMEM


def _vmem_limit_bytes(tq, n, m, D, d_ff, h):
    dh = D // h
    f32, bf16 = jnp.float32, jnp.bfloat16
    io = (_padded_bytes((tq, D), f32) * 2 +                       # x tile + out tile
          _padded_bytes((h, dh, n), bf16) + _padded_bytes((h, n, dh), bf16) +
          _padded_bytes((h, dh, m), bf16) + _padded_bytes((h, m, dh), bf16) +
          _padded_bytes((tq, n), bf16) + _padded_bytes((tq, m), bf16))
    const = (_padded_bytes((D, D), bf16) * 2 +                    # wq1, wq2
             _padded_bytes((h, dh, D), bf16) * 2 +                # wo1h, wo2h
             _padded_bytes((D, d_ff), bf16) + _padded_bytes((d_ff, D), bf16) +
             _padded_bytes((len(VEC_ORDER), D), f32) + _padded_bytes((1, d_ff), f32))
    inter = (4 * _padded_bytes((h, tq, n), f32) +                 # self scores / probabilities
             4 * _padded_bytes((h, tq, m), f32) +                 # cross scores / probabilities
             4 * _padded_bytes((h, tq, D), f32) +                 # per-head output projections
             2 * _padded_bytes((tq, d_ff), f32) +                 # FFN hidden
             8 * _padded_bytes((tq, D), f32))                     # q / x1 / x2 / ff temporaries
    needed = 2 * io + 2 * const + 2 * inter + (4 << 20)
    cap = int(0.85 * _vmem_capacity_bytes())                      # headroom for compiler scratch
    return max(16 << 20, min(cap, needed))
    # TODO(synk): for long sequences, flash-tile the self-attention KV axis (online softmax over
    # nk chunks) so the live (h, tq, nk) score buffer stops growing with n (critical on v7x).


# ----------------------------- parameter preparation (done once) ------------------------------

def prepare_decoder_params(P, n_head):
    """Cast/pack parameters once: bf16 weights, per-head Wo, packed bias/LN vector."""
    D = P["wq1"].shape[0]
    dh = D // n_head
    bf = lambda a: a.astype(jnp.bfloat16)
    return {
        "wq1": bf(P["wq1"]), "wk1": bf(P["wk1"]), "wv1": bf(P["wv1"]),
        "wo1h": bf(P["wo1"]).reshape(n_head, dh, D),
        "wq2": bf(P["wq2"]), "wk2": bf(P["wk2"]), "wv2": bf(P["wv2"]),
        "wo2h": bf(P["wo2"]).reshape(n_head, dh, D),
        "wf1": bf(P["wf1"]), "wf2": bf(P["wf2"]),
        "bk1": P["bk1"].reshape(1, D).astype(jnp.float32),
        "bv1": P["bv1"].reshape(1, D).astype(jnp.float32),
        "bk2": P["bk2"].reshape(1, D).astype(jnp.float32),
        "bv2": P["bv2"].reshape(1, D).astype(jnp.float32),
        "bf1": P["bf1"].reshape(1, -1).astype(jnp.float32),
        "vec": jnp.concatenate(
            [P[k].reshape(1, D).astype(jnp.float32) for k in VEC_ORDER], axis=0),   # (11, D)
    }


def _project_kv(seq, wk, bk, wv, bv, n_head):
    """K/V projection + head split, hoisted out of the kernel (computed once per call)."""
    B, n, D = seq.shape
    dh = D // n_head
    s16 = seq.astype(jnp.bfloat16)
    k = jnp.einsum("bnd,df->bnf", s16, wk, preferred_element_type=jnp.float32) + bk
    v = jnp.einsum("bnd,df->bnf", s16, wv, preferred_element_type=jnp.float32) + bv
    kT = k.reshape(B, n, n_head, dh).transpose(0, 2, 3, 1).astype(jnp.bfloat16)   # (B, h, dh, n)
    vh = v.reshape(B, n, n_head, dh).transpose(0, 2, 1, 3).astype(jnp.bfloat16)   # (B, h, n, dh)
    return kT, vh


# ----------------------------- wrapper --------------------------------------------------------

def transformer_decoder_layer(x, context, self_mask, context_mask, prep, n_head, tq=256):
    B, n, D = x.shape
    _, m, _ = context.shape
    assert D % n_head == 0
    dh = D // n_head
    d_ff = prep["wf1"].shape[1]

    tq = min(tq, n)
    assert n % tq == 0, "sequence length must be divisible by the query tile size"
    nt = n // tq

    # Hoisted K/V projections (self-attn uses x, cross-attn uses context).
    k1T, v1h = _project_kv(x, prep["wk1"], prep["bk1"], prep["wv1"], prep["bv1"], n_head)
    k2T, v2h = _project_kv(context, prep["wk2"], prep["bk2"], prep["wv2"], prep["bv2"], n_head)

    # Additive masks in bf16 (half the DMA).
    # TODO(synk): when the self-mask is known to be causal, generate it in-kernel from
    # broadcasted_iota + pl.program_id(1)*tq instead of streaming a (B,n,n) tensor from HBM.
    smask = self_mask.astype(jnp.bfloat16)
    cmask = context_mask.astype(jnp.bfloat16)

    operands = (x, k1T, v1h, k2T, v2h, smask, cmask,
                prep["wq1"], prep["wo1h"], prep["wq2"], prep["wo2h"],
                prep["wf1"], prep["wf2"], prep["vec"], prep["bf1"])

    vmem_limit = _vmem_limit_bytes(tq, n, m, D, d_ff, n_head)

    def build(single_buffer_consts):
        const_kw = {"pipeline_mode": pl.Buffered(1)} if single_buffer_consts else {}

        def const_spec(arr):
            zeros = (0,) * arr.ndim
            return pl.BlockSpec(arr.shape, lambda *_, _z=zeros: _z, **const_kw)

        in_specs = [
            pl.BlockSpec((1, tq, D), lambda b, t: (b, t, 0)),             # x query tile
            pl.BlockSpec((1, n_head, dh, n), lambda b, t: (b, 0, 0, 0)),  # self K^T (per batch)
            pl.BlockSpec((1, n_head, n, dh), lambda b, t: (b, 0, 0, 0)),  # self V
            pl.BlockSpec((1, n_head, dh, m), lambda b, t: (b, 0, 0, 0)),  # cross K^T
            pl.BlockSpec((1, n_head, m, dh), lambda b, t: (b, 0, 0, 0)),  # cross V
            pl.BlockSpec((1, tq, n), lambda b, t: (b, t, 0)),             # self mask tile
            pl.BlockSpec((1, tq, m), lambda b, t: (b, t, 0)),             # cross mask tile
        ] + [const_spec(w) for w in operands[7:]]

        out_spec = pl.BlockSpec((1, tq, D), lambda b, t: (b, t, 0))

        kernel = functools.partial(decoder_layer_kernel, n_head)
        return pl.pallas_call(
            kernel,
            out_shape=jax.ShapeDtypeStruct((B, n, D), x.dtype),
            grid_spec=pltpu.PrefetchScalarGridSpec(
                num_scalar_prefetch=0,
                grid=(B, nt),
                in_specs=in_specs,
                out_specs=out_spec,
            ),
            compiler_params=pltpu.CompilerParams(
                dimension_semantics=("parallel", "parallel"),
                vmem_limit_bytes=vmem_limit,
            ),
        )

    try:
        return build(True)(*operands)
    except Exception:
        # pl.Buffered(1) (single-buffered constant blocks) unsupported on this jax/libtpu:
        # fall back to default double-buffering.
        return build(False)(*operands)


# ----------------------------- pure-JAX f32 reference -----------------------------------------

def _mha_ref(q_in, k_in, v_in, mask, wq, bq, wk, bk, wv, bv, wo, bo, n_head):
    d = wq.shape[1]
    dh = d // n_head
    nq, nk = q_in.shape[0], k_in.shape[0]
    q = q_in @ wq + bq
    k = k_in @ wk + bk
    v = v_in @ wv + bv
    qh = q.reshape(nq, n_head, dh).transpose(1, 0, 2)
    kh = k.reshape(nk, n_head, dh).transpose(1, 0, 2)
    vh = v.reshape(nk, n_head, dh).transpose(1, 0, 2)
    s = jnp.einsum("hnd,hmd->hnm", qh, kh) * (1.0 / math.sqrt(dh)) + mask[None]
    p = jax.nn.softmax(s, axis=-1)
    o = jnp.einsum("hnm,hmd->hnd", p, vh)
    concat = o.transpose(1, 0, 2).reshape(nq, d)
    return concat @ wo + bo


def reference_layer(x, context, self_mask, context_mask, P, n_head):
    def one(xe, ce, sm, cm):
        a1 = _mha_ref(xe, xe, xe, sm, P["wq1"], P["bq1"], P["wk1"], P["bk1"],
                      P["wv1"], P["bv1"], P["wo1"], P["bo1"], n_head)
        x1 = _layernorm(xe + a1, P["g1"], P["be1"])
        a2 = _mha_ref(x1, ce, ce, cm, P["wq2"], P["bq2"], P["wk2"], P["bk2"],
                      P["wv2"], P["bv2"], P["wo2"], P["bo2"], n_head)
        x2 = _layernorm(x1 + a2, P["g2"], P["be2"])
        h = jnp.maximum(x2 @ P["wf1"] + P["bf1"], 0.0)
        ff = h @ P["wf2"] + P["bf2"]
        return _layernorm(x2 + ff, P["g3"], P["be3"])
    return jax.vmap(one)(x, context, self_mask, context_mask)


# ----------------------------- deterministic params & demo ------------------------------------

def init_params(key, d_model, d_ff):
    ks = iter(jax.random.split(key, 24))

    def w(shape):
        return jax.random.normal(next(ks), shape, jnp.float32) * 0.05

    P = {}
    for tag in ("1", "2"):                          # self-attn ("1") and cross-attn ("2")
        P["wq" + tag] = w((d_model, d_model)); P["wk" + tag] = w((d_model, d_model))
        P["wv" + tag] = w((d_model, d_model)); P["wo" + tag] = w((d_model, d_model))
        P["bq" + tag] = w((1, d_model)); P["bk" + tag] = w((1, d_model))
        P["bv" + tag] = w((1, d_model)); P["bo" + tag] = w((1, d_model))
    P["wf1"] = w((d_model, d_ff)); P["bf1"] = w((1, d_ff))
    P["wf2"] = w((d_ff, d_model)); P["bf2"] = w((1, d_model))
    for tag in ("1", "2", "3"):
        P["g" + tag] = jnp.ones((1, d_model), jnp.float32)
        P["be" + tag] = jnp.zeros((1, d_model), jnp.float32)
    return P


if __name__ == "__main__":
    B, n, m = 2, 16, 16
    d_model, d_ff, n_head = 128, 256, 4   # d_in == d_model == d_out; lane-dense (128-aligned)
    # NOTE: dh = d_model/n_head = 32 under-fills the MXU (v6e/v7x 256-wide); at this demo size
    # the kernel is VPU/overhead bound -- real configs should use dh >= 128 for MXU utilization.

    key = jax.random.PRNGKey(0)
    kx, kc, kp = jax.random.split(key, 3)
    x = jax.random.normal(kx, (B, n, d_model), jnp.float32)
    context = jax.random.normal(kc, (B, m, d_model), jnp.float32)

    # causal additive self-mask (-1e9 convention), all-visible context mask
    causal = jnp.where(jnp.tril(jnp.ones((n, n), jnp.bool_)), 0.0, -1e9).astype(jnp.float32)
    self_mask = jnp.broadcast_to(causal, (B, n, n))
    context_mask = jnp.zeros((B, n, m), jnp.float32)

    params = init_params(kp, d_model, d_ff)
    prep = prepare_decoder_params(params, n_head)   # cast/pack once, reuse across calls

    out = transformer_decoder_layer(x, context, self_mask, context_mask, prep, n_head)
    out = jax.block_until_ready(out)

    ref = reference_layer(x, context, self_mask, context_mask, params, n_head)
    assert out.shape == (B, n, d_model)
    assert bool(jnp.all(jnp.isfinite(out)))
    # bf16 weights/activations + approx reciprocal inside the kernel vs f32 reference
    assert jnp.allclose(out, ref, rtol=5e-2, atol=5e-2), "mismatch vs pure-JAX reference"

    print("KERNEL_OK")
</pallas_src>

<mosaic_0001>
module attributes {stable_mosaic.version = 11 : i64} {
  func.func @decoder_layer_kernel(%arg0: i32, %arg1: i32, %arg2: memref<1x16x128xf32, #tpu.memory_space<vmem>>, %arg3: memref<1x4x32x16xbf16, #tpu.memory_space<vmem>>, %arg4: memref<1x4x16x32xbf16, #tpu.memory_space<vmem>>, %arg5: memref<1x4x32x16xbf16, #tpu.memory_space<vmem>>, %arg6: memref<1x4x16x32xbf16, #tpu.memory_space<vmem>>, %arg7: memref<1x16x16xbf16, #tpu.memory_space<vmem>>, %arg8: memref<1x16x16xbf16, #tpu.memory_space<vmem>>, %arg9: memref<128x128xbf16, #tpu.memory_space<vmem>>, %arg10: memref<4x32x128xbf16, #tpu.memory_space<vmem>>, %arg11: memref<128x128xbf16, #tpu.memory_space<vmem>>, %arg12: memref<4x32x128xbf16, #tpu.memory_space<vmem>>, %arg13: memref<128x256xbf16, #tpu.memory_space<vmem>>, %arg14: memref<256x128xbf16, #tpu.memory_space<vmem>>, %arg15: memref<11x128xf32, #tpu.memory_space<vmem>>, %arg16: memref<1x256xf32, #tpu.memory_space<vmem>>, %arg17: memref<1x16x128xf32, #tpu.memory_space<vmem>>) attributes {dimension_semantics = [#tpu.dimension_semantics<parallel>, #tpu.dimension_semantics<parallel>], iteration_bounds = array<i64: 2, 1>, scalar_prefetch = 0 : i64, scratch_operands = 0 : i64, tpu.core_type = #tpu.core_type<tc>, window_params = [{transform_indices = @transform_0, window_bounds = array<i64: 1, 16, 128>}, {transform_indices = @transform_1, window_bounds = array<i64: 1, 4, 32, 16>}, {transform_indices = @transform_2, window_bounds = array<i64: 1, 4, 16, 32>}, {transform_indices = @transform_3, window_bounds = array<i64: 1, 4, 32, 16>}, {transform_indices = @transform_4, window_bounds = array<i64: 1, 4, 16, 32>}, {transform_indices = @transform_5, window_bounds = array<i64: 1, 16, 16>}, {transform_indices = @transform_6, window_bounds = array<i64: 1, 16, 16>}, {pipeline_mode = #tpu.pipeline_mode<synchronous>, transform_indices = @transform_7, window_bounds = array<i64: 128, 128>}, {pipeline_mode = #tpu.pipeline_mode<synchronous>, transform_indices = @transform_8, window_bounds = array<i64: 4, 32, 128>}, {pipeline_mode = #tpu.pipeline_mode<synchronous>, transform_indices = @transform_9, window_bounds = array<i64: 128, 128>}, {pipeline_mode = #tpu.pipeline_mode<synchronous>, transform_indices = @transform_10, window_bounds = array<i64: 4, 32, 128>}, {pipeline_mode = #tpu.pipeline_mode<synchronous>, transform_indices = @transform_11, window_bounds = array<i64: 128, 256>}, {pipeline_mode = #tpu.pipeline_mode<synchronous>, transform_indices = @transform_12, window_bounds = array<i64: 256, 128>}, {pipeline_mode = #tpu.pipeline_mode<synchronous>, transform_indices = @transform_13, window_bounds = array<i64: 11, 128>}, {pipeline_mode = #tpu.pipeline_mode<synchronous>, transform_indices = @transform_14, window_bounds = array<i64: 1, 256>}, {transform_indices = @transform_15, window_bounds = array<i64: 1, 16, 128>}]} {
    %c0 = arith.constant 0 : index
    %c0_0 = arith.constant 0 : index
    %c0_1 = arith.constant 0 : index
    %0 = vector.load %arg2[%c0, %c0_0, %c0_1] : memref<1x16x128xf32, #tpu.memory_space<vmem>>, vector<1x16x128xf32>
    %1 = vector.shape_cast %0 : vector<1x16x128xf32> to vector<16x128xf32>
    %c0_2 = arith.constant 0 : index
    %c0_3 = arith.constant 0 : index
    %c0_4 = arith.constant 0 : index
    %2 = vector.load %arg7[%c0_2, %c0_3, %c0_4] : memref<1x16x16xbf16, #tpu.memory_space<vmem>>, vector<1x16x16xbf16>
    %3 = vector.shape_cast %2 : vector<1x16x16xbf16> to vector<16x16xbf16>
    %4 = arith.extf %3 : vector<16x16xbf16> to vector<16x16xf32>
    %c0_5 = arith.constant 0 : index
    %c0_6 = arith.constant 0 : index
    %c0_7 = arith.constant 0 : index
    %5 = vector.load %arg8[%c0_5, %c0_6, %c0_7] : memref<1x16x16xbf16, #tpu.memory_space<vmem>>, vector<1x16x16xbf16>
    %6 = vector.shape_cast %5 : vector<1x16x16xbf16> to vector<16x16xbf16>
    %7 = arith.extf %6 : vector<16x16xbf16> to vector<16x16xf32>
    %c0_8 = arith.constant 0 : index
    %c0_9 = arith.constant 0 : index
    %8 = vector.load %arg15[%c0_8, %c0_9] : memref<11x128xf32, #tpu.memory_space<vmem>>, vector<11x128xf32>
    %c0_10 = arith.constant 0 : index
    %c0_11 = arith.constant 0 : index
    %c0_12 = arith.constant 0 : index
    %c0_13 = arith.constant 0 : index
    %9 = vector.load %arg3[%c0_10, %c0_11, %c0_12, %c0_13] : memref<1x4x32x16xbf16, #tpu.memory_space<vmem>>, vector<1x4x32x16xbf16>
    %10 = vector.shape_cast %9 : vector<1x4x32x16xbf16> to vector<4x32x16xbf16>
    %c0_14 = arith.constant 0 : index
    %c0_15 = arith.constant 0 : index
    %c0_16 = arith.constant 0 : index
    %c0_17 = arith.constant 0 : index
    %11 = vector.load %arg4[%c0_14, %c0_15, %c0_16, %c0_17] : memref<1x4x16x32xbf16, #tpu.memory_space<vmem>>, vector<1x4x16x32xbf16>
    %12 = vector.shape_cast %11 : vector<1x4x16x32xbf16> to vector<4x16x32xbf16>
    %c0_18 = arith.constant 0 : index
    %c0_19 = arith.constant 0 : index
    %13 = vector.load %arg9[%c0_18, %c0_19] : memref<128x128xbf16, #tpu.memory_space<vmem>>, vector<128x128xbf16>
    %14 = vector.extract_strided_slice %8 {offsets = [0, 0], sizes = [1, 128], strides = [1, 1]} : vector<11x128xf32> to vector<1x128xf32>
    %c0_20 = arith.constant 0 : index
    %c0_21 = arith.constant 0 : index
    %c0_22 = arith.constant 0 : index
    %15 = vector.load %arg10[%c0_20, %c0_21, %c0_22] : memref<4x32x128xbf16, #tpu.memory_space<vmem>>, vector<4x32x128xbf16>
    %16 = vector.extract_strided_slice %8 {offsets = [1, 0], sizes = [1, 128], strides = [1, 1]} : vector<11x128xf32> to vector<1x128xf32>
    %17 = arith.truncf %1 : vector<16x128xf32> to vector<16x128xbf16>
    %cst = arith.constant dense<0.000000e+00> : vector<16x128xf32>
    %18 = tpu.matmul %17, %13, %cst {dimension_numbers = #tpu.dot_dimension_numbers<[1], [0], [0], [1], [0, 0, 1, 1], [], []>} : vector<16x128xbf16>, vector<128x128xbf16>, vector<16x128xf32> -> vector<16x128xf32>
    %19 = vector.broadcast %14 : vector<1x128xf32> to vector<16x128xf32>
    %20 = arith.addf %18, %19 : vector<16x128xf32>
    %cst_23 = arith.constant 0.176776692 : f32
    %21 = vector.broadcast %cst_23 : f32 to vector<16x128xf32>
    %22 = arith.mulf %20, %21 : vector<16x128xf32>
    %23 = vector.shape_cast %22 : vector<16x128xf32> to vector<16x4x32xf32>
    %24 = tpu.transpose %23, [1, 0, 2] : vector<16x4x32xf32> -> vector<4x16x32xf32>
    %25 = arith.truncf %24 : vector<4x16x32xf32> to vector<4x16x32xbf16>
    "tpu.trace_start"() <{level = 10 : i32, message = "hqd,hdk->hqk"}> : () -> ()
    %cst_24 = arith.constant dense<0.000000e+00> : vector<4x16x16xf32>
    %26 = tpu.matmul %25, %10, %cst_24 {dimension_numbers = #tpu.dot_dimension_numbers<[2], [1], [1], [2], [0, 0, 0, 1, 1, 2], [0], [0]>} : vector<4x16x32xbf16>, vector<4x32x16xbf16>, vector<4x16x16xf32> -> vector<4x16x16xf32>
    "tpu.trace_stop"() : () -> ()
    %27 = vector.shape_cast %4 : vector<16x16xf32> to vector<1x16x16xf32>
    %28 = vector.broadcast %27 : vector<1x16x16xf32> to vector<4x16x16xf32>
    %29 = arith.addf %26, %28 : vector<4x16x16xf32>
    %cst_25 = arith.constant dense<0xFF800000> : vector<4x16xf32>
    %30 = vector.multi_reduction <maximumf>, %29, %cst_25 [2] : vector<4x16x16xf32> to vector<4x16xf32>
    %31 = vector.shape_cast %30 : vector<4x16xf32> to vector<4x16x1xf32>
    %32 = vector.broadcast %31 : vector<4x16x1xf32> to vector<4x16x16xf32>
    %33 = arith.subf %29, %32 : vector<4x16x16xf32>
    %34 = math.exp %33 : vector<4x16x16xf32>
    %cst_26 = arith.constant dense<0.000000e+00> : vector<4x16xf32>
    %35 = vector.multi_reduction <add>, %34, %cst_26 [2] : vector<4x16x16xf32> to vector<4x16xf32>
    %36 = vector.shape_cast %35 : vector<4x16xf32> to vector<4x16x1xf32>
    %37 = arith.truncf %34 : vector<4x16x16xf32> to vector<4x16x16xbf16>
    "tpu.trace_start"() <{level = 10 : i32, message = "hqk,hkd->hqd"}> : () -> ()
    %cst_27 = arith.constant dense<0.000000e+00> : vector<4x16x32xf32>
    %38 = tpu.matmul %37, %12, %cst_27 {dimension_numbers = #tpu.dot_dimension_numbers<[2], [1], [1], [2], [0, 0, 0, 1, 1, 2], [0], [0]>} : vector<4x16x16xbf16>, vector<4x16x32xbf16>, vector<4x16x32xf32> -> vector<4x16x32xf32>
    "tpu.trace_stop"() : () -> ()
    %39 = tpu.reciprocal %36 {approx = true} : vector<4x16x1xf32> -> vector<4x16x1xf32>
    %40 = vector.broadcast %39 : vector<4x16x1xf32> to vector<4x16x32xf32>
    %41 = arith.mulf %38, %40 : vector<4x16x32xf32>
    %42 = arith.truncf %41 : vector<4x16x32xf32> to vector<4x16x32xbf16>
    "tpu.trace_start"() <{level = 10 : i32, message = "hqd,hdf->hqf"}> : () -> ()
    %cst_28 = arith.constant dense<0.000000e+00> : vector<4x16x128xf32>
    %43 = tpu.matmul %42, %15, %cst_28 {dimension_numbers = #tpu.dot_dimension_numbers<[2], [1], [1], [2], [0, 0, 0, 1, 1, 2], [0], [0]>} : vector<4x16x32xbf16>, vector<4x32x128xbf16>, vector<4x16x128xf32> -> vector<4x16x128xf32>
    "tpu.trace_stop"() : () -> ()
    %44 = vector.extract_strided_slice %43 {offsets = [0, 0, 0], sizes = [1, 16, 128], strides = [1, 1, 1]} : vector<4x16x128xf32> to vector<1x16x128xf32>
    %45 = vector.shape_cast %44 : vector<1x16x128xf32> to vector<16x128xf32>
    %46 = vector.extract_strided_slice %43 {offsets = [1, 0, 0], sizes = [1, 16, 128], strides = [1, 1, 1]} : vector<4x16x128xf32> to vector<1x16x128xf32>
    %47 = vector.shape_cast %46 : vector<1x16x128xf32> to vector<16x128xf32>
    %48 = arith.addf %45, %47 : vector<16x128xf32>
    %49 = vector.extract_strided_slice %43 {offsets = [2, 0, 0], sizes = [1, 16, 128], strides = [1, 1, 1]} : vector<4x16x128xf32> to vector<1x16x128xf32>
    %50 = vector.shape_cast %49 : vector<1x16x128xf32> to vector<16x128xf32>
    %51 = arith.addf %48, %50 : vector<16x128xf32>
    %52 = vector.extract_strided_slice %43 {offsets = [3, 0, 0], sizes = [1, 16, 128], strides = [1, 1, 1]} : vector<4x16x128xf32> to vector<1x16x128xf32>
    %53 = vector.shape_cast %52 : vector<1x16x128xf32> to vector<16x128xf32>
    %54 = arith.addf %51, %53 : vector<16x128xf32>
    %55 = vector.broadcast %16 : vector<1x128xf32> to vector<16x128xf32>
    %56 = arith.addf %54, %55 : vector<16x128xf32>
    %57 = arith.addf %1, %56 : vector<16x128xf32>
    %58 = vector.extract_strided_slice %8 {offsets = [2, 0], sizes = [1, 128], strides = [1, 1]} : vector<11x128xf32> to vector<1x128xf32>
    %59 = vector.extract_strided_slice %8 {offsets = [3, 0], sizes = [1, 128], strides = [1, 1]} : vector<11x128xf32> to vector<1x128xf32>
    %cst_29 = arith.constant dense<0.000000e+00> : vector<16xf32>
    %60 = vector.multi_reduction <add>, %57, %cst_29 [1] : vector<16x128xf32> to vector<16xf32>
    %61 = vector.shape_cast %60 : vector<16xf32> to vector<16x1xf32>
    %cst_30 = arith.constant 1.280000e+02 : f32
    %62 = vector.broadcast %cst_30 : f32 to vector<16x1xf32>
    %63 = arith.divf %61, %62 : vector<16x1xf32>
    %64 = vector.broadcast %63 : vector<16x1xf32> to vector<16x128xf32>
    %65 = arith.subf %57, %64 : vector<16x128xf32>
    %66 = arith.mulf %65, %65 : vector<16x128xf32>
    %cst_31 = arith.constant dense<0.000000e+00> : vector<16xf32>
    %67 = vector.multi_reduction <add>, %66, %cst_31 [1] : vector<16x128xf32> to vector<16xf32>
    %68 = vector.shape_cast %67 : vector<16xf32> to vector<16x1xf32>
    %cst_32 = arith.constant 1.280000e+02 : f32
    %69 = vector.broadcast %cst_32 : f32 to vector<16x1xf32>
    %70 = arith.divf %68, %69 : vector<16x1xf32>
    %71 = vector.broadcast %63 : vector<16x1xf32> to vector<16x128xf32>
    %72 = arith.subf %57, %71 : vector<16x128xf32>
    %cst_33 = arith.constant 9.99999974E-6 : f32
    %73 = vector.broadcast %cst_33 : f32 to vector<16x1xf32>
    %74 = arith.addf %70, %73 : vector<16x1xf32>
    %75 = math.rsqrt %74 : vector<16x1xf32>
    %76 = vector.broadcast %75 : vector<16x1xf32> to vector<16x128xf32>
    %77 = arith.mulf %72, %76 : vector<16x128xf32>
    %78 = vector.broadcast %58 : vector<1x128xf32> to vector<16x128xf32>
    %79 = arith.mulf %77, %78 : vector<16x128xf32>
    %80 = vector.broadcast %59 : vector<1x128xf32> to vector<16x128xf32>
    %81 = arith.addf %79, %80 : vector<16x128xf32>
    %c0_34 = arith.constant 0 : index
    %c0_35 = arith.constant 0 : index
    %c0_36 = arith.constant 0 : index
    %c0_37 = arith.constant 0 : index
    %82 = vector.load %arg5[%c0_34, %c0_35, %c0_36, %c0_37] : memref<1x4x32x16xbf16, #tpu.memory_space<vmem>>, vector<1x4x32x16xbf16>
    %83 = vector.shape_cast %82 : vector<1x4x32x16xbf16> to vector<4x32x16xbf16>
    %c0_38 = arith.constant 0 : index
    %c0_39 = arith.constant 0 : index
    %c0_40 = arith.constant 0 : index
    %c0_41 = arith.constant 0 : index
    %84 = vector.load %arg6[%c0_38, %c0_39, %c0_40, %c0_41] : memref<1x4x16x32xbf16, #tpu.memory_space<vmem>>, vector<1x4x16x32xbf16>
    %85 = vector.shape_cast %84 : vector<1x4x16x32xbf16> to vector<4x16x32xbf16>
    %c0_42 = arith.constant 0 : index
    %c0_43 = arith.constant 0 : index
    %86 = vector.load %arg11[%c0_42, %c0_43] : memref<128x128xbf16, #tpu.memory_space<vmem>>, vector<128x128xbf16>
    %87 = vector.extract_strided_slice %8 {offsets = [4, 0], sizes = [1, 128], strides = [1, 1]} : vector<11x128xf32> to vector<1x128xf32>
    %c0_44 = arith.constant 0 : index
    %c0_45 = arith.constant 0 : index
    %c0_46 = arith.constant 0 : index
    %88 = vector.load %arg12[%c0_44, %c0_45, %c0_46] : memref<4x32x128xbf16, #tpu.memory_space<vmem>>, vector<4x32x128xbf16>
    %89 = vector.extract_strided_slice %8 {offsets = [5, 0], sizes = [1, 128], strides = [1, 1]} : vector<11x128xf32> to vector<1x128xf32>
    %90 = arith.truncf %81 : vector<16x128xf32> to vector<16x128xbf16>
    %cst_47 = arith.constant dense<0.000000e+00> : vector<16x128xf32>
    %91 = tpu.matmul %90, %86, %cst_47 {dimension_numbers = #tpu.dot_dimension_numbers<[1], [0], [0], [1], [0, 0, 1, 1], [], []>} : vector<16x128xbf16>, vector<128x128xbf16>, vector<16x128xf32> -> vector<16x128xf32>
    %92 = vector.broadcast %87 : vector<1x128xf32> to vector<16x128xf32>
    %93 = arith.addf %91, %92 : vector<16x128xf32>
    %cst_48 = arith.constant 0.176776692 : f32
    %94 = vector.broadcast %cst_48 : f32 to vector<16x128xf32>
    %95 = arith.mulf %93, %94 : vector<16x128xf32>
    %96 = vector.shape_cast %95 : vector<16x128xf32> to vector<16x4x32xf32>
    %97 = tpu.transpose %96, [1, 0, 2] : vector<16x4x32xf32> -> vector<4x16x32xf32>
    %98 = arith.truncf %97 : vector<4x16x32xf32> to vector<4x16x32xbf16>
    "tpu.trace_start"() <{level = 10 : i32, message = "hqd,hdk->hqk"}> : () -> ()
    %cst_49 = arith.constant dense<0.000000e+00> : vector<4x16x16xf32>
    %99 = tpu.matmul %98, %83, %cst_49 {dimension_numbers = #tpu.dot_dimension_numbers<[2], [1], [1], [2], [0, 0, 0, 1, 1, 2], [0], [0]>} : vector<4x16x32xbf16>, vector<4x32x16xbf16>, vector<4x16x16xf32> -> vector<4x16x16xf32>
    "tpu.trace_stop"() : () -> ()
    %100 = vector.shape_cast %7 : vector<16x16xf32> to vector<1x16x16xf32>
    %101 = vector.broadcast %100 : vector<1x16x16xf32> to vector<4x16x16xf32>
    %102 = arith.addf %99, %101 : vector<4x16x16xf32>
    %cst_50 = arith.constant dense<0xFF800000> : vector<4x16xf32>
    %103 = vector.multi_reduction <maximumf>, %102, %cst_50 [2] : vector<4x16x16xf32> to vector<4x16xf32>
    %104 = vector.shape_cast %103 : vector<4x16xf32> to vector<4x16x1xf32>
    %105 = vector.broadcast %104 : vector<4x16x1xf32> to vector<4x16x16xf32>
    %106 = arith.subf %102, %105 : vector<4x16x16xf32>
    %107 = math.exp %106 : vector<4x16x16xf32>
    %cst_51 = arith.constant dense<0.000000e+00> : vector<4x16xf32>
    %108 = vector.multi_reduction <add>, %107, %cst_51 [2] : vector<4x16x16xf32> to vector<4x16xf32>
    %109 = vector.shape_cast %108 : vector<4x16xf32> to vector<4x16x1xf32>
    %110 = arith.truncf %107 : vector<4x16x16xf32> to vector<4x16x16xbf16>
    "tpu.trace_start"() <{level = 10 : i32, message = "hqk,hkd->hqd"}> : () -> ()
    %cst_52 = arith.constant dense<0.000000e+00> : vector<4x16x32xf32>
    %111 = tpu.matmul %110, %85, %cst_52 {dimension_numbers = #tpu.dot_dimension_numbers<[2], [1], [1], [2], [0, 0, 0, 1, 1, 2], [0], [0]>} : vector<4x16x16xbf16>, vector<4x16x32xbf16>, vector<4x16x32xf32> -> vector<4x16x32xf32>
    "tpu.trace_stop"() : () -> ()
    %112 = tpu.reciprocal %109 {approx = true} : vector<4x16x1xf32> -> vector<4x16x1xf32>
    %113 = vector.broadcast %112 : vector<4x16x1xf32> to vector<4x16x32xf32>
    %114 = arith.mulf %111, %113 : vector<4x16x32xf32>
    %115 = arith.truncf %114 : vector<4x16x32xf32> to vector<4x16x32xbf16>
    "tpu.trace_start"() <{level = 10 : i32, message = "hqd,hdf->hqf"}> : () -> ()
    %cst_53 = arith.constant dense<0.000000e+00> : vector<4x16x128xf32>
    %116 = tpu.matmul %115, %88, %cst_53 {dimension_numbers = #tpu.dot_dimension_numbers<[2], [1], [1], [2], [0, 0, 0, 1, 1, 2], [0], [0]>} : vector<4x16x32xbf16>, vector<4x32x128xbf16>, vector<4x16x128xf32> -> vector<4x16x128xf32>
    "tpu.trace_stop"() : () -> ()
    %117 = vector.extract_strided_slice %116 {offsets = [0, 0, 0], sizes = [1, 16, 128], strides = [1, 1, 1]} : vector<4x16x128xf32> to vector<1x16x128xf32>
    %118 = vector.shape_cast %117 : vector<1x16x128xf32> to vector<16x128xf32>
    %119 = vector.extract_strided_slice %116 {offsets = [1, 0, 0], sizes = [1, 16, 128], strides = [1, 1, 1]} : vector<4x16x128xf32> to vector<1x16x128xf32>
    %120 = vector.shape_cast %119 : vector<1x16x128xf32> to vector<16x128xf32>
    %121 = arith.addf %118, %120 : vector<16x128xf32>
    %122 = vector.extract_strided_slice %116 {offsets = [2, 0, 0], sizes = [1, 16, 128], strides = [1, 1, 1]} : vector<4x16x128xf32> to vector<1x16x128xf32>
    %123 = vector.shape_cast %122 : vector<1x16x128xf32> to vector<16x128xf32>
    %124 = arith.addf %121, %123 : vector<16x128xf32>
    %125 = vector.extract_strided_slice %116 {offsets = [3, 0, 0], sizes = [1, 16, 128], strides = [1, 1, 1]} : vector<4x16x128xf32> to vector<1x16x128xf32>
    %126 = vector.shape_cast %125 : vector<1x16x128xf32> to vector<16x128xf32>
    %127 = arith.addf %124, %126 : vector<16x128xf32>
    %128 = vector.broadcast %89 : vector<1x128xf32> to vector<16x128xf32>
    %129 = arith.addf %127, %128 : vector<16x128xf32>
    %130 = arith.addf %81, %129 : vector<16x128xf32>
    %131 = vector.extract_strided_slice %8 {offsets = [6, 0], sizes = [1, 128], strides = [1, 1]} : vector<11x128xf32> to vector<1x128xf32>
    %132 = vector.extract_strided_slice %8 {offsets = [7, 0], sizes = [1, 128], strides = [1, 1]} : vector<11x128xf32> to vector<1x128xf32>
    %cst_54 = arith.constant dense<0.000000e+00> : vector<16xf32>
    %133 = vector.multi_reduction <add>, %130, %cst_54 [1] : vector<16x128xf32> to vector<16xf32>
    %134 = vector.shape_cast %133 : vector<16xf32> to vector<16x1xf32>
    %cst_55 = arith.constant 1.280000e+02 : f32
    %135 = vector.broadcast %cst_55 : f32 to vector<16x1xf32>
    %136 = arith.divf %134, %135 : vector<16x1xf32>
    %137 = vector.broadcast %136 : vector<16x1xf32> to vector<16x128xf32>
    %138 = arith.subf %130, %137 : vector<16x128xf32>
    %139 = arith.mulf %138, %138 : vector<16x128xf32>
    %cst_56 = arith.constant dense<0.000000e+00> : vector<16xf32>
    %140 = vector.multi_reduction <add>, %139, %cst_56 [1] : vector<16x128xf32> to vector<16xf32>
    %141 = vector.shape_cast %140 : vector<16xf32> to vector<16x1xf32>
    %cst_57 = arith.constant 1.280000e+02 : f32
    %142 = vector.broadcast %cst_57 : f32 to vector<16x1xf32>
    %143 = arith.divf %141, %142 : vector<16x1xf32>
    %144 = vector.broadcast %136 : vector<16x1xf32> to vector<16x128xf32>
    %145 = arith.subf %130, %144 : vector<16x128xf32>
    %cst_58 = arith.constant 9.99999974E-6 : f32
    %146 = vector.broadcast %cst_58 : f32 to vector<16x1xf32>
    %147 = arith.addf %143, %146 : vector<16x1xf32>
    %148 = math.rsqrt %147 : vector<16x1xf32>
    %149 = vector.broadcast %148 : vector<16x1xf32> to vector<16x128xf32>
    %150 = arith.mulf %145, %149 : vector<16x128xf32>
    %151 = vector.broadcast %131 : vector<1x128xf32> to vector<16x128xf32>
    %152 = arith.mulf %150, %151 : vector<16x128xf32>
    %153 = vector.broadcast %132 : vector<1x128xf32> to vector<16x128xf32>
    %154 = arith.addf %152, %153 : vector<16x128xf32>
    %155 = arith.truncf %154 : vector<16x128xf32> to vector<16x128xbf16>
    %c0_59 = arith.constant 0 : index
    %c0_60 = arith.constant 0 : index
    %156 = vector.load %arg13[%c0_59, %c0_60] : memref<128x256xbf16, #tpu.memory_space<vmem>>, vector<128x256xbf16>
    %cst_61 = arith.constant dense<0.000000e+00> : vector<16x256xf32>
    %157 = tpu.matmul %155, %156, %cst_61 {dimension_numbers = #tpu.dot_dimension_numbers<[1], [0], [0], [1], [0, 0, 1, 1], [], []>} : vector<16x128xbf16>, vector<128x256xbf16>, vector<16x256xf32> -> vector<16x256xf32>
    %c0_62 = arith.constant 0 : index
    %c0_63 = arith.constant 0 : index
    %158 = vector.load %arg16[%c0_62, %c0_63] : memref<1x256xf32, #tpu.memory_space<vmem>>, vector<1x256xf32>
    %159 = vector.broadcast %158 : vector<1x256xf32> to vector<16x256xf32>
    %160 = arith.addf %157, %159 : vector<16x256xf32>
    %cst_64 = arith.constant 0.000000e+00 : f32
    %161 = vector.broadcast %cst_64 : f32 to vector<16x256xf32>
    %162 = arith.maximumf %160, %161 : vector<16x256xf32>
    %163 = arith.truncf %162 : vector<16x256xf32> to vector<16x256xbf16>
    %c0_65 = arith.constant 0 : index
    %c0_66 = arith.constant 0 : index
    %164 = vector.load %arg14[%c0_65, %c0_66] : memref<256x128xbf16, #tpu.memory_space<vmem>>, vector<256x128xbf16>
    %cst_67 = arith.constant dense<0.000000e+00> : vector<16x128xf32>
    %165 = tpu.matmul %163, %164, %cst_67 {dimension_numbers = #tpu.dot_dimension_numbers<[1], [0], [0], [1], [0, 0, 1, 1], [], []>} : vector<16x256xbf16>, vector<256x128xbf16>, vector<16x128xf32> -> vector<16x128xf32>
    %166 = vector.extract_strided_slice %8 {offsets = [8, 0], sizes = [1, 128], strides = [1, 1]} : vector<11x128xf32> to vector<1x128xf32>
    %167 = vector.broadcast %166 : vector<1x128xf32> to vector<16x128xf32>
    %168 = arith.addf %165, %167 : vector<16x128xf32>
    %169 = arith.addf %154, %168 : vector<16x128xf32>
    %170 = vector.extract_strided_slice %8 {offsets = [9, 0], sizes = [1, 128], strides = [1, 1]} : vector<11x128xf32> to vector<1x128xf32>
    %171 = vector.extract_strided_slice %8 {offsets = [10, 0], sizes = [1, 128], strides = [1, 1]} : vector<11x128xf32> to vector<1x128xf32>
    %cst_68 = arith.constant dense<0.000000e+00> : vector<16xf32>
    %172 = vector.multi_reduction <add>, %169, %cst_68 [1] : vector<16x128xf32> to vector<16xf32>
    %173 = vector.shape_cast %172 : vector<16xf32> to vector<16x1xf32>
    %cst_69 = arith.constant 1.280000e+02 : f32
    %174 = vector.broadcast %cst_69 : f32 to vector<16x1xf32>
    %175 = arith.divf %173, %174 : vector<16x1xf32>
    %176 = vector.broadcast %175 : vector<16x1xf32> to vector<16x128xf32>
    %177 = arith.subf %169, %176 : vector<16x128xf32>
    %178 = arith.mulf %177, %177 : vector<16x128xf32>
    %cst_70 = arith.constant dense<0.000000e+00> : vector<16xf32>
    %179 = vector.multi_reduction <add>, %178, %cst_70 [1] : vector<16x128xf32> to vector<16xf32>
    %180 = vector.shape_cast %179 : vector<16xf32> to vector<16x1xf32>
    %cst_71 = arith.constant 1.280000e+02 : f32
    %181 = vector.broadcast %cst_71 : f32 to vector<16x1xf32>
    %182 = arith.divf %180, %181 : vector<16x1xf32>
    %183 = vector.broadcast %175 : vector<16x1xf32> to vector<16x128xf32>
    %184 = arith.subf %169, %183 : vector<16x128xf32>
    %cst_72 = arith.constant 9.99999974E-6 : f32
    %185 = vector.broadcast %cst_72 : f32 to vector<16x1xf32>
    %186 = arith.addf %182, %185 : vector<16x1xf32>
    %187 = math.rsqrt %186 : vector<16x1xf32>
    %188 = vector.broadcast %187 : vector<16x1xf32> to vector<16x128xf32>
    %189 = arith.mulf %184, %188 : vector<16x128xf32>
    %190 = vector.broadcast %170 : vector<1x128xf32> to vector<16x128xf32>
    %191 = arith.mulf %189, %190 : vector<16x128xf32>
    %192 = vector.broadcast %171 : vector<1x128xf32> to vector<16x128xf32>
    %193 = arith.addf %191, %192 : vector<16x128xf32>
    %c0_73 = arith.constant 0 : index
    %c0_74 = arith.constant 0 : index
    %c0_75 = arith.constant 0 : index
    %194 = vector.load %arg17[%c0_73, %c0_74, %c0_75] : memref<1x16x128xf32, #tpu.memory_space<vmem>>, vector<1x16x128xf32>
    %195 = vector.shape_cast %194 : vector<1x16x128xf32> to vector<16x128xf32>
    %196 = vector.shape_cast %193 : vector<16x128xf32> to vector<1x16x128xf32>
    tpu.vector_store %arg17[%c0_73, %c0_74, %c0_75], %196 {strides = array<i32>} : memref<1x16x128xf32, #tpu.memory_space<vmem>>, vector<1x16x128xf32>,
    return
  }
  func.func @transform_0(%arg0: i32, %arg1: i32) -> (i32, i32, i32) {
    %c0_i32 = arith.constant 0 : i32
    %c0_i32_0 = arith.constant 0 : i32
    return %arg0, %arg1, %c0_i32 : i32, i32, i32
  }
  func.func @transform_1(%arg0: i32, %arg1: i32) -> (i32, i32, i32, i32) {
    %c0_i32 = arith.constant 0 : i32
    %c0_i32_0 = arith.constant 0 : i32
    %c0_i32_1 = arith.constant 0 : i32
    %c0_i32_2 = arith.constant 0 : i32
    return %arg0, %c0_i32, %c0_i32_0, %c0_i32_1 : i32, i32, i32, i32
  }
  func.func @transform_2(%arg0: i32, %arg1: i32) -> (i32, i32, i32, i32) {
    %c0_i32 = arith.constant 0 : i32
    %c0_i32_0 = arith.constant 0 : i32
    %c0_i32_1 = arith.constant 0 : i32
    %c0_i32_2 = arith.constant 0 : i32
    return %arg0, %c0_i32, %c0_i32_0, %c0_i32_1 : i32, i32, i32, i32
  }
  func.func @transform_3(%arg0: i32, %arg1: i32) -> (i32, i32, i32, i32) {
    %c0_i32 = arith.constant 0 : i32
    %c0_i32_0 = arith.constant 0 : i32
    %c0_i32_1 = arith.constant 0 : i32
    %c0_i32_2 = arith.constant 0 : i32
    return %arg0, %c0_i32, %c0_i32_0, %c0_i32_1 : i32, i32, i32, i32
  }
  func.func @transform_4(%arg0: i32, %arg1: i32) -> (i32, i32, i32, i32) {
    %c0_i32 = arith.constant 0 : i32
    %c0_i32_0 = arith.constant 0 : i32
    %c0_i32_1 = arith.constant 0 : i32
    %c0_i32_2 = arith.constant 0 : i32
    return %arg0, %c0_i32, %c0_i32_0, %c0_i32_1 : i32, i32, i32, i32
  }
  func.func @transform_5(%arg0: i32, %arg1: i32) -> (i32, i32, i32) {
    %c0_i32 = arith.constant 0 : i32
    %c0_i32_0 = arith.constant 0 : i32
    return %arg0, %arg1, %c0_i32 : i32, i32, i32
  }
  func.func @transform_6(%arg0: i32, %arg1: i32) -> (i32, i32, i32) {
    %c0_i32 = arith.constant 0 : i32
    %c0_i32_0 = arith.constant 0 : i32
    return %arg0, %arg1, %c0_i32 : i32, i32, i32
  }
  func.func @transform_7(%arg0: i32, %arg1: i32) -> (i32, i32) {
    %c0_i32 = arith.constant 0 : i32
    %c0_i32_0 = arith.constant 0 : i32
    %c0_i32_1 = arith.constant 0 : i32
    return %c0_i32, %c0_i32_0 : i32, i32
  }
  func.func @transform_8(%arg0: i32, %arg1: i32) -> (i32, i32, i32) {
    %c0_i32 = arith.constant 0 : i32
    %c0_i32_0 = arith.constant 0 : i32
    %c0_i32_1 = arith.constant 0 : i32
    %c0_i32_2 = arith.constant 0 : i32
    return %c0_i32, %c0_i32_0, %c0_i32_1 : i32, i32, i32
  }
  func.func @transform_9(%arg0: i32, %arg1: i32) -> (i32, i32) {
    %c0_i32 = arith.constant 0 : i32
    %c0_i32_0 = arith.constant 0 : i32
    %c0_i32_1 = arith.constant 0 : i32
    return %c0_i32, %c0_i32_0 : i32, i32
  }
  func.func @transform_10(%arg0: i32, %arg1: i32) -> (i32, i32, i32) {
    %c0_i32 = arith.constant 0 : i32
    %c0_i32_0 = arith.constant 0 : i32
    %c0_i32_1 = arith.constant 0 : i32
    %c0_i32_2 = arith.constant 0 : i32
    return %c0_i32, %c0_i32_0, %c0_i32_1 : i32, i32, i32
  }
  func.func @transform_11(%arg0: i32, %arg1: i32) -> (i32, i32) {
    %c0_i32 = arith.constant 0 : i32
    %c0_i32_0 = arith.constant 0 : i32
    %c0_i32_1 = arith.constant 0 : i32
    return %c0_i32, %c0_i32_0 : i32, i32
  }
  func.func @transform_12(%arg0: i32, %arg1: i32) -> (i32, i32) {
    %c0_i32 = arith.constant 0 : i32
    %c0_i32_0 = arith.constant 0 : i32
    %c0_i32_1 = arith.constant 0 : i32
    return %c0_i32, %c0_i32_0 : i32, i32
  }
  func.func @transform_13(%arg0: i32, %arg1: i32) -> (i32, i32) {
    %c0_i32 = arith.constant 0 : i32
    %c0_i32_0 = arith.constant 0 : i32
    %c0_i32_1 = arith.constant 0 : i32
    return %c0_i32, %c0_i32_0 : i32, i32
  }
  func.func @transform_14(%arg0: i32, %arg1: i32) -> (i32, i32) {
    %c0_i32 = arith.constant 0 : i32
    %c0_i32_0 = arith.constant 0 : i32
    %c0_i32_1 = arith.constant 0 : i32
    return %c0_i32, %c0_i32_0 : i32, i32
  }
  func.func @transform_15(%arg0: i32, %arg1: i32) -> (i32, i32, i32) {
    %c0_i32 = arith.constant 0 : i32
    %c0_i32_0 = arith.constant 0 : i32
    return %arg0, %arg1, %c0_i32 : i32, i32, i32
  }
}

module attributes {stable_mosaic.version = 11 : i64} {
  func.func @decoder_layer_kernel(%arg0: i32, %arg1: i32, %arg2: memref<1x16x128xf32, #tpu.memory_space<vmem>>, %arg3: memref<1x4x32x16xbf16, #tpu.memory_space<vmem>>, %arg4: memref<1x4x16x32xbf16, #tpu.memory_space<vmem>>, %arg5: memref<1x4x32x16xbf16, #tpu.memory_space<vmem>>, %arg6: memref<1x4x16x32xbf16, #tpu.memory_space<vmem>>, %arg7: memref<1x16x16xbf16, #tpu.memory_space<vmem>>, %arg8: memref<1x16x16xbf16, #tpu.memory_space<vmem>>, %arg9: memref<128x128xbf16, #tpu.memory_space<vmem>>, %arg10: memref<4x32x128xbf16, #tpu.memory_space<vmem>>, %arg11: memref<128x128xbf16, #tpu.memory_space<vmem>>, %arg12: memref<4x32x128xbf16, #tpu.memory_space<vmem>>, %arg13: memref<128x256xbf16, #tpu.memory_space<vmem>>, %arg14: memref<256x128xbf16, #tpu.memory_space<vmem>>, %arg15: memref<11x128xf32, #tpu.memory_space<vmem>>, %arg16: memref<1x256xf32, #tpu.memory_space<vmem>>, %arg17: memref<1x16x128xf32, #tpu.memory_space<vmem>>) attributes {dimension_semantics = [#tpu.dimension_semantics<parallel>, #tpu.dimension_semantics<parallel>], iteration_bounds = array<i64: 2, 1>, scalar_prefetch = 0 : i64, scratch_operands = 0 : i64, tpu.core_type = #tpu.core_type<tc>, window_params = [{transform_indices = @transform_0, window_bounds = array<i64: 1, 16, 128>}, {transform_indices = @transform_1, window_bounds = array<i64: 1, 4, 32, 16>}, {transform_indices = @transform_2, window_bounds = array<i64: 1, 4, 16, 32>}, {transform_indices = @transform_3, window_bounds = array<i64: 1, 4, 32, 16>}, {transform_indices = @transform_4, window_bounds = array<i64: 1, 4, 16, 32>}, {transform_indices = @transform_5, window_bounds = array<i64: 1, 16, 16>}, {transform_indices = @transform_6, window_bounds = array<i64: 1, 16, 16>}, {pipeline_mode = #tpu.pipeline_mode<synchronous>, transform_indices = @transform_7, window_bounds = array<i64: 128, 128>}, {pipeline_mode = #tpu.pipeline_mode<synchronous>, transform_indices = @transform_8, window_bounds = array<i64: 4, 32, 128>}, {pipeline_mode = #tpu.pipeline_mode<synchronous>, transform_indices = @transform_9, window_bounds = array<i64: 128, 128>}, {pipeline_mode = #tpu.pipeline_mode<synchronous>, transform_indices = @transform_10, window_bounds = array<i64: 4, 32, 128>}, {pipeline_mode = #tpu.pipeline_mode<synchronous>, transform_indices = @transform_11, window_bounds = array<i64: 128, 256>}, {pipeline_mode = #tpu.pipeline_mode<synchronous>, transform_indices = @transform_12, window_bounds = array<i64: 256, 128>}, {pipeline_mode = #tpu.pipeline_mode<synchronous>, transform_indices = @transform_13, window_bounds = array<i64: 11, 128>}, {pipeline_mode = #tpu.pipeline_mode<synchronous>, transform_indices = @transform_14, window_bounds = array<i64: 1, 256>}, {transform_indices = @transform_15, window_bounds = array<i64: 1, 16, 128>}]} {
    %c0 = arith.constant 0 : index
    %c0_0 = arith.constant 0 : index
    %c0_1 = arith.constant 0 : index
    %0 = vector.load %arg2[%c0, %c0_0, %c0_1] : memref<1x16x128xf32, #tpu.memory_space<vmem>>, vector<1x16x128xf32>
    %1 = vector.shape_cast %0 : vector<1x16x128xf32> to vector<16x128xf32>
    %c0_2 = arith.constant 0 : index
    %c0_3 = arith.constant 0 : index
    %c0_4 = arith.constant 0 : index
    %2 = vector.load %arg7[%c0_2, %c0_3, %c0_4] : memref<1x16x16xbf16, #tpu.memory_space<vmem>>, vector<1x16x16xbf16>
    %3 = vector.shape_cast %2 : vector<1x16x16xbf16> to vector<16x16xbf16>
    %4 = arith.extf %3 : vector<16x16xbf16> to vector<16x16xf32>
    %c0_5 = arith.constant 0 : index
    %c0_6 = arith.constant 0 : index
    %c0_7 = arith.constant 0 : index
    %5 = vector.load %arg8[%c0_5, %c0_6, %c0_7] : memref<1x16x16xbf16, #tpu.memory_space<vmem>>, vector<1x16x16xbf16>
    %6 = vector.shape_cast %5 : vector<1x16x16xbf16> to vector<16x16xbf16>
    %7 = arith.extf %6 : vector<16x16xbf16> to vector<16x16xf32>
    %c0_8 = arith.constant 0 : index
    %c0_9 = arith.constant 0 : index
    %8 = vector.load %arg15[%c0_8, %c0_9] : memref<11x128xf32, #tpu.memory_space<vmem>>, vector<11x128xf32>
    %c0_10 = arith.constant 0 : index
    %c0_11 = arith.constant 0 : index
    %c0_12 = arith.constant 0 : index
    %c0_13 = arith.constant 0 : index
    %9 = vector.load %arg3[%c0_10, %c0_11, %c0_12, %c0_13] : memref<1x4x32x16xbf16, #tpu.memory_space<vmem>>, vector<1x4x32x16xbf16>
    %10 = vector.shape_cast %9 : vector<1x4x32x16xbf16> to vector<4x32x16xbf16>
    %c0_14 = arith.constant 0 : index
    %c0_15 = arith.constant 0 : index
    %c0_16 = arith.constant 0 : index
    %c0_17 = arith.constant 0 : index
    %11 = vector.load %arg4[%c0_14, %c0_15, %c0_16, %c0_17] : memref<1x4x16x32xbf16, #tpu.memory_space<vmem>>, vector<1x4x16x32xbf16>
    %12 = vector.shape_cast %11 : vector<1x4x16x32xbf16> to vector<4x16x32xbf16>
    %c0_18 = arith.constant 0 : index
    %c0_19 = arith.constant 0 : index
    %13 = vector.load %arg9[%c0_18, %c0_19] : memref<128x128xbf16, #tpu.memory_space<vmem>>, vector<128x128xbf16>
    %14 = vector.extract_strided_slice %8 {offsets = [0, 0], sizes = [1, 128], strides = [1, 1]} : vector<11x128xf32> to vector<1x128xf32>
    %c0_20 = arith.constant 0 : index
    %c0_21 = arith.constant 0 : index
    %c0_22 = arith.constant 0 : index
    %15 = vector.load %arg10[%c0_20, %c0_21, %c0_22] : memref<4x32x128xbf16, #tpu.memory_space<vmem>>, vector<4x32x128xbf16>
    %16 = vector.extract_strided_slice %8 {offsets = [1, 0], sizes = [1, 128], strides = [1, 1]} : vector<11x128xf32> to vector<1x128xf32>
    %17 = arith.truncf %1 : vector<16x128xf32> to vector<16x128xbf16>
    %cst = arith.constant dense<0.000000e+00> : vector<16x128xf32>
    %18 = tpu.matmul %17, %13, %cst {dimension_numbers = #tpu.dot_dimension_numbers<[1], [0], [0], [1], [0, 0, 1, 1], [], []>} : vector<16x128xbf16>, vector<128x128xbf16>, vector<16x128xf32> -> vector<16x128xf32>
    %19 = vector.broadcast %14 : vector<1x128xf32> to vector<16x128xf32>
    %20 = arith.addf %18, %19 : vector<16x128xf32>
    %cst_23 = arith.constant 0.176776692 : f32
    %21 = vector.broadcast %cst_23 : f32 to vector<16x128xf32>
    %22 = arith.mulf %20, %21 : vector<16x128xf32>
    %23 = vector.shape_cast %22 : vector<16x128xf32> to vector<16x4x32xf32>
    %24 = tpu.transpose %23, [1, 0, 2] : vector<16x4x32xf32> -> vector<4x16x32xf32>
    %25 = arith.truncf %24 : vector<4x16x32xf32> to vector<4x16x32xbf16>
    "tpu.trace_start"() <{level = 10 : i32, message = "hqd,hdk->hqk"}> : () -> ()
    %cst_24 = arith.constant dense<0.000000e+00> : vector<4x16x16xf32>
    %26 = tpu.matmul %25, %10, %cst_24 {dimension_numbers = #tpu.dot_dimension_numbers<[2], [1], [1], [2], [0, 0, 0, 1, 1, 2], [0], [0]>} : vector<4x16x32xbf16>, vector<4x32x16xbf16>, vector<4x16x16xf32> -> vector<4x16x16xf32>
    "tpu.trace_stop"() : () -> ()
    %27 = vector.shape_cast %4 : vector<16x16xf32> to vector<1x16x16xf32>
    %28 = vector.broadcast %27 : vector<1x16x16xf32> to vector<4x16x16xf32>
    %29 = arith.addf %26, %28 : vector<4x16x16xf32>
    %cst_25 = arith.constant dense<0xFF800000> : vector<4x16xf32>
    %30 = vector.multi_reduction <maximumf>, %29, %cst_25 [2] : vector<4x16x16xf32> to vector<4x16xf32>
    %31 = vector.shape_cast %30 : vector<4x16xf32> to vector<4x16x1xf32>
    %32 = vector.broadcast %31 : vector<4x16x1xf32> to vector<4x16x16xf32>
    %33 = arith.subf %29, %32 : vector<4x16x16xf32>
    %34 = math.exp %33 : vector<4x16x16xf32>
    %cst_26 = arith.constant dense<0.000000e+00> : vector<4x16xf32>
    %35 = vector.multi_reduction <add>, %34, %cst_26 [2] : vector<4x16x16xf32> to vector<4x16xf32>
    %36 = vector.shape_cast %35 : vector<4x16xf32> to vector<4x16x1xf32>
    %37 = arith.truncf %34 : vector<4x16x16xf32> to vector<4x16x16xbf16>
    "tpu.trace_start"() <{level = 10 : i32, message = "hqk,hkd->hqd"}> : () -> ()
    %cst_27 = arith.constant dense<0.000000e+00> : vector<4x16x32xf32>
    %38 = tpu.matmul %37, %12, %cst_27 {dimension_numbers = #tpu.dot_dimension_numbers<[2], [1], [1], [2], [0, 0, 0, 1, 1, 2], [0], [0]>} : vector<4x16x16xbf16>, vector<4x16x32xbf16>, vector<4x16x32xf32> -> vector<4x16x32xf32>
    "tpu.trace_stop"() : () -> ()
    %39 = tpu.reciprocal %36 {approx = true} : vector<4x16x1xf32> -> vector<4x16x1xf32>
    %40 = vector.broadcast %39 : vector<4x16x1xf32> to vector<4x16x32xf32>
    %41 = arith.mulf %38, %40 : vector<4x16x32xf32>
    %42 = arith.truncf %41 : vector<4x16x32xf32> to vector<4x16x32xbf16>
    "tpu.trace_start"() <{level = 10 : i32, message = "hqd,hdf->hqf"}> : () -> ()
    %cst_28 = arith.constant dense<0.000000e+00> : vector<4x16x128xf32>
    %43 = tpu.matmul %42, %15, %cst_28 {dimension_numbers = #tpu.dot_dimension_numbers<[2], [1], [1], [2], [0, 0, 0, 1, 1, 2], [0], [0]>} : vector<4x16x32xbf16>, vector<4x32x128xbf16>, vector<4x16x128xf32> -> vector<4x16x128xf32>
    "tpu.trace_stop"() : () -> ()
    %44 = vector.extract_strided_slice %43 {offsets = [0, 0, 0], sizes = [1, 16, 128], strides = [1, 1, 1]} : vector<4x16x128xf32> to vector<1x16x128xf32>
    %45 = vector.shape_cast %44 : vector<1x16x128xf32> to vector<16x128xf32>
    %46 = vector.extract_strided_slice %43 {offsets = [1, 0, 0], sizes = [1, 16, 128], strides = [1, 1, 1]} : vector<4x16x128xf32> to vector<1x16x128xf32>
    %47 = vector.shape_cast %46 : vector<1x16x128xf32> to vector<16x128xf32>
    %48 = arith.addf %45, %47 : vector<16x128xf32>
    %49 = vector.extract_strided_slice %43 {offsets = [2, 0, 0], sizes = [1, 16, 128], strides = [1, 1, 1]} : vector<4x16x128xf32> to vector<1x16x128xf32>
    %50 = vector.shape_cast %49 : vector<1x16x128xf32> to vector<16x128xf32>
    %51 = arith.addf %48, %50 : vector<16x128xf32>
    %52 = vector.extract_strided_slice %43 {offsets = [3, 0, 0], sizes = [1, 16, 128], strides = [1, 1, 1]} : vector<4x16x128xf32> to vector<1x16x128xf32>
    %53 = vector.shape_cast %52 : vector<1x16x128xf32> to vector<16x128xf32>
    %54 = arith.addf %51, %53 : vector<16x128xf32>
    %55 = vector.broadcast %16 : vector<1x128xf32> to vector<16x128xf32>
    %56 = arith.addf %54, %55 : vector<16x128xf32>
    %57 = arith.addf %1, %56 : vector<16x128xf32>
    %58 = vector.extract_strided_slice %8 {offsets = [2, 0], sizes = [1, 128], strides = [1, 1]} : vector<11x128xf32> to vector<1x128xf32>
    %59 = vector.extract_strided_slice %8 {offsets = [3, 0], sizes = [1, 128], strides = [1, 1]} : vector<11x128xf32> to vector<1x128xf32>
    %cst_29 = arith.constant dense<0.000000e+00> : vector<16xf32>
    %60 = vector.multi_reduction <add>, %57, %cst_29 [1] : vector<16x128xf32> to vector<16xf32>
    %61 = vector.shape_cast %60 : vector<16xf32> to vector<16x1xf32>
    %cst_30 = arith.constant 1.280000e+02 : f32
    %62 = vector.broadcast %cst_30 : f32 to vector<16x1xf32>
    %63 = arith.divf %61, %62 : vector<16x1xf32>
    %64 = vector.broadcast %63 : vector<16x1xf32> to vector<16x128xf32>
    %65 = arith.subf %57, %64 : vector<16x128xf32>
    %66 = arith.mulf %65, %65 : vector<16x128xf32>
    %cst_31 = arith.constant dense<0.000000e+00> : vector<16xf32>
    %67 = vector.multi_reduction <add>, %66, %cst_31 [1] : vector<16x128xf32> to vector<16xf32>
    %68 = vector.shape_cast %67 : vector<16xf32> to vector<16x1xf32>
    %cst_32 = arith.constant 1.280000e+02 : f32
    %69 = vector.broadcast %cst_32 : f32 to vector<16x1xf32>
    %70 = arith.divf %68, %69 : vector<16x1xf32>
    %71 = vector.broadcast %63 : vector<16x1xf32> to vector<16x128xf32>
    %72 = arith.subf %57, %71 : vector<16x128xf32>
    %cst_33 = arith.constant 9.99999974E-6 : f32
    %73 = vector.broadcast %cst_33 : f32 to vector<16x1xf32>
    %74 = arith.addf %70, %73 : vector<16x1xf32>
    %75 = math.rsqrt %74 : vector<16x1xf32>
    %76 = vector.broadcast %75 : vector<16x1xf32> to vector<16x128xf32>
    %77 = arith.mulf %72, %76 : vector<16x128xf32>
    %78 = vector.broadcast %58 : vector<1x128xf32> to vector<16x128xf32>
    %79 = arith.mulf %77, %78 : vector<16x128xf32>
    %80 = vector.broadcast %59 : vector<1x128xf32> to vector<16x128xf32>
    %81 = arith.addf %79, %80 : vector<16x128xf32>
    %c0_34 = arith.constant 0 : index
    %c0_35 = arith.constant 0 : index
    %c0_36 = arith.constant 0 : index
    %c0_37 = arith.constant 0 : index
    %82 = vector.load %arg5[%c0_34, %c0_35, %c0_36, %c0_37] : memref<1x4x32x16xbf16, #tpu.memory_space<vmem>>, vector<1x4x32x16xbf16>
    %83 = vector.shape_cast %82 : vector<1x4x32x16xbf16> to vector<4x32x16xbf16>
    %c0_38 = arith.constant 0 : index
    %c0_39 = arith.constant 0 : index
    %c0_40 = arith.constant 0 : index
    %c0_41 = arith.constant 0 : index
    %84 = vector.load %arg6[%c0_38, %c0_39, %c0_40, %c0_41] : memref<1x4x16x32xbf16, #tpu.memory_space<vmem>>, vector<1x4x16x32xbf16>
    %85 = vector.shape_cast %84 : vector<1x4x16x32xbf16> to vector<4x16x32xbf16>
    %c0_42 = arith.constant 0 : index
    %c0_43 = arith.constant 0 : index
    %86 = vector.load %arg11[%c0_42, %c0_43] : memref<128x128xbf16, #tpu.memory_space<vmem>>, vector<128x128xbf16>
    %87 = vector.extract_strided_slice %8 {offsets = [4, 0], sizes = [1, 128], strides = [1, 1]} : vector<11x128xf32> to vector<1x128xf32>
    %c0_44 = arith.constant 0 : index
    %c0_45 = arith.constant 0 : index
    %c0_46 = arith.constant 0 : index
    %88 = vector.load %arg12[%c0_44, %c0_45, %c0_46] : memref<4x32x128xbf16, #tpu.memory_space<vmem>>, vector<4x32x128xbf16>
    %89 = vector.extract_strided_slice %8 {offsets = [5, 0], sizes = [1, 128], strides = [1, 1]} : vector<11x128xf32> to vector<1x128xf32>
    %90 = arith.truncf %81 : vector<16x128xf32> to vector<16x128xbf16>
    %cst_47 = arith.constant dense<0.000000e+00> : vector<16x128xf32>
    %91 = tpu.matmul %90, %86, %cst_47 {dimension_numbers = #tpu.dot_dimension_numbers<[1], [0], [0], [1], [0, 0, 1, 1], [], []>} : vector<16x128xbf16>, vector<128x128xbf16>, vector<16x128xf32> -> vector<16x128xf32>
    %92 = vector.broadcast %87 : vector<1x128xf32> to vector<16x128xf32>
    %93 = arith.addf %91, %92 : vector<16x128xf32>
    %cst_48 = arith.constant 0.176776692 : f32
    %94 = vector.broadcast %cst_48 : f32 to vector<16x128xf32>
    %95 = arith.mulf %93, %94 : vector<16x128xf32>
    %96 = vector.shape_cast %95 : vector<16x128xf32> to vector<16x4x32xf32>
    %97 = tpu.transpose %96, [1, 0, 2] : vector<16x4x32xf32> -> vector<4x16x32xf32>
    %98 = arith.truncf %97 : vector<4x16x32xf32> to vector<4x16x32xbf16>
    "tpu.trace_start"() <{level = 10 : i32, message = "hqd,hdk->hqk"}> : () -> ()
    %cst_49 = arith.constant dense<0.000000e+00> : vector<4x16x16xf32>
    %99 = tpu.matmul %98, %83, %cst_49 {dimension_numbers = #tpu.dot_dimension_numbers<[2], [1], [1], [2], [0, 0, 0, 1, 1, 2], [0], [0]>} : vector<4x16x32xbf16>, vector<4x32x16xbf16>, vector<4x16x16xf32> -> vector<4x16x16xf32>
    "tpu.trace_stop"() : () -> ()
    %100 = vector.shape_cast %7 : vector<16x16xf32> to vector<1x16x16xf32>
    %101 = vector.broadcast %100 : vector<1x16x16xf32> to vector<4x16x16xf32>
    %102 = arith.addf %99, %101 : vector<4x16x16xf32>
    %cst_50 = arith.constant dense<0xFF800000> : vector<4x16xf32>
    %103 = vector.multi_reduction <maximumf>, %102, %cst_50 [2] : vector<4x16x16xf32> to vector<4x16xf32>
    %104 = vector.shape_cast %103 : vector<4x16xf32> to vector<4x16x1xf32>
    %105 = vector.broadcast %104 : vector<4x16x1xf32> to vector<4x16x16xf32>
    %106 = arith.subf %102, %105 : vector<4x16x16xf32>
    %107 = math.exp %106 : vector<4x16x16xf32>
    %cst_51 = arith.constant dense<0.000000e+00> : vector<4x16xf32>
    %108 = vector.multi_reduction <add>, %107, %cst_51 [2] : vector<4x16x16xf32> to vector<4x16xf32>
    %109 = vector.shape_cast %108 : vector<4x16xf32> to vector<4x16x1xf32>
    %110 = arith.truncf %107 : vector<4x16x16xf32> to vector<4x16x16xbf16>
    "tpu.trace_start"() <{level = 10 : i32, message = "hqk,hkd->hqd"}> : () -> ()
    %cst_52 = arith.constant dense<0.000000e+00> : vector<4x16x32xf32>
    %111 = tpu.matmul %110, %85, %cst_52 {dimension_numbers = #tpu.dot_dimension_numbers<[2], [1], [1], [2], [0, 0, 0, 1, 1, 2], [0], [0]>} : vector<4x16x16xbf16>, vector<4x16x32xbf16>, vector<4x16x32xf32> -> vector<4x16x32xf32>
    "tpu.trace_stop"() : () -> ()
    %112 = tpu.reciprocal %109 {approx = true} : vector<4x16x1xf32> -> vector<4x16x1xf32>
    %113 = vector.broadcast %112 : vector<4x16x1xf32> to vector<4x16x32xf32>
    %114 = arith.mulf %111, %113 : vector<4x16x32xf32>
    %115 = arith.truncf %114 : vector<4x16x32xf32> to vector<4x16x32xbf16>
    "tpu.trace_start"() <{level = 10 : i32, message = "hqd,hdf->hqf"}> : () -> ()
    %cst_53 = arith.constant dense<0.000000e+00> : vector<4x16x128xf32>
    %116 = tpu.matmul %115, %88, %cst_53 {dimension_numbers = #tpu.dot_dimension_numbers<[2], [1], [1], [2], [0, 0, 0, 1, 1, 2], [0], [0]>} : vector<4x16x32xbf16>, vector<4x32x128xbf16>, vector<4x16x128xf32> -> vector<4x16x128xf32>
    "tpu.trace_stop"() : () -> ()
    %117 = vector.extract_strided_slice %116 {offsets = [0, 0, 0], sizes = [1, 16, 128], strides = [1, 1, 1]} : vector<4x16x128xf32> to vector<1x16x128xf32>
    %118 = vector.shape_cast %117 : vector<1x16x128xf32> to vector<16x128xf32>
    %119 = vector.extract_strided_slice %116 {offsets = [1, 0, 0], sizes = [1, 16, 128], strides = [1, 1, 1]} : vector<4x16x128xf32> to vector<1x16x128xf32>
    %120 = vector.shape_cast %119 : vector<1x16x128xf32> to vector<16x128xf32>
    %121 = arith.addf %118, %120 : vector<16x128xf32>
    %122 = vector.extract_strided_slice %116 {offsets = [2, 0, 0], sizes = [1, 16, 128], strides = [1, 1, 1]} : vector<4x16x128xf32> to vector<1x16x128xf32>
    %123 = vector.shape_cast %122 : vector<1x16x128xf32> to vector<16x128xf32>
    %124 = arith.addf %121, %123 : vector<16x128xf32>
    %125 = vector.extract_strided_slice %116 {offsets = [3, 0, 0], sizes = [1, 16, 128], strides = [1, 1, 1]} : vector<4x16x128xf32> to vector<1x16x128xf32>
    %126 = vector.shape_cast %125 : vector<1x16x128xf32> to vector<16x128xf32>
    %127 = arith.addf %124, %126 : vector<16x128xf32>
    %128 = vector.broadcast %89 : vector<1x128xf32> to vector<16x128xf32>
    %129 = arith.addf %127, %128 : vector<16x128xf32>
    %130 = arith.addf %81, %129 : vector<16x128xf32>
    %131 = vector.extract_strided_slice %8 {offsets = [6, 0], sizes = [1, 128], strides = [1, 1]} : vector<11x128xf32> to vector<1x128xf32>
    %132 = vector.extract_strided_slice %8 {offsets = [7, 0], sizes = [1, 128], strides = [1, 1]} : vector<11x128xf32> to vector<1x128xf32>
    %cst_54 = arith.constant dense<0.000000e+00> : vector<16xf32>
    %133 = vector.multi_reduction <add>, %130, %cst_54 [1] : vector<16x128xf32> to vector<16xf32>
    %134 = vector.shape_cast %133 : vector<16xf32> to vector<16x1xf32>
    %cst_55 = arith.constant 1.280000e+02 : f32
    %135 = vector.broadcast %cst_55 : f32 to vector<16x1xf32>
    %136 = arith.divf %134, %135 : vector<16x1xf32>
    %137 = vector.broadcast %136 : vector<16x1xf32> to vector<16x128xf32>
    %138 = arith.subf %130, %137 : vector<16x128xf32>
    %139 = arith.mulf %138, %138 : vector<16x128xf32>
    %cst_56 = arith.constant dense<0.000000e+00> : vector<16xf32>
    %140 = vector.multi_reduction <add>, %139, %cst_56 [1] : vector<16x128xf32> to vector<16xf32>
    %141 = vector.shape_cast %140 : vector<16xf32> to vector<16x1xf32>
    %cst_57 = arith.constant 1.280000e+02 : f32
    %142 = vector.broadcast %cst_57 : f32 to vector<16x1xf32>
    %143 = arith.divf %141, %142 : vector<16x1xf32>
    %144 = vector.broadcast %136 : vector<16x1xf32> to vector<16x128xf32>
    %145 = arith.subf %130, %144 : vector<16x128xf32>
    %cst_58 = arith.constant 9.99999974E-6 : f32
    %146 = vector.broadcast %cst_58 : f32 to vector<16x1xf32>
    %147 = arith.addf %143, %146 : vector<16x1xf32>
    %148 = math.rsqrt %147 : vector<16x1xf32>
    %149 = vector.broadcast %148 : vector<16x1xf32> to vector<16x128xf32>
    %150 = arith.mulf %145, %149 : vector<16x128xf32>
    %151 = vector.broadcast %131 : vector<1x128xf32> to vector<16x128xf32>
    %152 = arith.mulf %150, %151 : vector<16x128xf32>
    %153 = vector.broadcast %132 : vector<1x128xf32> to vector<16x128xf32>
    %154 = arith.addf %152, %153 : vector<16x128xf32>
    %155 = arith.truncf %154 : vector<16x128xf32> to vector<16x128xbf16>
    %c0_59 = arith.constant 0 : index
    %c0_60 = arith.constant 0 : index
    %156 = vector.load %arg13[%c0_59, %c0_60] : memref<128x256xbf16, #tpu.memory_space<vmem>>, vector<128x256xbf16>
    %cst_61 = arith.constant dense<0.000000e+00> : vector<16x256xf32>
    %157 = tpu.matmul %155, %156, %cst_61 {dimension_numbers = #tpu.dot_dimension_numbers<[1], [0], [0], [1], [0, 0, 1, 1], [], []>} : vector<16x128xbf16>, vector<128x256xbf16>, vector<16x256xf32> -> vector<16x256xf32>
    %c0_62 = arith.constant 0 : index
    %c0_63 = arith.constant 0 : index
    %158 = vector.load %arg16[%c0_62, %c0_63] : memref<1x256xf32, #tpu.memory_space<vmem>>, vector<1x256xf32>
    %159 = vector.broadcast %158 : vector<1x256xf32> to vector<16x256xf32>
    %160 = arith.addf %157, %159 : vector<16x256xf32>
    %cst_64 = arith.constant 0.000000e+00 : f32
    %161 = vector.broadcast %cst_64 : f32 to vector<16x256xf32>
    %162 = arith.maximumf %160, %161 : vector<16x256xf32>
    %163 = arith.truncf %162 : vector<16x256xf32> to vector<16x256xbf16>
    %c0_65 = arith.constant 0 : index
    %c0_66 = arith.constant 0 : index
    %164 = vector.load %arg14[%c0_65, %c0_66] : memref<256x128xbf16, #tpu.memory_space<vmem>>, vector<256x128xbf16>
    %cst_67 = arith.constant dense<0.000000e+00> : vector<16x128xf32>
    %165 = tpu.matmul %163, %164, %cst_67 {dimension_numbers = #tpu.dot_dimension_numbers<[1], [0], [0], [1], [0, 0, 1, 1], [], []>} : vector<16x256xbf16>, vector<256x128xbf16>, vector<16x128xf32> -> vector<16x128xf32>
    %166 = vector.extract_strided_slice %8 {offsets = [8, 0], sizes = [1, 128], strides = [1, 1]} : vector<11x128xf32> to vector<1x128xf32>
    %167 = vector.broadcast %166 : vector<1x128xf32> to vector<16x128xf32>
    %168 = arith.addf %165, %167 : vector<16x128xf32>
    %169 = arith.addf %154, %168 : vector<16x128xf32>
    %170 = vector.extract_strided_slice %8 {offsets = [9, 0], sizes = [1, 128], strides = [1, 1]} : vector<11x128xf32> to vector<1x128xf32>
    %171 = vector.extract_strided_slice %8 {offsets = [10, 0], sizes = [1, 128], strides = [1, 1]} : vector<11x128xf32> to vector<1x128xf32>
    %cst_68 = arith.constant dense<0.000000e+00> : vector<16xf32>
    %172 = vector.multi_reduction <add>, %169, %cst_68 [1] : vector<16x128xf32> to vector<16xf32>
    %173 = vector.shape_cast %172 : vector<16xf32> to vector<16x1xf32>
    %cst_69 = arith.constant 1.280000e+02 : f32
    %174 = vector.broadcast %cst_69 : f32 to vector<16x1xf32>
    %175 = arith.divf %173, %174 : vector<16x1xf32>
    %176 = vector.broadcast %175 : vector<16x1xf32> to vector<16x128xf32>
    %177 = arith.subf %169, %176 : vector<16x128xf32>
    %178 = arith.mulf %177, %177 : vector<16x128xf32>
    %cst_70 = arith.constant dense<0.000000e+00> : vector<16xf32>
    %179 = vector.multi_reduction <add>, %178, %cst_70 [1] : vector<16x128xf32> to vector<16xf32>
    %180 = vector.shape_cast %179 : vector<16xf32> to vector<16x1xf32>
    %cst_71 = arith.constant 1.280000e+02 : f32
    %181 = vector.broadcast %cst_71 : f32 to vector<16x1xf32>
    %182 = arith.divf %180, %181 : vector<16x1xf32>
    %183 = vector.broadcast %175 : vector<16x1xf32> to vector<16x128xf32>
    %184 = arith.subf %169, %183 : vector<16x128xf32>
    %cst_72 = arith.constant 9.99999974E-6 : f32
    %185 = vector.broadcast %cst_72 : f32 to vector<16x1xf32>
    %186 = arith.addf %182, %185 : vector<16x1xf32>
    %187 = math.rsqrt %186 : vector<16x1xf32>
    %188 = vector.broadcast %187 : vector<16x1xf32> to vector<16x128xf32>
    %189 = arith.mulf %184, %188 : vector<16x128xf32>
    %190 = vector.broadcast %170 : vector<1x128xf32> to vector<16x128xf32>
    %191 = arith.mulf %189, %190 : vector<16x128xf32>
    %192 = vector.broadcast %171 : vector<1x128xf32> to vector<16x128xf32>
    %193 = arith.addf %191, %192 : vector<16x128xf32>
    %c0_73 = arith.constant 0 : index
    %c0_74 = arith.constant 0 : index
    %c0_75 = arith.constant 0 : index
    %194 = vector.load %arg17[%c0_73, %c0_74, %c0_75] : memref<1x16x128xf32, #tpu.memory_space<vmem>>, vector<1x16x128xf32>
    %195 = vector.shape_cast %194 : vector<1x16x128xf32> to vector<16x128xf32>
    %196 = vector.shape_cast %193 : vector<16x128xf32> to vector<1x16x128xf32>
    tpu.vector_store %arg17[%c0_73, %c0_74, %c0_75], %196 {strides = array<i32>} : memref<1x16x128xf32, #tpu.memory_space<vmem>>, vector<1x16x128xf32>,
    return
  }
  func.func @transform_0(%arg0: i32, %arg1: i32) -> (i32, i32, i32) {
    %c0_i32 = arith.constant 0 : i32
    %c0_i32_0 = arith.constant 0 : i32
    return %arg0, %arg1, %c0_i32 : i32, i32, i32
  }
  func.func @transform_1(%arg0: i32, %arg1: i32) -> (i32, i32, i32, i32) {
    %c0_i32 = arith.constant 0 : i32
    %c0_i32_0 = arith.constant 0 : i32
    %c0_i32_1 = arith.constant 0 : i32
    %c0_i32_2 = arith.constant 0 : i32
    return %arg0, %c0_i32, %c0_i32_0, %c0_i32_1 : i32, i32, i32, i32
  }
  func.func @transform_2(%arg0: i32, %arg1: i32) -> (i32, i32, i32, i32) {
    %c0_i32 = arith.constant 0 : i32
    %c0_i32_0 = arith.constant 0 : i32
    %c0_i32_1 = arith.constant 0 : i32
    %c0_i32_2 = arith.constant 0 : i32
    return %arg0, %c0_i32, %c0_i32_0, %c0_i32_1 : i32, i32, i32, i32
  }
  func.func @transform_3(%arg0: i32, %arg1: i32) -> (i32, i32, i32, i32) {
    %c0_i32 = arith.constant 0 : i32
    %c0_i32_0 = arith.constant 0 : i32
    %c0_i32_1 = arith.constant 0 : i32
    %c0_i32_2 = arith.constant 0 : i32
    return %arg0, %c0_i32, %c0_i32_0, %c0_i32_1 : i32, i32, i32, i32
  }
  func.func @transform_4(%arg0: i32, %arg1: i32) -> (i32, i32, i32, i32) {
    %c0_i32 = arith.constant 0 : i32
    %c0_i32_0 = arith.constant 0 : i32
    %c0_i32_1 = arith.constant 0 : i32
    %c0_i32_2 = arith.constant 0 : i32
    return %arg0, %c0_i32, %c0_i32_0, %c0_i32_1 : i32, i32, i32, i32
  }
  func.func @transform_5(%arg0: i32, %arg1: i32) -> (i32, i32, i32) {
    %c0_i32 = arith.constant 0 : i32
    %c0_i32_0 = arith.constant 0 : i32
    return %arg0, %arg1, %c0_i32 : i32, i32, i32
  }
  func.func @transform_6(%arg0: i32, %arg1: i32) -> (i32, i32, i32) {
    %c0_i32 = arith.constant 0 : i32
    %c0_i32_0 = arith.constant 0 : i32
    return %arg0, %arg1, %c0_i32 : i32, i32, i32
  }
  func.func @transform_7(%arg0: i32, %arg1: i32) -> (i32, i32) {
    %c0_i32 = arith.constant 0 : i32
    %c0_i32_0 = arith.constant 0 : i32
    %c0_i32_1 = arith.constant 0 : i32
    return %c0_i32, %c0_i32_0 : i32, i32
  }
  func.func @transform_8(%arg0: i32, %arg1: i32) -> (i32, i32, i32) {
    %c0_i32 = arith.constant 0 : i32
    %c0_i32_0 = arith.constant 0 : i32
    %c0_i32_1 = arith.constant 0 : i32
    %c0_i32_2 = arith.constant 0 : i32
    return %c0_i32, %c0_i32_0, %c0_i32_1 : i32, i32, i32
  }
  func.func @transform_9(%arg0: i32, %arg1: i32) -> (i32, i32) {
    %c0_i32 = arith.constant 0 : i32
    %c0_i32_0 = arith.constant 0 : i32
    %c0_i32_1 = arith.constant 0 : i32
    return %c0_i32, %c0_i32_0 : i32, i32
  }
  func.func @transform_10(%arg0: i32, %arg1: i32) -> (i32, i32, i32) {
    %c0_i32 = arith.constant 0 : i32
    %c0_i32_0 = arith.constant 0 : i32
    %c0_i32_1 = arith.constant 0 : i32
    %c0_i32_2 = arith.constant 0 : i32
    return %c0_i32, %c0_i32_0, %c0_i32_1 : i32, i32, i32
  }
  func.func @transform_11(%arg0: i32, %arg1: i32) -> (i32, i32) {
    %c0_i32 = arith.constant 0 : i32
    %c0_i32_0 = arith.constant 0 : i32
    %c0_i32_1 = arith.constant 0 : i32
    return %c0_i32, %c0_i32_0 : i32, i32
  }
  func.func @transform_12(%arg0: i32, %arg1: i32) -> (i32, i32) {
    %c0_i32 = arith.constant 0 : i32
    %c0_i32_0 = arith.constant 0 : i32
    %c0_i32_1 = arith.constant 0 : i32
    return %c0_i32, %c0_i32_0 : i32, i32
  }
  func.func @transform_13(%arg0: i32, %arg1: i32) -> (i32, i32) {
    %c0_i32 = arith.constant 0 : i32
    %c0_i32_0 = arith.constant 0 : i32
    %c0_i32_1 = arith.constant 0 : i32
    return %c0_i32, %c0_i32_0 : i32, i32
  }
  func.func @transform_14(%arg0: i32, %arg1: i32) -> (i32, i32) {
    %c0_i32 = arith.constant 0 : i32
    %c0_i32_0 = arith.constant 0 : i32
    %c0_i32_1 = arith.constant 0 : i32
    return %c0_i32, %c0_i32_0 : i32, i32
  }
  func.func @transform_15(%arg0: i32, %arg1: i32) -> (i32, i32, i32) {
    %c0_i32 = arith.constant 0 : i32
    %c0_i32_0 = arith.constant 0 : i32
    return %arg0, %arg1, %c0_i32 : i32, i32, i32
  }
}

</mosaic_0001>

<bundles_post_ra>
// kernel: tpu_custom_call.1
= control target key start
LH: loop header
LB: loop body
LE: loop exit
PB: predicated region body
PF: predicated region fallthrough
CT: control target
= control target key end

     0   :  { %s5270_s0 = inlined_call_operand.hbm [shape: f32[2,16,128], index: 0, kind: input, shape index: {}]   ;;  %s5271_s1 = inlined_call_operand.vmem [shape: bf16[2,4,32,16], index: 1, kind: input, shape index: {}]   ;;  %s5272_s2 = inlined_call_operand.vmem [shape: bf16[2,4,16,32], index: 2, kind: input, shape index: {}]   ;;  %s5273_s3 = inlined_call_operand.vmem [shape: bf16[2,4,32,16], index: 3, kind: input, shape index: {}]   ;;  %s5274_s4 = inlined_call_operand.hbm [shape: bf16[2,4,16,32], index: 4, kind: input, shape index: {}]   ;;  %s5275_s5 = inlined_call_operand.hbm [shape: bf16[2,16,16], index: 5, kind: input, shape index: {}]   ;;  %s5276_s6 = inlined_call_operand.hbm [shape: bf16[2,16,16], index: 6, kind: input, shape index: {}]   ;;  %s5277_s7 = inlined_call_operand.hbm [shape: bf16[128,128], index: 7, kind: input, shape index: {}]   ;;  %s5278_s8 = inlined_call_operand.hbm [shape: bf16[4,32,128], index: 8, kind: input, shape index: {}]   ;;  %s5279_s9 = inlined_call_operand.hbm [shape: bf16[128,128], index: 9, kind: input, shape index: {}]   ;;  %s5280_s10 = inlined_call_operand.hbm [shape: bf16[4,32,128], index: 10, kind: input, shape index: {}]   ;;  %s5281_s11 = inlined_call_operand.vmem [shape: bf16[128,256], index: 11, kind: input, shape index: {}]   ;;  %s5282_s12 = inlined_call_operand.vmem [shape: bf16[256,128], index: 12, kind: input, shape index: {}]   ;;  %s5283_s13 = inlined_call_operand.hbm [shape: f32[11,128], index: 13, kind: input, shape index: {}]   ;;  %s5284_s14 = inlined_call_operand.vmem [shape: f32[1,256], index: 14, kind: input, shape index: {}]   ;;  %s5285_s15 = inlined_call_operand.hbm [shape: f32[2,16,128], index: 15, kind: output, shape index: {}]  }
   0x1   :  { %5300 = sst [smem:[#allocation31_spill]] %s5271_s1 }
   0x2   :  { %5301 = sst [smem:[#allocation32_spill]] %s5272_s2 }
   0x3   :  { %5302 = sst [smem:[#allocation33_spill]] %s5273_s3 }
   0x4   :  { %5303 = sst [smem:[#allocation34_spill]] %s5274_s4 }
   0x5   :  { %5304 = sst [smem:[#allocation35_spill]] %s5277_s7 }
   0x6   :  { %5305 = sst [smem:[#allocation36_spill]] %s5278_s8 }
   0x7   :  { %5306 = sst [smem:[#allocation37_spill]] %s5279_s9 }
   0x8   :  { %5307 = sst [smem:[#allocation38_spill]] %s5280_s10 }
   0x9   :  { %5308 = sst [smem:[#allocation39_spill]] %s5281_s11 }
   0xa   :  { %5309 = sst [smem:[#allocation40_spill]] %s5282_s12 }
   0xb   :  { %5310 = sst [smem:[#allocation41_spill]] %s5283_s13 }
   0xc   :  { %5311 = sst [smem:[#allocation42_spill]] %s5284_s14 }
   0xd   :  { %5312 = sst [smem:[#allocation43_spill]] %s5285_s15 }
   0xe   :  { %20 = vsyncpa [#allocation3], 0 }
   0xf   :  { %22 = vsyncpa [#allocation3 + $0x1], 0 }
  0x10   :  { %23 = vsyncpa [#allocation6], 0 }
  0x11   :  { %25 = vsyncpa [#allocation6 + $0x1], 0 }
  0x12   :  { %26 = vsyncpa [#allocation9], 0 }
  0x13   :  { %28 = vsyncpa [#allocation9 + $0x1], 0 }
  0x14   :  { %29 = vsyncpa [#allocation12], 0 }
  0x15   :  { %30 = vsyncpa [#allocation15], 0 }
  0x16   :  { %31 = vsyncpa [#allocation4], 0 }
  0x17   :  { %33 = vsyncpa [#allocation4 + $0x1], 0  ;;  %s4510_s18 = smov 0   ;;  %s4512_s19 = smov 0  }
  0x18   :  { %s4514_s20 = smov 0   ;;  %s4516_s21 = smov 0  }
  0x19   :  { %s4518_s22 = smov 0   ;;  %s4520_s23 = smov 0  }
  0x1a LB: > { %5313 = sst [smem:[#allocation25_spill]] %s4391_s18  ;;  %s4541_s24 = sadd.s32 4294967295, %s4411_s23   ;;  %s4411_s23 = sphi %s4520_s23, %s39_s23   ;;  %s4407_s22 = sphi %s4518_s22, %s5352_s22   ;;  %s4403_s21 = sphi %s4516_s21, %s5351_s21   ;;  %s4399_s20 = sphi %s4514_s20, %s5347_s20   ;;  %s4395_s19 = sphi %s4512_s19, %s5350_s19   ;;  %s4391_s18 = sphi %s4510_s18, %s5349_s18  }
  0x1b   : > { %5314 = sst [smem:[#allocation26_spill]] %s4399_s20  ;;  %s3268_s25 = sadd.s32 4294967294, %s4411_s23  }
  0x1c   : > { %p73_p0 = scmp.ne.s32.totalorder %s4395_s19, %s4391_s18  ;;  %p74_p1 = scmp.eq.s32.totalorder %s4541_s24, 0 }
  0x1d   : > { %p427_p2 = scmp.eq.s32.totalorder %s4541_s24, 1  ;;  %p433_p3 = scmp.eq.s32.totalorder %s3268_s25, 1 }
  0x1e   : > { %p4550_p4 = por %p74_p1, %p73_p0  ;;  %p3269_p5 = scmp.ge.s32.totalorder %s4411_s23, 1 }
  0x1f   : > { %p4555_p6 = por %p433_p3, %p73_p0  ;;  %p440_p7 = scmp.lt.s32.totalorder %s4411_s23, 3 }
  0x20   : > { %s5318_s7 = sld [smem:[#allocation35_spill]]  ;;  %s4413_s17 = smov [#allocation10]  }
  0x21   : > { %s5316_s27 = scalar_select %p4555_p6, 1, 0 }
  0x22   : > { %p4563_p8 = pnand %p3269_p5, %p440_p7  ;;  %s453_s25 = sshll.u32 %s4413_s17, 4  ;;  %s454_s25 = int_to_ptr.vmem [resolvable:$true] %s453_s25 }
  0x23   : > { %5317 = sst [smem:[#allocation27_spill]] %s5316_s27  ;;  %s5291_s27 = smov 64  }
  0x24   : > { %p3820_p9 = pneg %p4563_p8  ;;  %s5321_s8 = sld [smem:[#allocation36_spill]] }
  0x25   : > { %s5293_s17 = smov 4   ;;  %s4416_s15 = smov [#allocation11]  }
  0x26   : > { %s451_s30 = sshll.u32 %s5318_s7, 4  ;;  %p4571_p10 = pnand %p3820_p9, %p74_p1  ;;  %s452_s30 = int_to_ptr.hbm [resolvable:$true] %s451_s30 }
  0x27   : > { %s467_s14 = sshll.u32 %s4416_s15, 4  ;;  %s5322_s10 = sld [smem:[#allocation38_spill]]  ;;  %s468_s14 = int_to_ptr.vmem [resolvable:$true] %s467_s14 }
  0x28   : > { %3823 = dma.hbm_to_vmem [thread:$0]  (!%p4571_p10), %s452_s30, 1024, %s454_s25, [#allocation9], %s5291_s27, %s5291_s27, %s5293_s17  }
  0x29   : > { %s4417_s29 = smov [#allocation14]   ;;  %s51_s11 = sadd.s32 1, %s4407_s22 }
  0x2a   : > { %s465_s7 = sshll.u32 %s5321_s8, 4  ;;  %s495_s8 = sshll.u32 %s4417_s29, 4  ;;  %s466_s7 = int_to_ptr.hbm [resolvable:$true] %s465_s7  ;;  %s496_s8 = int_to_ptr.vmem [resolvable:$true] %s495_s8 }
  0x2b   : > { %3826 = dma.hbm_to_vmem [thread:$0]  (!%p4571_p10), %s466_s7, 1024, %s468_s14, [#allocation12], %s5291_s27, %s5291_s27, %s5293_s17  }
  0x2c   : > { %p53_p12 = scmp.ge.s32.totalorder %s51_s11, 2  ;;  %s60_s12 = sadd.s32 1, %s4399_s20 }
  0x2d   : > { %s493_s28 = sshll.u32 %s5322_s10, 4  ;;  %p67_p13 = scmp.ne.s32.totalorder %s4399_s20, %s4395_s19  ;;  %s494_s28 = int_to_ptr.hbm [resolvable:$true] %s493_s28 }
  0x2e   : > { %3832 = dma.hbm_to_vmem [thread:$0]  (!%p4571_p10), %s494_s28, 1024, %s496_s8, [#allocation15], %s5291_s27, %s5291_s27, %s5293_s17  }
  0x2f   : > { %p68_p0 = scmp.eq.s32.totalorder %s4411_s23, 0  ;;  %s5354_s11 = smov (%p53_p12, %s51_s11), 0 }
  0x30   : > { %5323 = sst [smem:[#allocation28_spill]] %s5354_s11  ;;  %p4606_p5 = por %p427_p2, %p67_p13 }
  0x31   : > { %p69_p3 = por %p68_p0, %p67_p13  ;;  %s55_s14 = ssub.s32 %s4407_s22, %s5354_s11 }
  0x32   : > { %s5324_s7 = scalar_select %p4606_p5, 1, 0 }
  0x33   : > { %p3858_p7 = scmp.lt.s32.totalorder %s4411_s23, 2  ;;  %p58_p9 = scmp.eq.s32.totalorder %s55_s14, 0 }
  0x34   : > { %5325 = sst [smem:[#allocation29_spill]] %s5324_s7  ;;  %s4614_s8 = sand.u32 1, %s4399_s20  }
  0x35   : > { %p4616_p11 = pnand %p3858_p7, %p69_p3  ;;  %s5298_s30 = sand.u32 1, %s4411_s23  }
  0x36   : > { %s4622_s25 = scalar_select %p58_p9, %s4399_s20, %s60_s12  }
  0x37   : > { %s3279_s28 = sshll.u32 %s4614_s8, 5  ;;  %s3687_s29 = sshll.u32 %s4407_s22, 5 }
  0x38   : > { %5327 = sst [smem:[#allocation30_spill]] %s4622_s25  ;;  %s584_s14 = scalar_lea.vmem [#allocation5], %s3279_s28 }
  0x39   : > { %s5328_s4 = sld [smem:[#allocation34_spill]]  ;;  %s592_s7 = sshll.u32 %s584_s14, 4  ;;  %s593_s7 = int_to_ptr.vmem [resolvable:$true] %s592_s7 }
  0x3a   : > { %s4631_s3 = scalar_lea.sflag [#allocation6], %s5298_s30  ;;  %s5329_s2 = smov 4  }
  0x3b   : > { %s5330_s12 = smov 64   ;;  %s5331_s9 = sld [smem:[#allocation37_spill]] }
  0x3c   : > { %s4418_s17 = smov [#allocation13]   ;;  %s5332_s13 = sld [smem:[#allocation41_spill]] }
  0x3d   : > { %s481_s28 = sshll.u32 %s4418_s17, 4  ;;  %s4420_s25 = smov 128   ;;  %s482_s28 = int_to_ptr.vmem [resolvable:$true] %s481_s28 }
  0x3e   : > { %s4421_s27 = smov 8   ;;  %s3276_s17 = sshll.u32 %s4614_s8, 4 }
  0x3f   : > { %s589_s10 = scalar_lea.hbm %s5328_s4, %s3687_s29  ;;  %s3686_s29 = sshll.u32 %s4407_s22, 4 }
  0x40   : > { %s590_s11 = sshll.u32 %s589_s10, 4  ;;  %s3282_s20 = sshll.u32 %s4614_s8, 3  ;;  %s591_s11 = int_to_ptr.hbm [resolvable:$true] %s590_s11 }
  0x41   : > { %3842 = dma.hbm_to_vmem [thread:$0]  (!%p4616_p11), %s591_s11, 512, %s593_s7, %s4631_s3, %s5330_s12, %s5330_s12, %s5329_s2  }
  0x42   : > { %s479_s10 = sshll.u32 %s5331_s9, 4  ;;  %s513_s30 = sshll.u32 %s5332_s13, 4  ;;  %s480_s10 = int_to_ptr.hbm [resolvable:$true] %s479_s10  ;;  %s514_s30 = int_to_ptr.hbm [resolvable:$true] %s513_s30 }
  0x43   : > { %3829 = dma.hbm_to_vmem [thread:$0]  (!%p4571_p10), %s480_s10, 1024, %s482_s28, [#allocation12], %s5330_s12, %s5330_s12, %s5329_s2  }
  0x44   : > { %s4419_s11 = smov [#allocation16]   ;;  %s543_s9 = scalar_lea.hbm %s5270_s0, %s3686_s29 }
  0x45   : > { %s515_s7 = sshll.u32 %s4419_s11, 4  ;;  %s544_s13 = sshll.u32 %s543_s9, 4  ;;  %s516_s7 = int_to_ptr.vmem [resolvable:$true] %s515_s7  ;;  %s545_s13 = int_to_ptr.hbm [resolvable:$true] %s544_s13 }
  0x46   : > { %3835 = dma.hbm_to_vmem [thread:$0]  (!%p4571_p10), %s514_s30, 256, %s516_s7, [#allocation15], %s4420_s25, %s4420_s25, %s4421_s27  }
  0x47   : > { %s536_s10 = scalar_lea.vmem [#allocation2], %s3276_s17  ;;  %s533_s11 = scalar_lea.sflag [#allocation3], %s4614_s8 }
  0x48   : > { %s546_s28 = sshll.u32 %s536_s10, 4  ;;  %s3688_s18 = sshll.u32 %s4407_s22, 3  ;;  %s547_s28 = int_to_ptr.vmem [resolvable:$true] %s546_s28 }
  0x49   : > { %3839 = dma.hbm_to_vmem [thread:$0]  (!%p4616_p11), %s545_s13, 256, %s547_s28, %s533_s11, %s4420_s25, %s4420_s25, %s4421_s27  }
  0x4a   : > { %s613_s1 = scalar_lea.hbm %s5275_s5, %s3688_s18  ;;  %s606_s29 = scalar_lea.vmem [#allocation7], %s3282_s20 }
  0x4b   : > { %s614_s4 = sshll.u32 %s613_s1, 4  ;;  %s616_s14 = sshll.u32 %s606_s29, 4  ;;  %s615_s4 = int_to_ptr.hbm [resolvable:$true] %s614_s4  ;;  %s617_s14 = int_to_ptr.vmem [resolvable:$true] %s616_s14 }
  0x4c   : > { %3845 = dma.hbm_to_vmem [thread:$0]  (!%p4616_p11), %s615_s4, 128, %s617_s14, %s4631_s3, %s5330_s12, %s5330_s12, %s5329_s2  }
  0x4d   : > { %s637_s8 = scalar_lea.hbm %s5276_s6, %s3688_s18  ;;  %s630_s27 = scalar_lea.vmem [#allocation8], %s3282_s20 }
  0x4e   : > { %s638_s25 = sshll.u32 %s637_s8, 4  ;;  %s640_s17 = sshll.u32 %s630_s27, 4  ;;  %s639_s25 = int_to_ptr.hbm [resolvable:$true] %s638_s25  ;;  %s641_s17 = int_to_ptr.vmem [resolvable:$true] %s640_s17 }
  0x4f   : > { %s5333_s10 = sand.u32 1, %s4411_s23   ;;  %652 = sbr.rel (%p4563_p8) target bundleno = 2988 (0xbac), region = 80 }
  0x50   : > { %s627_s1 = scalar_lea.sflag [#allocation9], %s5333_s10  ;;  %s4684_s3 = sand.u32 (!%p4563_p8), 1, %s4395_s19  }
  0x51   : > { %3848 = dma.hbm_to_vmem [thread:$0]  (!%p4616_p11), %s639_s25, 128, %s641_s17, %s627_s1, %s5330_s12, %s5330_s12, %s5329_s2  }
  0x52   : > { %s3289_s20 = sshll.u32 (!%p4563_p8), %s4684_s3, 4  ;;  %s655_s28 = scalar_lea.sflag (!%p4563_p8), [#allocation3], %s4684_s3 }
  0x53   : > { %s4690_s11 = scalar_lea.vmem (!%p4563_p8), [#allocation2], %s3289_s20 }
  0x54   : > { %4362 = dma.done.wait (%p4550_p4), %s655_s28, 256  }
  0x55   : > { %4364 = vsyncadd (%p4550_p4), %s655_s28, 4294967040  ;;  %s664_s2 = sand.u32 1, %s4541_s24   ;;  %s3290_s16 = sshll.u32 %s4684_s3, 5 }
  0x56   : > { %s665_s15 = scalar_lea.sflag [#allocation6], %s664_s2  ;;  %s4698_s12 = scalar_lea.vmem [#allocation5], %s3290_s16 }
  0x57   : > { %4366 = dma.done.wait (%p4550_p4), %s665_s15, 640  }
  0x58   : > { %4368 = vsyncadd (%p4550_p4), %s665_s15, 4294966656  ;;  %s3291_s18 = sshll.u32 %s4684_s3, 3  ;;  %s685_s7 = scalar_lea.sflag [#allocation9], %s664_s2 }
  0x59   : > { %s4705_s30 = scalar_lea.vmem [#allocation7], %s3291_s18  ;;  %s4707_s4 = scalar_lea.vmem [#allocation8], %s3291_s18 }
  0x5a   : > { %4370 = dma.done.wait (%p4550_p4), %s685_s7, 128  }
  0x5b   : > { %4372 = vsyncadd (%p4550_p4), %s685_s7, 4294967168 }
  0x5c   : > { %4374 = dma.done.wait (%p74_p1), [#allocation9], 1024  }
  0x5d   : > { %4376 = vsyncadd (%p74_p1), [#allocation9], 4294966272 }
  0x5e   : > { %4378 = dma.done.wait (%p74_p1), [#allocation12], 2048  }
  0x5f   : > { %4380 = vsyncadd (%p74_p1), [#allocation12], 4294965248 }
  0x60   : > { %4382 = dma.done.wait (%p74_p1), [#allocation15], 1280  }
  0x61   : > { %4384 = vsyncadd (%p74_p1), [#allocation15], 4294966016  ;;  %v3712_v0 = vld [vmem:[#allocation10 + $0x38] sm:$0xff]  ;;  %v3711_v1 = vld [vmem:[#allocation10 + $0x30] sm:$0xff]  ;;  %s4422_s24 = smov 32   ;;  %s4423_s26 = smov 96  }
  0x62   : > { %929 = vmatpush.bf16.msra.mxu0 %v3712_v0  ;;  %v3710_v2 = vld [vmem:[#allocation10 + $0x28] sm:$0xff]  ;;  %v3709_v3 = vld [vmem:[#allocation10 + $0x20] sm:$0xff]  ;;  %v3708_v4 = vld [vmem:[#allocation10 + $0x18] sm:$0xff]  ;;  %s4424_s29 = smov 64   ;;  %p792_p1 = scmp.lt.s32.totalorder %s4403_s21, 1  ;;  %vm966_vm0 = vcmask 1047556  }
  0x63   : > { %v3707_v5 = vld [vmem:[#allocation10 + $0x10] sm:$0xff]  ;;  %v3706_v6 = vld [vmem:[#allocation10 + $0x8] sm:$0xff]  ;;  %v3705_v7 = vld [vmem:[#allocation10] sm:$0xff]  ;;  %s5334_s25 = sld [smem:[#allocation31_spill]]  ;;  %v4425_v26 = vmov 1983009808  }
  0x64   : > { %v4726_v8 = vld [vmem:[%s4690_s11] sm:$0xff]  ;;  %v4729_v9 = vld [vmem:[%s4690_s11 + $0x8] sm:$0xff]  ;;  %s4747_s14 = scalar_select %p792_p1, %s4403_s21, 1  ;;  %v971_v27 = vunpack.c.l.s4 %v4425_v26  ;;  %v4426_v42 = vmov 1934713408   ;;  %vm1211_vm1 = vcmask 261120  }
  0x65   : > { %v879_v10 = vpack.c.bf16 %v4729_v9, %v4726_v8  ;;  %v4733_v11 = vld [vmem:[#allocation16] sm:$0xff]  ;;  %v995_v43 = vunpack.c.l.s4 %v4426_v42  ;;  %vm1331_vm2 = vcmask 130048   ;;  %s5335_s28 = sld [smem:[#allocation32_spill]]  ;;  %s3781_s2 = sshll.u32 %s4403_s21, 4 }
  0x66   : > { %930 = vmatpush.bf16.msra.mxu0 %v3711_v1  ;;  %v880_v13 = vperm.slane %v4733_v11, 0  ;;  %s3690_s9 = sshll.u32 %s4747_s14, 6  ;;  %v4762_v37 = vunpack.c.0.s8 %v971_v27  ;;  %s3691_s17 = sshll.u32 %s4747_s14, 5 }
  0x67   : > { %v4774_v53 = vunpack.c.0.s8 %v995_v43  ;;  %s5336_s15 = sld [smem:[#allocation33_spill]]  ;;  %s3008_s21 = scalar_lea.sflag [#allocation4], %s4684_s3 }
  0x68   : > { %s5337_s7 = sld [smem:[#allocation39_spill]] }
  0x69   : > { %s4755_s27 = scalar_lea.vmem %s5334_s25, %s3690_s9 }
  0x6a   : > { %931 = vmatpush.bf16.msra.mxu0 %v3710_v2  ;;  %v3698_v20 = vld [vmem:[%s4755_s27 + $0x28] sm:$0xff]  ;;  %v3696_v22 = vld [vmem:[%s4755_s27 + $0x18] sm:$0xff]  ;;  %v3697_v23 = vld [vmem:[%s4755_s27 + $0x20] sm:$0xff] }
  0x6b   : > { %v3694_v21 = vld [vmem:[%s4755_s27 + $0x8] sm:$0xff]  ;;  %1289 = vmatpush.bf16.msra.mxu3 %v3698_v20  ;;  %v3693_v24 = vld [vmem:[%s4755_s27] sm:$0xff]  ;;  %1255 = vmatpush.bf16.msra.mxu2 %v3696_v22  ;;  %v3695_v58 = vld [vmem:[%s4755_s27 + $0x10] sm:$0xff]  ;;  %s4876_s11 = scalar_lea.vmem %s5335_s28, %s3691_s17 }
  0x6c   : > { %1221 = vmatpush.bf16.msra.mxu1 %v3694_v21  ;;  %v3699_v26 = vld [vmem:[%s4755_s27 + $0x30] sm:$0xff] }
  0x6d   : > { %s4926_s18 = scalar_lea.vmem %s5336_s15, %s3690_s9 }
  0x6e   : > { %932 = vmatpush.bf16.msra.mxu0 %v3709_v3 }
  0x6f   : > { %1290 = vmatpush.bf16.msra.mxu3 %v3697_v23  ;;  %1256 = vmatpush.bf16.msra.mxu2 %v3695_v58 }
  0x70   : > { %1222 = vmatpush.bf16.msra.mxu1 %v3693_v24 }
  0x72   : > { %933 = vmatpush.bf16.msra.mxu0 %v3708_v4 }
  0x76   : > { %934 = vmatpush.bf16.msra.mxu0 %v3707_v5 }
  0x7a   : > { %935 = vmatpush.bf16.msra.mxu0 %v3706_v6 }
  0x7e   : > { %936 = vmatpush.bf16.msra.mxu0 %v3705_v7 }
  0x81   : > { %937 = vmatmul.bf16.vlgmr.msra.gmra.mxu0 %v879_v10 }
  0xfe   : > { %v938_v12 = vpop.f32.mrf.mxu0 }
  0xff   : > { %v939_v14 = vadd.f32 %v938_v12, %v880_v13 }
 0x101   : > { %v4736_v17 = vmul.f32 0.17677669, %v939_v14 }
 0x103   : > { %v968_v48 = vrot.slane %v4736_v17, 4 }
 0x106   : > { %v940_v15 = vpop.f32.mrf.mxu0 }
 0x107   : > { %v941_v16 = vadd.f32 %v940_v15, %v880_v13 }
 0x109   : > { %v4738_v18 = vmul.f32 0.17677669, %v941_v16 }
 0x10b   : > { %v3940_v19 = vpack.i.bf16 %v4738_v18, %v4736_v17  ;;  %v1024_v46 = vrot.slane %v4738_v18, 4 }
 0x10d   : > { %3941 = vrot.lane.b32.xlu1 %v3940_v19, %s4422_s24  ;;  %3931 = vrot.lane.b32.xlu0 %v3940_v19, %s4423_s26 }
 0x115   : > { %3936 = vrot.lane.b32.xlu0 %v3940_v19, %s4424_s29 }
 0x17f   : > { %v3942_v25 = vpop.permute.xlu1 %3941  ;;  %v3932_v28 = vpop.permute.xlu0 %3931 }
 0x180   : > { %v3944_v29 = vunpack.i.h.bf16 %v3942_v25  ;;  %v3943_v30 = vunpack.i.l.bf16 %v3942_v25  ;;  %v3934_v31 = vunpack.i.h.bf16 %v3932_v28  ;;  %v3933_v32 = vunpack.i.l.bf16 %v3932_v28 }
 0x182   : > { %v1034_v33 = vrot.slane %v3944_v29, 4  ;;  %v978_v34 = vrot.slane %v3943_v30, 4  ;;  %v1036_v35 = vrot.slane %v3934_v31, 4  ;;  %v980_v36 = vrot.slane %v3933_v32, 4 }
 0x184   : > { %v1035_v38 = vsel %vm966_vm0, %v1034_v33, %v3934_v31  ;;  %v981_v39 = vsel %vm966_vm0, %v3943_v30, %v980_v36  ;;  %v1037_v40 = vsel %vm966_vm0, %v3944_v29, %v1036_v35  ;;  %v979_v41 = vsel %vm966_vm0, %v978_v34, %v3933_v32 }
 0x185   : > { %v1041_v44 = vperm.slane %v1035_v38, %v4762_v37  ;;  %v989_v45 = vperm.slane %v981_v39, %v4762_v37  ;;  %v1045_v49 = vperm.slane %v1037_v40, %v4762_v37  ;;  %v985_v50 = vperm.slane %v979_v41, %v4762_v37 }
 0x187   : > { %v3937_v47 = vpop.permute.xlu0 %3936  ;;  %v1046_v59 = vrot.slane %v1041_v44, 4  ;;  %v1002_v60 = vrot.slane %v989_v45, 4  ;;  %v1058_v63 = vrot.slane %v1045_v49, 4  ;;  %v990_v0 = vrot.slane %v985_v50, 4 }
 0x188   : > { %v3939_v51 = vunpack.i.h.bf16 %v3937_v47  ;;  %v3938_v52 = vunpack.i.l.bf16 %v3937_v47 }
 0x18a   : > { %v1022_v54 = vrot.slane %v3939_v51, 4  ;;  %v1025_v55 = vsel %vm966_vm0, %v3939_v51, %v1024_v46  ;;  %v965_v56 = vrot.slane %v3938_v52, 4  ;;  %v969_v57 = vsel %vm966_vm0, %v3938_v52, %v968_v48 }
 0x18b   : > { %v1033_v61 = vperm.slane %v1025_v55, %v4762_v37  ;;  %v977_v62 = vperm.slane %v969_v57, %v4762_v37 }
 0x18c   : > { %v1023_v1 = vsel %vm966_vm0, %v1022_v54, %v4738_v18  ;;  %v967_v2 = vsel %vm966_vm0, %v965_v56, %v4736_v17  ;;  %v3700_v17 = vld [vmem:[%s4755_s27 + $0x38] sm:$0xff] }
 0x18d   : > { %v1029_v3 = vperm.slane %v1023_v1, %v4762_v37  ;;  %v1060_v4 = vrot.slane %v1033_v61, 4  ;;  %v973_v5 = vperm.slane %v967_v2, %v4762_v37  ;;  %v1003_v6 = vsel %vm966_vm0, %v1002_v60, %v977_v62  ;;  %1323 = vmatpush.bf16.msrb.mxu1 %v3700_v17 }
 0x18e   : > { %v1004_v7 = vrot.slane %v977_v62, 4  ;;  %v1009_v10 = vperm.slane %v1003_v6, %v4774_v53  ;;  %v1059_v12 = vsel %vm966_vm0, %v1058_v63, %v1033_v61 }
 0x18f   : > { %v1048_v13 = vrot.slane %v1029_v3, 4  ;;  %v991_v14 = vsel %vm966_vm0, %v990_v0, %v973_v5  ;;  %v992_v15 = vrot.slane %v973_v5, 4  ;;  %v1047_v16 = vsel %vm966_vm0, %v1046_v59, %v1029_v3 }
 0x190   : > { %v997_v18 = vperm.slane %v991_v14, %v4774_v53  ;;  %v1005_v19 = vsel %vm966_vm0, %v989_v45, %v1004_v7  ;;  %v1018_v20 = vrot.slane %v1009_v10, 4  ;;  %v1053_v21 = vperm.slane %v1047_v16, %v4774_v53 }
 0x191   : > { %v993_v22 = vsel %vm966_vm0, %v985_v50, %v992_v15  ;;  %v1013_v23 = vperm.slane %v1005_v19, %v4774_v53  ;;  %v1049_v24 = vsel %vm966_vm0, %v1041_v44, %v1048_v13  ;;  %v1061_v25 = vsel %vm966_vm0, %v1045_v49, %v1060_v4  ;;  %1324 = vmatpush.bf16.msrb.mxu1 %v3699_v26 }
 0x192   : > { %v1001_v27 = vperm.slane %v993_v22, %v4774_v53  ;;  %v1014_v28 = vrot.slane %v997_v18, 4  ;;  %v1057_v29 = vperm.slane %v1049_v24, %v4774_v53  ;;  %v1065_v31 = vperm.slane %v1059_v12, %v4774_v53 }
 0x193   : > { %v1020_v30 = vrot.slane %v1013_v23, 4  ;;  %v1069_v32 = vperm.slane %v1061_v25, %v4774_v53  ;;  %v1070_v33 = vrot.slane %v1053_v21, 4  ;;  %v1019_v36 = vsel %vm966_vm0, 0.0, %v1018_v20 }
 0x194   : > { %v1015_v34 = vsel %vm966_vm0, 0.0, %v1014_v28  ;;  %v1016_v35 = vrot.slane %v1001_v27, 4  ;;  %v1072_v38 = vrot.slane %v1057_v29, 4  ;;  %v1074_v41 = vrot.slane %v1065_v31, 4 }
 0x195   : > { %v1021_v39 = vsel %vm966_vm0, 0.0, %v1020_v30  ;;  %v1071_v40 = vsel %vm966_vm0, 0.0, %v1070_v33  ;;  %v1076_v42 = vrot.slane %v1069_v32, 4  ;;  %v1089_v46 = vsel %vm966_vm0, %v1020_v30, %v1009_v10 }
 0x196   : > { %v1017_v43 = vsel %vm966_vm0, 0.0, %v1016_v35  ;;  %v1073_v44 = vsel %vm966_vm0, 0.0, %v1072_v38  ;;  %v1078_v45 = vsel %vm966_vm0, %v1016_v35, %v997_v18  ;;  %v1075_v47 = vsel %vm966_vm0, 0.0, %v1074_v41 }
 0x197   : > { %v1077_v48 = vsel %vm966_vm0, 0.0, %v1076_v42  ;;  %v1083_v49 = vrot.slane %v1017_v43, 4  ;;  %v1093_v50 = vperm.slane %v1089_v46, %v4762_v37  ;;  %v1094_v51 = vrot.slane %v1021_v39, 4 }
 0x198   : > { %v1132_v52 = vsel %vm966_vm0, %v1072_v38, %v1053_v21  ;;  %v1137_v54 = vrot.slane %v1073_v44, 4  ;;  %v1143_v55 = vsel %vm966_vm0, %v1076_v42, %v1065_v31  ;;  %v1148_v57 = vrot.slane %v1077_v48, 4 }
 0x199   : > { %v1147_v56 = vperm.slane %v1143_v55, %v4762_v37  ;;  %v1082_v58 = vperm.slane %v1078_v45, %v4762_v37  ;;  %v1084_v59 = vsel %vm966_vm0, %v1083_v49, %v1015_v34  ;;  %v1095_v60 = vsel %vm966_vm0, %v1094_v51, %v1019_v36 }
 0x19a   : > { %v1088_v61 = vperm.slane %v1084_v59, %v4762_v37  ;;  %v1114_v62 = vrot.slane %v1093_v50, 4  ;;  %v1136_v63 = vperm.slane %v1132_v52, %v4762_v37  ;;  %v1149_v0 = vsel %vm966_vm0, %v1148_v57, %v1075_v47 }
 0x19b   : > { %v1099_v1 = vperm.slane %v1095_v60, %v4762_v37  ;;  %v1102_v2 = vrot.slane %v1082_v58, 4  ;;  %v1138_v3 = vsel %vm966_vm0, %v1137_v54, %v1071_v40  ;;  %v1153_v5 = vperm.slane %v1149_v0, %v4762_v37 }
 0x19c   : > { %v1142_v4 = vperm.slane %v1138_v3, %v4762_v37  ;;  %v1156_v6 = vrot.slane %v1136_v63, 4  ;;  %v1168_v7 = vrot.slane %v1147_v56, 4  ;;  %v1100_v13 = vrot.slane %v1088_v61, 4 }
 0x19d   : > { %v1103_v10 = vsel %vm966_vm0, %v1088_v61, %v1102_v2  ;;  %v1115_v12 = vsel %vm966_vm0, %v1099_v1, %v1114_v62  ;;  %v1112_v14 = vrot.slane %v1099_v1, 4  ;;  %v1166_v28 = vrot.slane %v1153_v5, 4 }
 0x19e   : > { %v1111_v15 = vperm.slane %v1103_v10, %v4774_v53  ;;  %v1123_v16 = vperm.slane %v1115_v12, %v4774_v53  ;;  %v1157_v17 = vsel %vm966_vm0, %v1142_v4, %v1156_v6  ;;  %v1169_v18 = vsel %vm966_vm0, %v1153_v5, %v1168_v7  ;;  %v3783_v5 = vld [vmem:[%s4705_s30] sm:$0xff]  }
 0x19f   : > { %v1165_v19 = vperm.slane %v1157_v17, %v4774_v53  ;;  %v1177_v20 = vperm.slane %v1169_v18, %v4774_v53  ;;  %v1101_v21 = vsel %vm966_vm0, %v1100_v13, %v1082_v58  ;;  %v1113_v22 = vsel %vm966_vm0, %v1112_v14, %v1093_v50 }
 0x1a0   : > { %v1128_v23 = vrot.slane %v1123_v16, 4  ;;  %v1107_v24 = vperm.slane %v1101_v21, %v4774_v53  ;;  %v1119_v25 = vperm.slane %v1113_v22, %v4774_v53  ;;  %v1154_v27 = vrot.slane %v1142_v4, 4 }
 0x1a1   : > { %v1182_v26 = vrot.slane %v1177_v20, 4  ;;  %v1167_v35 = vsel %vm966_vm0, %v1166_v28, %v1147_v56  ;;  %v1130_v60 = vrot.slane %v1111_v15, 4  ;;  %v1184_v61 = vrot.slane %v1165_v19, 4 }
 0x1a2   : > { %v1129_v29 = vsel %vm966_vm0, %v1128_v23, %v1111_v15  ;;  %v1124_v30 = vrot.slane %v1119_v25, 4  ;;  %v1126_v31 = vrot.slane %v1107_v24, 4  ;;  %v1155_v34 = vsel %vm966_vm0, %v1154_v27, %v1136_v63 }
 0x1a3   : > { %v1183_v32 = vsel %vm966_vm0, %v1182_v26, %v1165_v19  ;;  %v1190_v33 = vpack.c.bf16 %v1129_v29, %v1129_v29  ;;  %v1161_v39 = vperm.slane %v1155_v34, %v4774_v53  ;;  %v1173_v40 = vperm.slane %v1167_v35, %v4774_v53  ;;  %v3701_v35 = vld [vmem:[%s4876_s11] sm:$0xff] }
 0x1a4   : > { %v1191_v36 = vpack.c.bf16 %v1183_v32, %v1183_v32  ;;  %v1125_v38 = vsel %vm966_vm0, %v1124_v30, %v1107_v24  ;;  %v1127_v43 = vsel %vm966_vm0, %v1119_v25, %v1126_v31  ;;  %v1131_v62 = vsel %vm966_vm0, %v1123_v16, %v1130_v60  ;;  %1433 = vmatpush.bf16.msrb.mxu2 %v3701_v35 }
 0x1a5   : > { %v1265_v41 = vunpack.c.l.b16 %v1190_v33  ;;  %v1186_v42 = vpack.c.bf16 %v1125_v38, %v1125_v38  ;;  %v1178_v45 = vrot.slane %v1173_v40, 4  ;;  %v1180_v46 = vrot.slane %v1161_v39, 4 }
 0x1a6   : > { %v1266_v44 = vunpack.c.l.b16 %v1191_v36  ;;  %v1188_v47 = vpack.c.bf16 %v1127_v43, %v1127_v43  ;;  %v1185_v63 = vsel %vm966_vm0, %v1177_v20, %v1184_v61  ;;  %v1192_v0 = vpack.c.bf16 %v1131_v62, %v1131_v62 }
 0x1a7   : > { %v1179_v49 = vsel %vm966_vm0, %v1178_v45, %v1161_v39  ;;  %v1181_v50 = vsel %vm966_vm0, %v1173_v40, %v1180_v46  ;;  %v1196_v52 = vunpack.c.l.b16 %v1186_v42  ;;  %v1193_v1 = vpack.c.bf16 %v1185_v63, %v1185_v63  ;;  %v3704_v40 = vld [vmem:[%s4876_s11 + $0x18] sm:$0xff]  ;;  %v3702_v46 = vld [vmem:[%s4876_s11 + $0x8] sm:$0xff] }
 0x1a8   : > { %v1267_v48 = vpack.c.b16 %v1266_v44, %v1265_v41  ;;  %v1187_v51 = vpack.c.bf16 %v1179_v49, %v1179_v49  ;;  %v1189_v54 = vpack.c.bf16 %v1181_v50, %v1181_v50  ;;  %v1231_v55 = vunpack.c.l.b16 %v1188_v47  ;;  %1461 = vmatpush.bf16.msrb.mxu3 %v3702_v46 }
 0x1a9   : > { %v1299_v2 = vunpack.c.l.b16 %v1192_v0  ;;  %v1300_v3 = vunpack.c.l.b16 %v1193_v1  ;;  %v3784_v6 = vunpack.c.l.bf16 %v3783_v5  ;;  %v3785_v13 = vunpack.c.h.bf16 %v3783_v5 }
 0x1aa   : > { %3363 = vmatmul.msk.bf16.vlgmr.msra.gmra.mxu3 %vm1211_vm1, %v1267_v48  ;;  %v1197_v56 = vunpack.c.l.b16 %v1187_v51  ;;  %v1232_v57 = vunpack.c.l.b16 %v1189_v54 }
 0x1ab   : > { %v1301_v4 = vpack.c.b16 %v1300_v3, %v1299_v2  ;;  %v3703_v2 = vld [vmem:[%s4876_s11 + $0x10] sm:$0xff]  ;;  %s5339_s11 = sld [smem:[#allocation42_spill]] }
 0x1ac   : > { %v1198_v58 = vpack.c.b16 %v1197_v56, %v1196_v52  ;;  %v1233_v59 = vpack.c.b16 %v1232_v57, %v1231_v55 }
 0x1ae   : > { %3345 = vmatmul.msk.bf16.vlgmr.msra.gmra.mxu1 %vm1211_vm1, %v1198_v58  ;;  %3354 = vmatmul.msk.bf16.vlgmr.msra.gmra.mxu2 %vm1211_vm1, %v1233_v59 }
 0x1af   : > { %1517 = vmatpush.bf16.msra.mxu2 %v3704_v40  ;;  %1489 = vmatpush.bf16.msra.mxu1 %v3703_v2 }
 0x1be   : > { %3372 = vmatmul.msk.bf16.vlgmr.msrb.gmra.mxu1 %vm1211_vm1, %v1301_v4 }
 0x22b   : > { %v1224_v7 = vpop.f32.mrf.mxu1 }
 0x22c   : > { %v1225_v10 = vadd.f32 %v3784_v6, %v1224_v7 }
 0x22d   : > { %v1292_v28 = vpop.f32.mrf.mxu3 }
 0x22e   : > { %v1332_v12 = vsel %vm1331_vm2, %v1225_v10, -inf  ;;  %v4864_v30 = vadd.f32 %v3784_v6, %v1292_v28 }
 0x22f   : > { %1333 = vmax.xlane.f32.xlu1 %v1332_v12 }
 0x230   : > { %v1344_v31 = vsel %vm1331_vm2, %v4864_v30, -inf }
 0x231   : > { %v1258_v19 = vpop.f32.mrf.mxu2 }
 0x232   : > { %v1259_v21 = vadd.f32 %v3784_v6, %v1258_v19 }
 0x233   : > { %v1226_v14 = vpop.f32.mrf.mxu1 }
 0x234   : > { %v1227_v15 = vadd.f32 %v3785_v13, %v1226_v14  ;;  %v1338_v25 = vsel %vm1331_vm2, %v1259_v21, -inf }
 0x235   : > { %v1294_v32 = vpop.f32.mrf.mxu3 }
 0x236   : > { %v1335_v16 = vsel %vm1331_vm2, %v1227_v15, -inf  ;;  %v4868_v33 = vadd.f32 %v3785_v13, %v1294_v32 }
 0x237   : > { %1336 = vmax.xlane.f32.xlu2 %v1335_v16 }
 0x238   : > { %v1347_v34 = vsel %vm1331_vm2, %v4868_v33, -inf }
 0x239   : > { %v1260_v26 = vpop.f32.mrf.mxu2 }
 0x23a   : > { %v1261_v27 = vadd.f32 %v3785_v13, %v1260_v26 }
 0x23b   : > { %v1326_v17 = vpop.f32.mrf.mxu1 }
 0x23c   : > { %v1327_v18 = vadd.f32 %v3784_v6, %v1326_v17  ;;  %v1341_v29 = vsel %vm1331_vm2, %v1261_v27, -inf }
 0x23e   : > { %v1350_v20 = vsel %vm1331_vm2, %v1327_v18, -inf }
 0x23f   : > { %1351 = vmax.xlane.f32.xlu2 %v1350_v20 }
 0x243   : > { %v1328_v22 = vpop.f32.mrf.mxu1 }
 0x244   : > { %v1329_v23 = vadd.f32 %v3785_v13, %v1328_v22 }
 0x246   : > { %v1353_v24 = vsel %vm1331_vm2, %v1329_v23, -inf }
 0x247   : > { %1354 = vmax.xlane.f32.xlu0 %v1353_v24  ;;  %1339 = vmax.xlane.f32.xlu2 %v1338_v25 }
 0x24f   : > { %1342 = vmax.xlane.f32.xlu2 %v1341_v29 }
 0x257   : > { %1345 = vmax.xlane.f32.xlu2 %v1344_v31 }
 0x25f   : > { %1348 = vmax.xlane.f32.xlu2 %v1347_v34 }
 0x2a2   : > { %v1334_v36 = vpop.xlane.xlu1 %1333 }
 0x2a3   : > { %v1356_v38 = vsub.f32 %v1225_v10, %v1334_v36 }
 0x2a5   : > { %v1364_v39 = vmul.f32 1.442695, %v1356_v38 }
 0x2a7   : > { %3960 = vpow2.f32 %v1364_v39 }
 0x2aa   : > { %v1337_v41 = vpop.xlane.xlu2 %1336 }
 0x2ab   : > { %v1357_v42 = vsub.f32 %v1227_v15, %v1337_v41 }
 0x2ad   : > { %v3961_v43 = vpop.eup %3960  ;;  %v1366_v44 = vmul.f32 1.442695, %v1357_v42  ;;  %v3713_v42 = vld [vmem:[#allocation11] sm:$0xff] }
 0x2ae   : > { %v1380_v45 = vsel %vm1331_vm2, %v3961_v43, 0.0  ;;  %v1404_v49 = vpack.c.bf16 %v3961_v43, %v3961_v43  ;;  %v3720_v43 = vld [vmem:[#allocation11 + $0x38] sm:$0xff] }
 0x2af   : > { %3962 = vpow2.f32 %v1366_v44  ;;  %1381 = vadd.xlane.f32.xlu2 %v1380_v45  ;;  %v3719_v45 = vld [vmem:[#allocation11 + $0x30] sm:$0xff] }
 0x2b0   : > { %v1414_v55 = vunpack.c.l.b16 %v1404_v49 }
 0x2b2   : > { %v1352_v47 = vpop.xlane.xlu2 %1351 }
 0x2b3   : > { %v1362_v48 = vsub.f32 %v1327_v18, %v1352_v47 }
 0x2b5   : > { %v3963_v50 = vpop.eup %3962  ;;  %v1376_v51 = vmul.f32 1.442695, %v1362_v48  ;;  %v3716_v48 = vld [vmem:[#allocation11 + $0x18] sm:$0xff] }
 0x2b6   : > { %v1405_v52 = vpack.c.bf16 %v3963_v50, %v3963_v50  ;;  %v1383_v54 = vsel %vm1331_vm2, %v3963_v50, 0.0  ;;  %1608 = vmatpush.bf16.msrb.mxu0 %v3716_v48  ;;  %v1690_v48 = vperm.slane %v4733_v11, 1 }
 0x2b7   : > { %3964 = vpow2.f32 %v1376_v51  ;;  %1384 = vadd.xlane.f32.xlu1 %v1383_v54  ;;  %v3715_v51 = vld [vmem:[#allocation11 + $0x10] sm:$0xff] }
 0x2b8   : > { %v1415_v56 = vunpack.c.l.b16 %v1405_v52  ;;  %v3718_v52 = vld [vmem:[#allocation11 + $0x28] sm:$0xff] }
 0x2b9   : > { %1642 = vmatpush.bf16.msrb.mxu1 %v3718_v52 }
 0x2ba   : > { %v1355_v57 = vpop.xlane.xlu0 %1354  ;;  %v1340_v58 = vpop.xlane.xlu2 %1339  ;;  %v1416_v59 = vpack.c.b16 %v1415_v56, %v1414_v55  ;;  %1609 = vmatpush.bf16.msrb.mxu0 %v3715_v51 }
 0x2bb   : > { %v1363_v60 = vsub.f32 %v1329_v23, %v1355_v57  ;;  %v1358_v61 = vsub.f32 %v1259_v21, %v1340_v58 }
 0x2bc   : > { %3377 = vmatmul.msk.bf16.vlgmr.msrb.gmra.mxu2 %vm1331_vm2, %v1416_v59 }
 0x2bd   : > { %v3965_v62 = vpop.eup %3964  ;;  %v1378_v63 = vmul.f32 1.442695, %v1363_v60  ;;  %v1368_v0 = vmul.f32 1.442695, %v1358_v61  ;;  %1676 = vmatpush.bf16.msrb.mxu2 %v3720_v43 }
 0x2be   : > { %v1398_v1 = vsel %vm1331_vm2, %v3965_v62, 0.0  ;;  %v1410_v5 = vpack.c.bf16 %v3965_v62, %v3965_v62 }
 0x2bf   : > { %3966 = vpow2.f32 %v1378_v63  ;;  %1399 = vadd.xlane.f32.xlu2 %v1398_v1 }
 0x2c0   : > { %3968 = vpow2.f32 %v1368_v0  ;;  %v1498_v15 = vunpack.c.l.b16 %v1410_v5  ;;  %v3717_v0 = vld [vmem:[#allocation11 + $0x20] sm:$0xff] }
 0x2c1   : > { %1677 = vmatpush.bf16.msrb.mxu2 %v3719_v45  ;;  %1643 = vmatpush.bf16.msrb.mxu1 %v3717_v0 }
 0x2c2   : > { %v1343_v3 = vpop.xlane.xlu2 %1342 }
 0x2c3   : > { %v1359_v4 = vsub.f32 %v1261_v27, %v1343_v3 }
 0x2c5   : > { %v3967_v6 = vpop.eup %3966  ;;  %v1370_v7 = vmul.f32 1.442695, %v1359_v4 }
 0x2c6   : > { %v3969_v10 = vpop.eup %3968  ;;  %v1411_v12 = vpack.c.bf16 %v3967_v6, %v3967_v6  ;;  %v1401_v13 = vsel %vm1331_vm2, %v3967_v6, 0.0 }
 0x2c7   : > { %3970 = vpow2.f32 %v1370_v7  ;;  %1402 = vadd.xlane.f32.xlu0 %v1401_v13  ;;  %v1386_v14 = vsel %vm1331_vm2, %v3969_v10, 0.0  ;;  %v1406_v20 = vpack.c.bf16 %v3969_v10, %v3969_v10 }
 0x2c8   : > { %v1499_v16 = vunpack.c.l.b16 %v1411_v12  ;;  %1387 = vadd.xlane.f32.xlu1 %v1386_v14 }
 0x2c9   : > { %v1442_v25 = vunpack.c.l.b16 %v1406_v20 }
 0x2ca   : > { %v1500_v17 = vpack.c.b16 %v1499_v16, %v1498_v15  ;;  %v1346_v18 = vpop.xlane.xlu2 %1345 }
 0x2cb   : > { %v1360_v19 = vsub.f32 %v4864_v30, %v1346_v18 }
 0x2cc   : > { %3392 = vmatmul.msk.bf16.vlgmr.msra.gmra.mxu2 %vm1331_vm2, %v1500_v17 }
 0x2cd   : > { %v3971_v21 = vpop.eup %3970  ;;  %v1372_v22 = vmul.f32 1.442695, %v1360_v19 }
 0x2ce   : > { %v1407_v23 = vpack.c.bf16 %v3971_v21, %v3971_v21  ;;  %v1389_v24 = vsel %vm1331_vm2, %v3971_v21, 0.0 }
 0x2cf   : > { %3972 = vpow2.f32 %v1372_v22  ;;  %1390 = vadd.xlane.f32.xlu2 %v1389_v24 }
 0x2d0   : > { %v1443_v26 = vunpack.c.l.b16 %v1407_v23 }
 0x2d2   : > { %v1349_v27 = vpop.xlane.xlu2 %1348  ;;  %v1444_v28 = vpack.c.b16 %v1443_v26, %v1442_v25 }
 0x2d3   : > { %v1361_v29 = vsub.f32 %v4868_v33, %v1349_v27  ;;  %v3714_v33 = vld [vmem:[#allocation11 + $0x8] sm:$0xff] }
 0x2d4   : > { %3382 = vmatmul.msk.bf16.vlgmr.msrb.gmra.mxu3 %vm1331_vm2, %v1444_v28 }
 0x2d5   : > { %v3973_v31 = vpop.eup %3972  ;;  %v1374_v30 = vmul.f32 1.442695, %v1361_v29  ;;  %1574 = vmatpush.bf16.msra.mxu3 %v3714_v33 }
 0x2d6   : > { %v1392_v32 = vsel %vm1331_vm2, %v3973_v31, 0.0  ;;  %v1408_v34 = vpack.c.bf16 %v3973_v31, %v3973_v31 }
 0x2d7   : > { %3974 = vpow2.f32 %v1374_v30  ;;  %1393 = vadd.xlane.f32.xlu0 %v1392_v32 }
 0x2d8   : > { %v1470_v39 = vunpack.c.l.b16 %v1408_v34 }
 0x2d9   : > { %1575 = vmatpush.bf16.msra.mxu3 %v3713_v42 }
 0x2dd   : > { %v3975_v35 = vpop.eup %3974 }
 0x2de   : > { %v1409_v36 = vpack.c.bf16 %v3975_v35, %v3975_v35  ;;  %v1395_v38 = vsel %vm1331_vm2, %v3975_v35, 0.0 }
 0x2df   : > { %1396 = vadd.xlane.f32.xlu1 %v1395_v38 }
 0x2e0   : > { %v1471_v40 = vunpack.c.l.b16 %v1409_v36 }
 0x2e2   : > { %v1472_v41 = vpack.c.b16 %v1471_v40, %v1470_v39 }
 0x2e4   : > { %3387 = vmatmul.msk.bf16.vlgmr.msra.gmra.mxu1 %vm1331_vm2, %v1472_v41 }
 0x322   : > { %v1382_v44 = vpop.xlane.xlu2 %1381 }
 0x323   : > { %3976 = vrcp.f32 %v1382_v44 }
 0x329   : > { %v3977_v49 = vpop.eup %3976 }
 0x32a   : > { %v1385_v46 = vpop.xlane.xlu1 %1384 }
 0x32b   : > { %3978 = vrcp.f32 %v1385_v46 }
 0x331   : > { %v3979_v54 = vpop.eup %3978 }
 0x332   : > { %v1400_v58 = vpop.xlane.xlu2 %1399 }
 0x333   : > { %3980 = vrcp.f32 %v1400_v58 }
 0x339   : > { %v3981_v3 = vpop.eup %3980 }
 0x33a   : > { %v1403_v62 = vpop.xlane.xlu0 %1402 }
 0x33b   : > { %3982 = vrcp.f32 %v1403_v62  ;;  %v1388_v2 = vpop.xlane.xlu1 %1387  ;;  %v4427_v62 = vmov 128.0  }
 0x33c   : > { %3984 = vrcp.f32 %v1388_v2 }
 0x33f   : > { %v1435_v47 = vpop.f32.mrf.mxu2 }
 0x340   : > { %v1532_v50 = vmul.f32 %v3977_v49, %v1435_v47 }
 0x341   : > { %v3983_v6 = vpop.eup %3982 }
 0x342   : > { %v1540_v56 = vpack.c.bf16 %v1532_v50, %v1532_v50  ;;  %v1391_v5 = vpop.xlane.xlu2 %1390  ;;  %v3985_v15 = vpop.eup %3984 }
 0x343   : > { %3986 = vrcp.f32 %v1391_v5 }
 0x344   : > { %v1550_v60 = vunpack.c.l.b16 %v1540_v56 }
 0x347   : > { %v1437_v55 = vpop.f32.mrf.mxu2 }
 0x348   : > { %v1533_v57 = vmul.f32 %v3979_v54, %v1437_v55 }
 0x349   : > { %v3987_v21 = vpop.eup %3986 }
 0x34a   : > { %v1541_v59 = vpack.c.bf16 %v1533_v57, %v1533_v57  ;;  %v1394_v16 = vpop.xlane.xlu0 %1393 }
 0x34b   : > { %3988 = vrcp.f32 %v1394_v16  ;;  %v3738_v16 = vld [vmem:[#allocation13 + $0x28] sm:$0xff] }
 0x34c   : > { %v1551_v61 = vunpack.c.l.b16 %v1541_v59 }
 0x34e   : > { %v1552_v63 = vpack.c.b16 %v1551_v61, %v1550_v60 }
 0x34f   : > { %v1519_v1 = vpop.f32.mrf.mxu2 }
 0x350   : > { %3401 = vmatmul.msk.bf16.vlgmr.msra.gmra.mxu3 %vm1211_vm1, %v1552_v63  ;;  %v1538_v4 = vmul.f32 %v3981_v3, %v1519_v1 }
 0x351   : > { %v3989_v31 = vpop.eup %3988 }
 0x352   : > { %v1546_v12 = vpack.c.bf16 %v1538_v4, %v1538_v4  ;;  %v1397_v23 = vpop.xlane.xlu1 %1396 }
 0x353   : > { %3990 = vrcp.f32 %v1397_v23  ;;  %v3733_v23 = vld [vmem:[#allocation13] sm:$0xff] }
 0x354   : > { %v1652_v17 = vunpack.c.l.b16 %v1546_v12  ;;  %3992 = vrcp.f32 %v4427_v62  ;;  %v3722_v62 = vld [vmem:[%s4926_s18 + $0x8] sm:$0xff] }
 0x355   : > { %2144 = vmatpush.bf16.msra.mxu0 %v3722_v62 }
 0x357   : > { %v1463_v7 = vpop.f32.mrf.mxu3  ;;  %v1521_v10 = vpop.f32.mrf.mxu2 }
 0x358   : > { %v1539_v13 = vmul.f32 %v3983_v6, %v1521_v10  ;;  %v1534_v18 = vmul.f32 %v3985_v15, %v1463_v7  ;;  %v3739_v15 = vld [vmem:[#allocation13 + $0x30] sm:$0xff] }
 0x359   : > { %v3991_v34 = vpop.eup %3990 }
 0x35a   : > { %v1547_v14 = vpack.c.bf16 %v1539_v13, %v1539_v13  ;;  %v1542_v24 = vpack.c.bf16 %v1534_v18, %v1534_v18  ;;  %v3993_v63 = vpop.eup %3992  ;;  %v3736_v18 = vld [vmem:[#allocation13 + $0x18] sm:$0xff] }
 0x35b   : > { %v1700_v0 = vmul.f32 128.0, %v3993_v63  ;;  %vm1704_vm3 = vweird.f32 %v3993_v63 }
 0x35c   : > { %v1653_v19 = vunpack.c.l.b16 %v1547_v14  ;;  %v1584_v28 = vunpack.c.l.b16 %v1542_v24  ;;  %v3740_v14 = vld [vmem:[#allocation13 + $0x38] sm:$0xff] }
 0x35d   : > { %v1701_v1 = vsub.f32 1.0, %v1700_v0  ;;  %1854 = vmatpush.bf16.msrb.mxu3 %v3740_v14 }
 0x35e   : > { %v1654_v20 = vpack.c.b16 %v1653_v19, %v1652_v17  ;;  %v3737_v17 = vld [vmem:[#allocation13 + $0x20] sm:$0xff]  ;;  %v3735_v19 = vld [vmem:[#allocation13 + $0x10] sm:$0xff] }
 0x35f   : > { %v1465_v22 = vpop.f32.mrf.mxu3  ;;  %v1702_v2 = vmul.f32 %v3993_v63, %v1701_v1 }
 0x360   : > { %v1535_v25 = vmul.f32 %v3987_v21, %v1465_v22  ;;  %3428 = vmatmul.msk.bf16.vlgmr.msrb.gmra.mxu2 %vm1211_vm1, %v1654_v20  ;;  %v3734_v20 = vld [vmem:[#allocation13 + $0x8] sm:$0xff] }
 0x361   : > { %v1491_v26 = vpop.f32.mrf.mxu1  ;;  %v1703_v3 = vadd.f32 %v3993_v63, %v1702_v2  ;;  %1855 = vmatpush.bf16.msrb.mxu3 %v3739_v15  ;;  %v3725_v2 = vld [vmem:[%s4926_s18 + $0x20] sm:$0xff] }
 0x362   : > { %v1543_v27 = vpack.c.bf16 %v1535_v25, %v1535_v25  ;;  %v1536_v32 = vmul.f32 %v3989_v31, %v1491_v26 }
 0x363   : > { %v4903_v4 = vsel %vm1704_vm3, %v3993_v63, %v1703_v3  ;;  %v3724_v63 = vld [vmem:[%s4926_s18 + $0x18] sm:$0xff]  ;;  %v3721_v3 = vld [vmem:[%s4926_s18] sm:$0xff] }
 0x364   : > { %v1585_v29 = vunpack.c.l.b16 %v1543_v27  ;;  %v1544_v36 = vpack.c.bf16 %v1536_v32, %v1536_v32  ;;  %2178 = vmatpush.bf16.msra.mxu1 %v3724_v63  ;;  %2145 = vmatpush.bf16.msra.mxu0 %v3721_v3 }
 0x365   : > { %1856 = vmatpush.bf16.msrb.mxu3 %v3738_v16 }
 0x366   : > { %v1586_v30 = vpack.c.b16 %v1585_v29, %v1584_v28  ;;  %v1618_v40 = vunpack.c.l.b16 %v1544_v36 }
 0x368   : > { %3410 = vmatmul.msk.bf16.vlgmr.msrb.gmra.mxu0 %vm1211_vm1, %v1586_v30 }
 0x369   : > { %v1493_v35 = vpop.f32.mrf.mxu1  ;;  %1857 = vmatpush.bf16.msrb.mxu3 %v3737_v17 }
 0x36a   : > { %v1537_v38 = vmul.f32 %v3991_v34, %v1493_v35 }
 0x36c   : > { %v1545_v39 = vpack.c.bf16 %v1537_v38, %v1537_v38 }
 0x36d   : > { %1858 = vmatpush.bf16.msrb.mxu3 %v3736_v18 }
 0x36e   : > { %v1619_v41 = vunpack.c.l.b16 %v1545_v39 }
 0x370   : > { %v1620_v33 = vpack.c.b16 %v1619_v41, %v1618_v40 }
 0x371   : > { %1859 = vmatpush.bf16.msrb.mxu3 %v3735_v19 }
 0x372   : > { %3419 = vmatmul.msk.bf16.vlgmr.msrb.gmra.mxu1 %vm1211_vm1, %v1620_v33 }
 0x375   : > { %1860 = vmatpush.bf16.msrb.mxu3 %v3734_v20 }
 0x379   : > { %1861 = vmatpush.bf16.msrb.mxu3 %v3733_v23 }
 0x3d3   : > { %v1577_v43 = vpop.f32.mrf.mxu3 }
 0x3db   : > { %v1579_v52 = vpop.f32.mrf.mxu3 }
 0x3e3   : > { %v1679_v45 = vpop.f32.mrf.mxu2 }
 0x3e5   : > { %v1611_v42 = vpop.f32.mrf.mxu0 }
 0x3e6   : > { %v1684_v44 = vadd.f32 %v1611_v42, %v1577_v43  ;;  %v1742_v42 = vperm.slane %v4733_v11, 2 }
 0x3eb   : > { %v1681_v58 = vpop.f32.mrf.mxu2 }
 0x3ed   : > { %v1613_v50 = vpop.f32.mrf.mxu0 }
 0x3ee   : > { %v1685_v54 = vadd.f32 %v1613_v50, %v1579_v52 }
 0x3ef   : > { %v1645_v46 = vpop.f32.mrf.mxu1 }
 0x3f0   : > { %v1686_v47 = vadd.f32 %v1684_v44, %v1645_v46 }
 0x3f2   : > { %v1688_v49 = vadd.f32 %v1686_v47, %v1679_v45  ;;  %v1745_v47 = vperm.slane %v4733_v11, 3 }
 0x3f4   : > { %v1691_v51 = vadd.f32 %v1690_v48, %v1688_v49 }
 0x3f6   : > { %v1693_v55 = vadd.f32 %v1691_v51, %v4726_v8 }
 0x3f7   : > { %v1647_v56 = vpop.f32.mrf.mxu1 }
 0x3f8   : > { %v1687_v57 = vadd.f32 %v1685_v54, %v1647_v56  ;;  %1695 = vadd.xlane.f32.xlu2 %v1693_v55  ;;  %v1805_v54 = vperm.slane %v4733_v11, 4 }
 0x3fa   : > { %v1689_v59 = vadd.f32 %v1687_v57, %v1681_v58 }
 0x3fc   : > { %v1692_v60 = vadd.f32 %v1690_v48, %v1689_v59 }
 0x3fe   : > { %v1694_v61 = vadd.f32 %v1692_v60, %v4729_v9 }
 0x400   : > { %1697 = vadd.xlane.f32.xlu0 %v1694_v61 }
 0x46b   : > { %v1696_v8 = vpop.xlane.xlu2 %1695 }
 0x46c   : > { %v1706_v5 = vmul.f32 %v4903_v4, %v1696_v8  ;;  %v3723_v8 = vld [vmem:[%s4926_s18 + $0x10] sm:$0xff] }
 0x46d   : > { %2179 = vmatpush.bf16.msra.mxu1 %v3723_v8 }
 0x46e   : > { %v1708_v6 = vsub.f32 %v1693_v55, %v1706_v5 }
 0x470   : > { %v1710_v7 = vmul.f32 %v1708_v6, %v1708_v6 }
 0x472   : > { %1712 = vadd.xlane.f32.xlu1 %v1710_v7 }
 0x473   : > { %v1698_v10 = vpop.xlane.xlu0 %1697 }
 0x474   : > { %v1707_v9 = vmul.f32 %v4903_v4, %v1698_v10 }
 0x476   : > { %v1709_v12 = vsub.f32 %v1694_v61, %v1707_v9  ;;  %v3726_v61 = vld [vmem:[%s4926_s18 + $0x28] sm:$0xff] }
 0x477   : > { %2212 = vmatpush.bf16.msra.mxu2 %v3726_v61 }
 0x478   : > { %v1711_v13 = vmul.f32 %v1709_v12, %v1709_v12 }
 0x47a   : > { %1714 = vadd.xlane.f32.xlu2 %v1711_v13 }
 0x47b   : > { %2213 = vmatpush.bf16.msra.mxu2 %v3725_v2 }
 0x4e5   : > { %v1713_v21 = vpop.xlane.xlu1 %1712 }
 0x4e6   : > { %v1716_v22 = vmul.f32 %v1713_v21, %v4903_v4 }
 0x4e8   : > { %v1718_v24 = vadd.f32 1e-05, %v1716_v22 }
 0x4ea   : > { %3994 = vrsqrt.f32 %v1718_v24  ;;  %vm1726_vm5 = vweird.f32 %v1718_v24 }
 0x4ed   : > { %v1715_v25 = vpop.xlane.xlu2 %1714 }
 0x4ee   : > { %v1717_v26 = vmul.f32 %v1715_v25, %v4903_v4 }
 0x4f0   : > { %v3995_v27 = vpop.eup %3994  ;;  %v1719_v28 = vadd.f32 1e-05, %v1717_v26 }
 0x4f1   : > { %v1721_v29 = vmul.f32 %v3995_v27, %v1718_v24  ;;  %vm1727_vm4 = vweird.f32 %v3995_v27 }
 0x4f2   : > { %3996 = vrsqrt.f32 %v1719_v28  ;;  %vm1728_vm6 = vmor %vm1726_vm5, %vm1727_vm4  ;;  %vm1736_vm8 = vweird.f32 %v1719_v28 }
 0x4f3   : > { %v1722_v31 = vmul.f32 %v3995_v27, %v1721_v29 }
 0x4f5   : > { %v1723_v30 = vmul.f32 0.5, %v1722_v31 }
 0x4f7   : > { %v1724_v32 = vsub.f32 1.5, %v1723_v30 }
 0x4f8   : > { %v3997_v34 = vpop.eup %3996 }
 0x4f9   : > { %v1725_v35 = vmul.f32 %v3995_v27, %v1724_v32  ;;  %v1731_v36 = vmul.f32 %v3997_v34, %v1719_v28  ;;  %vm1737_vm7 = vweird.f32 %v3997_v34 }
 0x4fa   : > { %vm1738_vm9 = vmor %vm1736_vm8, %vm1737_vm7 }
 0x4fb   : > { %v1732_v38 = vmul.f32 %v3997_v34, %v1731_v36  ;;  %v1729_v39 = vsel %vm1728_vm6, %v3995_v27, %v1725_v35 }
 0x4fc   : > { %v1740_v33 = vmul.f32 %v1729_v39, %v1708_v6 }
 0x4fd   : > { %v1733_v40 = vmul.f32 0.5, %v1732_v38 }
 0x4fe   : > { %v1743_v46 = vmul.f32 %v1742_v42, %v1740_v33 }
 0x4ff   : > { %v1734_v41 = vsub.f32 1.5, %v1733_v40 }
 0x500   : > { %v4911_v49 = vadd.f32 %v1745_v47, %v1743_v46 }
 0x501   : > { %v1735_v43 = vmul.f32 %v3997_v34, %v1734_v41 }
 0x503   : > { %v1739_v44 = vsel %vm1738_vm9, %v3997_v34, %v1735_v43 }
 0x504   : > { %v1741_v45 = vmul.f32 %v1739_v44, %v1709_v12 }
 0x506   : > { %v1744_v48 = vmul.f32 %v1742_v42, %v1741_v45 }
 0x508   : > { %v4913_v50 = vadd.f32 %v1745_v47, %v1744_v48  ;;  %v3728_v48 = vld [vmem:[%s4926_s18 + $0x38] sm:$0xff] }
 0x509   : > { %2246 = vmatpush.bf16.msrb.mxu0 %v3728_v48 }
 0x50a   : > { %v1804_v51 = vpack.c.bf16 %v4913_v50, %v4911_v49 }
 0x50c   : > { %1862 = vmatmul.bf16.vlgmr.msrb.gmra.mxu3 %v1804_v51 }
 0x58f   : > { %v1863_v52 = vpop.f32.mrf.mxu3 }
 0x590   : > { %v1864_v55 = vadd.f32 %v1863_v52, %v1805_v54 }
 0x592   : > { %v1868_v58 = vmul.f32 0.17677669, %v1864_v55 }
 0x594   : > { %v1892_v9 = vrot.slane %v1868_v58, 4 }
 0x597   : > { %v1865_v56 = vpop.f32.mrf.mxu3 }
 0x598   : > { %v1866_v57 = vadd.f32 %v1865_v56, %v1805_v54 }
 0x59a   : > { %v1869_v59 = vmul.f32 0.17677669, %v1866_v57 }
 0x59c   : > { %v3955_v60 = vpack.i.bf16 %v1869_v59, %v1868_v58  ;;  %v1948_v6 = vrot.slane %v1869_v59, 4 }
 0x59e   : > { %3956 = vrot.lane.b32.xlu2 %v3955_v60, %s4422_s24  ;;  %3951 = vrot.lane.b32.xlu1 %v3955_v60, %s4424_s29  ;;  %s5338_s24 = sld [smem:[#allocation40_spill]] }
 0x59f   : > { %3946 = vrot.lane.b32.xlu0 %v3955_v60, %s4423_s26  ;;  %v3727_v60 = vld [vmem:[%s4926_s18 + $0x30] sm:$0xff]  ;;  %s5340_s18 = sld [smem:[#allocation43_spill]] }
 0x5a0   : > { %2247 = vmatpush.bf16.msrb.mxu0 %v3727_v60 }
 0x5a5   : > { %s3021_s30 = scalar_lea.hbm %s5340_s18, %s3781_s2 }
 0x5a6   : > { %s3024_s14 = sshll.u32 %s3021_s30, 4  ;;  %s3025_s14 = int_to_ptr.hbm [resolvable:$true] %s3024_s14 }
 0x5a7   : > { %s4323_s9 = sshra.s32 %s3025_s14, 4  ;;  %s4324_s9 = int_to_ptr.hbm [resolvable:$true] %s4323_s9 }
 0x5a8   : > { %s4325_s13 = scalar_lea.hbm %s4324_s9, 16 }
 0x5a9   : > { %p4326_p2 = scmp.ne.s32.totalorder %s4324_s9, %s4325_s13 }
 0x5ab   : > { %p4327_p4 = pnand %p4326_p2, %p4606_p5 }
 0x5ad   : > { %p4328_p8 = pneg %p4327_p4 }
 0x5f8   : > { %v3957_v11 = vpop.permute.xlu2 %3956 }
 0x5f9   : > { %v3959_v0 = vunpack.i.h.bf16 %v3957_v11  ;;  %v3958_v1 = vunpack.i.l.bf16 %v3957_v11 }
 0x5fb   : > { %v1958_v13 = vrot.slane %v3959_v0, 4  ;;  %v1902_v14 = vrot.slane %v3958_v1, 4 }
 0x610   : > { %v3952_v5 = vpop.permute.xlu1 %3951 }
 0x611   : > { %v3954_v7 = vunpack.i.h.bf16 %v3952_v5  ;;  %v3953_v10 = vunpack.i.l.bf16 %v3952_v5  ;;  %v3947_v12 = vpop.permute.xlu0 %3946 }
 0x612   : > { %v3949_v15 = vunpack.i.h.bf16 %v3947_v12  ;;  %v3948_v16 = vunpack.i.l.bf16 %v3947_v12 }
 0x613   : > { %v1946_v17 = vrot.slane %v3954_v7, 4  ;;  %v1949_v18 = vsel %vm966_vm0, %v3954_v7, %v1948_v6  ;;  %v1890_v19 = vrot.slane %v3953_v10, 4  ;;  %v1893_v20 = vsel %vm966_vm0, %v3953_v10, %v1892_v9 }
 0x614   : > { %v1957_v21 = vperm.slane %v1949_v18, %v4762_v37  ;;  %v1901_v22 = vperm.slane %v1893_v20, %v4762_v37  ;;  %v1959_v23 = vsel %vm966_vm0, %v1958_v13, %v3949_v15  ;;  %v1960_v24 = vrot.slane %v3949_v15, 4 }
 0x615   : > { %v1947_v25 = vsel %vm966_vm0, %v1946_v17, %v1869_v59  ;;  %v1891_v26 = vsel %vm966_vm0, %v1890_v19, %v1868_v58  ;;  %v1965_v27 = vperm.slane %v1959_v23, %v4762_v37  ;;  %v1903_v28 = vsel %vm966_vm0, %v1902_v14, %v3948_v16 }
 0x616   : > { %v1953_v29 = vperm.slane %v1947_v25, %v4762_v37  ;;  %v1984_v31 = vrot.slane %v1957_v21, 4  ;;  %v1897_v30 = vperm.slane %v1891_v26, %v4762_v37  ;;  %v1961_v32 = vsel %vm966_vm0, %v3959_v0, %v1960_v24 }
 0x617   : > { %v1970_v34 = vrot.slane %v1965_v27, 4  ;;  %v1904_v35 = vrot.slane %v3948_v16, 4  ;;  %v1909_v36 = vperm.slane %v1903_v28, %v4762_v37  ;;  %v1969_v40 = vperm.slane %v1961_v32, %v4762_v37 }
 0x618   : > { %v1972_v38 = vrot.slane %v1953_v29, 4  ;;  %v1916_v39 = vrot.slane %v1897_v30, 4  ;;  %v1928_v41 = vrot.slane %v1901_v22, 4 }
 0x619   : > { %v1971_v33 = vsel %vm966_vm0, %v1970_v34, %v1953_v29  ;;  %v1905_v42 = vsel %vm966_vm0, %v3958_v1, %v1904_v35  ;;  %v1914_v43 = vrot.slane %v1909_v36, 4  ;;  %v1982_v46 = vrot.slane %v1969_v40, 4 }
 0x61a   : > { %v1973_v44 = vsel %vm966_vm0, %v1965_v27, %v1972_v38  ;;  %v1977_v45 = vperm.slane %v1971_v33, %v4774_v53  ;;  %v1985_v47 = vsel %vm966_vm0, %v1969_v40, %v1984_v31  ;;  %v1913_v54 = vperm.slane %v1905_v42, %v4762_v37 }
 0x61b   : > { %v1981_v51 = vperm.slane %v1973_v44, %v4774_v53  ;;  %v1993_v52 = vperm.slane %v1985_v47, %v4774_v53  ;;  %v1915_v55 = vsel %vm966_vm0, %v1914_v43, %v1897_v30  ;;  %v1983_v56 = vsel %vm966_vm0, %v1982_v46, %v1957_v21 }
 0x61c   : > { %v1994_v57 = vrot.slane %v1977_v45, 4  ;;  %v1917_v58 = vsel %vm966_vm0, %v1909_v36, %v1916_v39  ;;  %v1921_v59 = vperm.slane %v1915_v55, %v4774_v53  ;;  %v1989_v11 = vperm.slane %v1983_v56, %v4774_v53 }
 0x61d   : > { %v1996_v61 = vrot.slane %v1981_v51, 4  ;;  %v2000_v62 = vrot.slane %v1993_v52, 4  ;;  %v1925_v63 = vperm.slane %v1917_v58, %v4774_v53  ;;  %v1926_v1 = vrot.slane %v1913_v54, 4 }
 0x61e   : > { %v1995_v0 = vsel %vm966_vm0, 0.0, %v1994_v57  ;;  %v1929_v2 = vsel %vm966_vm0, %v1913_v54, %v1928_v41  ;;  %v1938_v3 = vrot.slane %v1921_v59, 4  ;;  %v1998_v5 = vrot.slane %v1989_v11, 4 }
 0x61f   : > { %v1997_v8 = vsel %vm966_vm0, 0.0, %v1996_v61  ;;  %v2001_v6 = vsel %vm966_vm0, 0.0, %v2000_v62  ;;  %v2056_v7 = vsel %vm966_vm0, %v1996_v61, %v1977_v45  ;;  %v2067_v12 = vsel %vm966_vm0, %v2000_v62, %v1989_v11 }
 0x620   : > { %v2060_v10 = vperm.slane %v2056_v7, %v4762_v37  ;;  %v2061_v9 = vrot.slane %v1997_v8, 4  ;;  %v2072_v13 = vrot.slane %v2001_v6, 4  ;;  %v1999_v14 = vsel %vm966_vm0, 0.0, %v1998_v5 }
 0x621   : > { %v2071_v15 = vperm.slane %v2067_v12, %v4762_v37  ;;  %v1927_v16 = vsel %vm966_vm0, %v1926_v1, %v1901_v22  ;;  %v1937_v17 = vperm.slane %v1929_v2, %v4774_v53  ;;  %v1939_v26 = vsel %vm966_vm0, 0.0, %v1938_v3 }
 0x622   : > { %v2062_v18 = vsel %vm966_vm0, %v2061_v9, %v1995_v0  ;;  %v2073_v19 = vsel %vm966_vm0, %v2072_v13, %v1999_v14  ;;  %v2080_v20 = vrot.slane %v2060_v10, 4  ;;  %v1933_v21 = vperm.slane %v1927_v16, %v4774_v53 }
 0x623   : > { %v2066_v23 = vperm.slane %v2062_v18, %v4762_v37  ;;  %v2077_v24 = vperm.slane %v2073_v19, %v4762_v37  ;;  %v2092_v25 = vrot.slane %v2071_v15, 4  ;;  %v1940_v27 = vrot.slane %v1925_v63, 4 }
 0x624   : > { %v1942_v28 = vrot.slane %v1933_v21, 4  ;;  %v1944_v29 = vrot.slane %v1937_v17, 4 }
 0x625   : > { %v2078_v22 = vrot.slane %v2066_v23, 4  ;;  %v2090_v31 = vrot.slane %v2077_v24, 4  ;;  %v2081_v30 = vsel %vm966_vm0, %v2066_v23, %v2080_v20  ;;  %v2093_v32 = vsel %vm966_vm0, %v2077_v24, %v2092_v25 }
 0x626   : > { %v1941_v34 = vsel %vm966_vm0, 0.0, %v1940_v27  ;;  %v1943_v35 = vsel %vm966_vm0, 0.0, %v1942_v28  ;;  %v1945_v36 = vsel %vm966_vm0, 0.0, %v1944_v29  ;;  %v2002_v38 = vsel %vm966_vm0, %v1940_v27, %v1921_v59 }
 0x627   : > { %v2006_v39 = vperm.slane %v2002_v38, %v4762_v37  ;;  %v2007_v40 = vrot.slane %v1941_v34, 4  ;;  %v2013_v41 = vsel %vm966_vm0, %v1944_v29, %v1933_v21  ;;  %v2018_v33 = vrot.slane %v1945_v36, 4 }
 0x628   : > { %v2017_v42 = vperm.slane %v2013_v41, %v4762_v37  ;;  %v2089_v43 = vperm.slane %v2081_v30, %v4774_v53  ;;  %v2101_v44 = vperm.slane %v2093_v32, %v4774_v53  ;;  %v2079_v45 = vsel %vm966_vm0, %v2078_v22, %v2060_v10  ;;  %v3787_v41 = vld [vmem:[%s4707_s4] sm:$0xff]   ;;  %s790_s4 = scalar_lea.vmem [#allocation17], %s3289_s20 }
 0x629   : > { %v2008_v46 = vsel %vm966_vm0, %v2007_v40, %v1939_v26  ;;  %v2019_v47 = vsel %vm966_vm0, %v2018_v33, %v1943_v35  ;;  %v2026_v48 = vrot.slane %v2006_v39, 4  ;;  %v2085_v51 = vperm.slane %v2079_v45, %v4774_v53  ;;  %s3022_s29 = sshll.u32 %s790_s4, 4  ;;  %s3023_s29 = int_to_ptr.vmem [resolvable:$true] %s3022_s29 }
 0x62a   : > { %v2012_v52 = vperm.slane %v2008_v46, %v4762_v37  ;;  %v2023_v54 = vperm.slane %v2019_v47, %v4762_v37  ;;  %v2038_v55 = vrot.slane %v2017_v42, 4  ;;  %v2106_v56 = vrot.slane %v2101_v44, 4 }
 0x62b   : > { %v2091_v57 = vsel %vm966_vm0, %v2090_v31, %v2071_v15  ;;  %v2104_v58 = vrot.slane %v2085_v51, 4  ;;  %v2108_v30 = vrot.slane %v2089_v43, 4  ;;  %v3788_v33 = vunpack.c.l.bf16 %v3787_v41 }
 0x62c   : > { %v2024_v59 = vrot.slane %v2012_v52, 4  ;;  %v2036_v60 = vrot.slane %v2023_v54, 4  ;;  %v2027_v11 = vsel %vm966_vm0, %v2012_v52, %v2026_v48  ;;  %v2039_v61 = vsel %vm966_vm0, %v2023_v54, %v2038_v55 }
 0x62d   : > { %v2035_v62 = vperm.slane %v2027_v11, %v4774_v53  ;;  %v2047_v63 = vperm.slane %v2039_v61, %v4774_v53  ;;  %v2107_v0 = vsel %vm966_vm0, %v2106_v56, %v2089_v43  ;;  %v2097_v1 = vperm.slane %v2091_v57, %v4774_v53 }
 0x62e   : > { %v2115_v37 = vpack.c.bf16 %v2107_v0, %v2107_v0  ;;  %v2025_v2 = vsel %vm966_vm0, %v2024_v59, %v2006_v39  ;;  %v2037_v3 = vsel %vm966_vm0, %v2036_v60, %v2017_v42  ;;  %v2109_v34 = vsel %vm966_vm0, %v2101_v44, %v2108_v30 }
 0x62f   : > { %v2052_v8 = vrot.slane %v2047_v63, 4  ;;  %v2031_v5 = vperm.slane %v2025_v2, %v4774_v53  ;;  %v2043_v6 = vperm.slane %v2037_v3, %v4774_v53  ;;  %v2102_v7 = vrot.slane %v2097_v1, 4 }
 0x630   : > { %v2105_v10 = vsel %vm966_vm0, %v2097_v1, %v2104_v58  ;;  %v2189_v16 = vunpack.c.l.b16 %v2115_v37  ;;  %v2054_v31 = vrot.slane %v2035_v62, 4  ;;  %v2117_v36 = vpack.c.bf16 %v2109_v34, %v2109_v34 }
 0x631   : > { %v2053_v9 = vsel %vm966_vm0, %v2052_v8, %v2035_v62  ;;  %v2048_v12 = vrot.slane %v2043_v6, 4  ;;  %v2103_v13 = vsel %vm966_vm0, %v2102_v7, %v2085_v51  ;;  %v2050_v14 = vrot.slane %v2031_v5, 4  ;;  %v3730_v8 = vld [vmem:[%s4698_s12 + $0x8] sm:$0xff] }
 0x632   : > { %v2114_v15 = vpack.c.bf16 %v2053_v9, %v2053_v9  ;;  %v2111_v17 = vpack.c.bf16 %v2103_v13, %v2103_v13  ;;  %v2113_v18 = vpack.c.bf16 %v2105_v10, %v2105_v10  ;;  %v2055_v32 = vsel %vm966_vm0, %v2047_v63, %v2054_v31  ;;  %2383 = vmatpush.bf16.msrb.mxu2 %v3730_v8  ;;  %v3729_v10 = vld [vmem:[%s4698_s12] sm:$0xff] }
 0x633   : > { %v2049_v19 = vsel %vm966_vm0, %v2048_v12, %v2031_v5  ;;  %v2051_v20 = vsel %vm966_vm0, %v2043_v6, %v2050_v14  ;;  %v2116_v35 = vpack.c.bf16 %v2055_v32, %v2055_v32  ;;  %v2223_v39 = vunpack.c.l.b16 %v2117_v36  ;;  %v3731_v5 = vld [vmem:[%s4698_s12 + $0x10] sm:$0xff]  ;;  %2355 = vmatpush.bf16.msrb.mxu1 %v3729_v10  ;;  %v3746_v10 = vld [vmem:[#allocation14 + $0x28] sm:$0xff] }
 0x634   : > { %v2188_v21 = vunpack.c.l.b16 %v2114_v15  ;;  %v2110_v23 = vpack.c.bf16 %v2049_v19, %v2049_v19  ;;  %v2121_v53 = vunpack.c.l.b16 %v2111_v17  ;;  %v2112_v24 = vpack.c.bf16 %v2051_v20, %v2051_v20  ;;  %2411 = vmatpush.bf16.msra.mxu3 %v3731_v5 }
 0x635   : > { %v2155_v25 = vunpack.c.l.b16 %v2113_v18  ;;  %v2222_v38 = vunpack.c.l.b16 %v2116_v35  ;;  %v3789_v44 = vunpack.c.h.bf16 %v3787_v41 }
 0x636   : > { %v2190_v26 = vpack.c.b16 %v2189_v16, %v2188_v21  ;;  %v2120_v27 = vunpack.c.l.b16 %v2110_v23  ;;  %v2154_v28 = vunpack.c.l.b16 %v2112_v24  ;;  %v3732_v16 = vld [vmem:[%s4698_s12 + $0x18] sm:$0xff]  ;;  %s5341_s12 = smov %s5340_s18 }
 0x637   : > { %v2224_v40 = vpack.c.b16 %v2223_v39, %v2222_v38  ;;  %s4329_s25 = scalar_lea.hbm %s5341_s12, 32  ;;  %p4330_p10 = scmp.lt.s32.totalorder %s4324_s9, %s5341_s12 }
 0x638   : > { %3487 = vmatmul.msk.bf16.vlgmr.msra.gmra.mxu2 %vm1211_vm1, %v2190_v26  ;;  %v2122_v29 = vpack.c.b16 %v2121_v53, %v2120_v27  ;;  %v2156_v22 = vpack.c.b16 %v2155_v25, %v2154_v28  ;;  %2564 = vmatpush.bf16.msrb.mxu3 %v3746_v10  ;;  %p4331_p11 = scmp.lt.s32.totalorder %s4329_s25, %s4325_s13 }
 0x63a   : > { %3469 = vmatmul.msk.bf16.vlgmr.msra.gmra.mxu0 %vm1211_vm1, %v2122_v29  ;;  %3478 = vmatmul.msk.bf16.vlgmr.msra.gmra.mxu1 %vm1211_vm1, %v2156_v22  ;;  %p4332_p12 = por %p4331_p11, %p4330_p10 }
 0x63b   : > { %2439 = vmatpush.bf16.msra.mxu0 %v3732_v16  ;;  %v3741_v16 = vld [vmem:[#allocation14] sm:$0xff] }
 0x63c   : > { %p4333_p13 = pnand %p4332_p12, %p4328_p8 }
 0x64a   : > { %3496 = vmatmul.msk.bf16.vlgmr.msrb.gmra.mxu0 %vm1211_vm1, %v2224_v40 }
 0x6b7   : > { %v2147_v42 = vpop.f32.mrf.mxu0  ;;  %v2181_v45 = vpop.f32.mrf.mxu1 }
 0x6b8   : > { %v2182_v43 = vadd.f32 %v3788_v33, %v2181_v45  ;;  %v2148_v59 = vadd.f32 %v3788_v33, %v2147_v42 }
 0x6ba   : > { %v2260_v46 = vsel %vm1331_vm2, %v2182_v43, -inf  ;;  %v2254_v0 = vsel %vm1331_vm2, %v2148_v59, -inf }
 0x6bb   : > { %v2215_v47 = vpop.f32.mrf.mxu2  ;;  %2261 = vmax.xlane.f32.xlu0 %v2260_v46 }
 0x6bc   : > { %v2216_v48 = vadd.f32 %v3788_v33, %v2215_v47 }
 0x6be   : > { %v2266_v51 = vsel %vm1331_vm2, %v2216_v48, -inf }
 0x6bf   : > { %2267 = vmax.xlane.f32.xlu2 %v2266_v51  ;;  %v2149_v52 = vpop.f32.mrf.mxu0  ;;  %v2183_v54 = vpop.f32.mrf.mxu1 }
 0x6c0   : > { %v2184_v55 = vadd.f32 %v3789_v44, %v2183_v54  ;;  %v2150_v62 = vadd.f32 %v3789_v44, %v2149_v52 }
 0x6c2   : > { %v2263_v56 = vsel %vm1331_vm2, %v2184_v55, -inf  ;;  %v2257_v1 = vsel %vm1331_vm2, %v2150_v62, -inf }
 0x6c3   : > { %v2217_v57 = vpop.f32.mrf.mxu2  ;;  %2264 = vmax.xlane.f32.xlu1 %v2263_v56 }
 0x6c4   : > { %v2218_v58 = vadd.f32 %v3789_v44, %v2217_v57 }
 0x6c6   : > { %v2269_v60 = vsel %vm1331_vm2, %v2218_v58, -inf }
 0x6c7   : > { %2270 = vmax.xlane.f32.xlu0 %v2269_v60  ;;  %v2249_v11 = vpop.f32.mrf.mxu0 }
 0x6c8   : > { %v2250_v61 = vadd.f32 %v3788_v33, %v2249_v11 }
 0x6ca   : > { %v2272_v63 = vsel %vm1331_vm2, %v2250_v61, -inf }
 0x6cb   : > { %2273 = vmax.xlane.f32.xlu2 %v2272_v63  ;;  %2255 = vmax.xlane.f32.xlu1 %v2254_v0 }
 0x6cf   : > { %v2251_v37 = vpop.f32.mrf.mxu0  ;;  %2258 = vmax.xlane.f32.xlu0 %v2257_v1 }
 0x6d0   : > { %v5028_v2 = vadd.f32 %v3789_v44, %v2251_v37 }
 0x6d2   : > { %v2275_v3 = vsel %vm1331_vm2, %v5028_v2, -inf }
 0x6d3   : > { %2276 = vmax.xlane.f32.xlu1 %v2275_v3 }
 0x72e   : > { %v2262_v6 = vpop.xlane.xlu0 %2261 }
 0x72f   : > { %v2280_v7 = vsub.f32 %v2182_v43, %v2262_v6 }
 0x731   : > { %v2290_v9 = vmul.f32 1.442695, %v2280_v7  ;;  %v3744_v7 = vld [vmem:[#allocation14 + $0x18] sm:$0xff] }
 0x732   : > { %v2268_v12 = vpop.xlane.xlu2 %2267  ;;  %2530 = vmatpush.bf16.msra.mxu2 %v3744_v7 }
 0x733   : > { %3998 = vpow2.f32 %v2290_v9  ;;  %v2282_v13 = vsub.f32 %v2216_v48, %v2268_v12  ;;  %v3742_v9 = vld [vmem:[#allocation14 + $0x8] sm:$0xff]  ;;  %v3743_v12 = vld [vmem:[#allocation14 + $0x10] sm:$0xff] }
 0x734   : > { %2496 = vmatpush.bf16.msra.mxu1 %v3742_v9 }
 0x735   : > { %v2294_v14 = vmul.f32 1.442695, %v2282_v13  ;;  %v3745_v13 = vld [vmem:[#allocation14 + $0x20] sm:$0xff] }
 0x736   : > { %v2265_v15 = vpop.xlane.xlu1 %2264  ;;  %2531 = vmatpush.bf16.msra.mxu2 %v3743_v12  ;;  %2565 = vmatpush.bf16.msrb.mxu3 %v3745_v13 }
 0x737   : > { %4000 = vpow2.f32 %v2294_v14  ;;  %v2281_v17 = vsub.f32 %v2184_v55, %v2265_v15  ;;  %v3748_v15 = vld [vmem:[#allocation14 + $0x38] sm:$0xff] }
 0x738   : > { %2598 = vmatpush.bf16.msrb.mxu0 %v3748_v15  ;;  %2497 = vmatpush.bf16.msra.mxu1 %v3741_v16 }
 0x739   : > { %v3999_v18 = vpop.eup %3998  ;;  %v2292_v19 = vmul.f32 1.442695, %v2281_v17 }
 0x73a   : > { %v2271_v20 = vpop.xlane.xlu0 %2270  ;;  %v2308_v21 = vsel %vm1331_vm2, %v3999_v18, 0.0  ;;  %v2328_v22 = vpack.c.bf16 %v3999_v18, %v3999_v18  ;;  %v3747_v18 = vld [vmem:[#allocation14 + $0x30] sm:$0xff] }
 0x73b   : > { %4002 = vpow2.f32 %v2292_v19  ;;  %v2283_v23 = vsub.f32 %v2218_v58, %v2271_v20  ;;  %2309 = vadd.xlane.f32.xlu0 %v2308_v21 }
 0x73c   : > { %v2364_v39 = vunpack.c.l.b16 %v2328_v22  ;;  %2599 = vmatpush.bf16.msrb.mxu0 %v3747_v18 }
 0x73d   : > { %v4001_v53 = vpop.eup %4000  ;;  %v2296_v24 = vmul.f32 1.442695, %v2283_v23 }
 0x73e   : > { %v2274_v25 = vpop.xlane.xlu2 %2273  ;;  %v2314_v26 = vsel %vm1331_vm2, %v4001_v53, 0.0  ;;  %v2256_v27 = vpop.xlane.xlu1 %2255  ;;  %v2330_v40 = vpack.c.bf16 %v4001_v53, %v4001_v53 }
 0x73f   : > { %4004 = vpow2.f32 %v2296_v24  ;;  %v2284_v28 = vsub.f32 %v2250_v61, %v2274_v25  ;;  %2315 = vadd.xlane.f32.xlu1 %v2314_v26  ;;  %v2278_v29 = vsub.f32 %v2148_v59, %v2256_v27 }
 0x740   : > { %v2392_v51 = vunpack.c.l.b16 %v2330_v40 }
 0x741   : > { %v4003_v31 = vpop.eup %4002  ;;  %v2298_v30 = vmul.f32 1.442695, %v2284_v28  ;;  %v2286_v32 = vmul.f32 1.442695, %v2278_v29 }
 0x742   : > { %v2329_v34 = vpack.c.bf16 %v4003_v31, %v4003_v31  ;;  %v2259_v35 = vpop.xlane.xlu0 %2258  ;;  %v2311_v36 = vsel %vm1331_vm2, %v4003_v31, 0.0 }
 0x743   : > { %v2279_v38 = vsub.f32 %v2150_v62, %v2259_v35  ;;  %2312 = vadd.xlane.f32.xlu2 %v2311_v36  ;;  %4006 = vpow2.f32 %v2286_v32 }
 0x744   : > { %v2365_v41 = vunpack.c.l.b16 %v2329_v34  ;;  %4008 = vpow2.f32 %v2298_v30 }
 0x745   : > { %v4005_v33 = vpop.eup %4004  ;;  %v2288_v42 = vmul.f32 1.442695, %v2279_v38 }
 0x746   : > { %v2366_v45 = vpack.c.b16 %v2365_v41, %v2364_v39  ;;  %v2331_v43 = vpack.c.bf16 %v4005_v33, %v4005_v33  ;;  %v2317_v46 = vsel %vm1331_vm2, %v4005_v33, 0.0  ;;  %v2277_v47 = vpop.xlane.xlu1 %2276 }
 0x747   : > { %4010 = vpow2.f32 %v2288_v42  ;;  %2318 = vadd.xlane.f32.xlu0 %v2317_v46  ;;  %v2285_v48 = vsub.f32 %v5028_v2, %v2277_v47 }
 0x748   : > { %v2393_v44 = vunpack.c.l.b16 %v2331_v43  ;;  %3506 = vmatmul.msk.bf16.vlgmr.msrb.gmra.mxu2 %vm1331_vm2, %v2366_v45 }
 0x749   : > { %v2300_v52 = vmul.f32 1.442695, %v2285_v48  ;;  %v4007_v54 = vpop.eup %4006 }
 0x74a   : > { %v2394_v55 = vpack.c.b16 %v2393_v44, %v2392_v51  ;;  %v4009_v56 = vpop.eup %4008  ;;  %v2302_v57 = vsel %vm1331_vm2, %v4007_v54, 0.0  ;;  %v2326_v58 = vpack.c.bf16 %v4007_v54, %v4007_v54 }
 0x74b   : > { %4012 = vpow2.f32 %v2300_v52  ;;  %2303 = vadd.xlane.f32.xlu2 %v2302_v57  ;;  %v2320_v11 = vsel %vm1331_vm2, %v4009_v56, 0.0  ;;  %v2332_v62 = vpack.c.bf16 %v4009_v56, %v4009_v56 }
 0x74c   : > { %3511 = vmatmul.msk.bf16.vlgmr.msra.gmra.mxu3 %vm1331_vm2, %v2394_v55  ;;  %v2336_v63 = vunpack.c.l.b16 %v2326_v58 }
 0x74d   : > { %v4011_v59 = vpop.eup %4010  ;;  %v2420_v8 = vunpack.c.l.b16 %v2332_v62 }
 0x74e   : > { %v2327_v60 = vpack.c.bf16 %v4011_v59, %v4011_v59  ;;  %v2305_v61 = vsel %vm1331_vm2, %v4011_v59, 0.0 }
 0x74f   : > { %2321 = vadd.xlane.f32.xlu0 %v2320_v11  ;;  %2306 = vadd.xlane.f32.xlu1 %v2305_v61 }
 0x750   : > { %v2337_v0 = vunpack.c.l.b16 %v2327_v60 }
 0x751   : > { %v4013_v1 = vpop.eup %4012 }
 0x752   : > { %v2338_v37 = vpack.c.b16 %v2337_v0, %v2336_v63  ;;  %v2333_v2 = vpack.c.bf16 %v4013_v1, %v4013_v1  ;;  %v2323_v3 = vsel %vm1331_vm2, %v4013_v1, 0.0 }
 0x753   : > { %2324 = vadd.xlane.f32.xlu2 %v2323_v3 }
 0x754   : > { %v2421_v5 = vunpack.c.l.b16 %v2333_v2  ;;  %3501 = vmatmul.msk.bf16.vlgmr.msrb.gmra.mxu1 %vm1331_vm2, %v2338_v37 }
 0x756   : > { %v2422_v6 = vpack.c.b16 %v2421_v5, %v2420_v8 }
 0x758   : > { %3516 = vmatmul.msk.bf16.vlgmr.msra.gmra.mxu0 %vm1331_vm2, %v2422_v6 }
 0x7ae   : > { %v2310_v14 = vpop.xlane.xlu0 %2309 }
 0x7af   : > { %4014 = vrcp.f32 %v2310_v14  ;;  %v5053_v14 = vld [vmem:[#allocation16] sm:$0xff] }
 0x7b0   : > { %v2612_v15 = vperm.slane %v5053_v14, 5 }
 0x7b2   : > { %v2316_v20 = vpop.xlane.xlu1 %2315 }
 0x7b3   : > { %4016 = vrcp.f32 %v2316_v20 }
 0x7b5   : > { %v4015_v53 = vpop.eup %4014 }
 0x7b6   : > { %v2313_v17 = vpop.xlane.xlu2 %2312 }
 0x7b7   : > { %4018 = vrcp.f32 %v2313_v17 }
 0x7b9   : > { %v4017_v29 = vpop.eup %4016 }
 0x7ba   : > { %v2319_v19 = vpop.xlane.xlu0 %2318 }
 0x7bd   : > { %v4019_v22 = vpop.eup %4018 }
 0x7be   : > { %v2304_v21 = vpop.xlane.xlu2 %2303 }
 0x7bf   : > { %4020 = vrcp.f32 %v2304_v21 }
 0x7c0   : > { %4022 = vrcp.f32 %v2319_v19 }
 0x7c2   : > { %v2322_v24 = vpop.xlane.xlu0 %2321  ;;  %v2307_v26 = vpop.xlane.xlu1 %2306 }
 0x7c3   : > { %4024 = vrcp.f32 %v2322_v24 }
 0x7c4   : > { %4026 = vrcp.f32 %v2307_v26 }
 0x7c5   : > { %v4021_v30 = vpop.eup %4020 }
 0x7c6   : > { %v2325_v32 = vpop.xlane.xlu2 %2324  ;;  %v4023_v41 = vpop.eup %4022 }
 0x7c7   : > { %4028 = vrcp.f32 %v2325_v32 }
 0x7c9   : > { %v4025_v42 = vpop.eup %4024 }
 0x7ca   : > { %v4027_v48 = vpop.eup %4026 }
 0x7cb   : > { %v2385_v23 = vpop.f32.mrf.mxu2 }
 0x7cc   : > { %v2456_v27 = vmul.f32 %v4015_v53, %v2385_v23 }
 0x7cd   : > { %v4029_v60 = vpop.eup %4028 }
 0x7ce   : > { %v2464_v34 = vpack.c.bf16 %v2456_v27, %v2456_v27 }
 0x7cf   : > { %v2413_v25 = vpop.f32.mrf.mxu3 }
 0x7d0   : > { %v2458_v35 = vmul.f32 %v4017_v29, %v2413_v25  ;;  %v2506_v45 = vunpack.c.l.b16 %v2464_v34 }
 0x7d1   : > { %v2357_v28 = vpop.f32.mrf.mxu1 }
 0x7d2   : > { %v2454_v38 = vmul.f32 %v4021_v30, %v2357_v28  ;;  %v2466_v43 = vpack.c.bf16 %v2458_v35, %v2458_v35  ;;  %v3764_v35 = vld [vmem:[%s5337_s7 + $0x74] sm:$0xf0] }
 0x7d3   : > { %v2387_v31 = vpop.f32.mrf.mxu2 }
 0x7d4   : > { %v2457_v36 = vmul.f32 %v4019_v22, %v2387_v31  ;;  %v2462_v51 = vpack.c.bf16 %v2454_v38, %v2454_v38  ;;  %v2540_v57 = vunpack.c.l.b16 %v2466_v43  ;;  %v3605_v43 = vld [vmem:[%s5337_s7 + $0x68] sm:$0xf0] }
 0x7d5   : > { %v2441_v39 = vpop.f32.mrf.mxu0 }
 0x7d6   : > { %v2465_v40 = vpack.c.bf16 %v2457_v36, %v2457_v36  ;;  %v2460_v55 = vmul.f32 %v4025_v42, %v2441_v39  ;;  %v2472_v11 = vunpack.c.l.b16 %v2462_v51  ;;  %v3763_v36 = vld [vmem:[%s5337_s7 + $0x74] sm:$0xf]  ;;  %v3613_v39 = vld [vmem:[%s5337_s7 + $0x78] sm:$0xf0]  ;;  %v3761_v42 = vld [vmem:[%s5337_s7 + $0x64] sm:$0xf] }
 0x7d7   : > { %v2415_v33 = vpop.f32.mrf.mxu3  ;;  %v3759_v51 = vld [vmem:[%s5337_s7 + $0x54] sm:$0xf] }
 0x7d8   : > { %v2507_v46 = vunpack.c.l.b16 %v2465_v40  ;;  %v2459_v47 = vmul.f32 %v4023_v41, %v2415_v33  ;;  %v2468_v63 = vpack.c.bf16 %v2460_v55, %v2460_v55  ;;  %v3616_v40 = vor.u32 %v3763_v36, %v3613_v39  ;;  %v3603_v41 = vld [vmem:[%s5337_s7 + $0x60] sm:$0xf]  ;;  %v3762_v33 = vld [vmem:[%s5337_s7 + $0x64] sm:$0xf0] }
 0x7d9   : > { %v2359_v44 = vpop.f32.mrf.mxu1  ;;  %v3587_v55 = vld [vmem:[%s5337_s7 + $0x40] sm:$0xf] }
 0x7da   : > { %v2508_v52 = vpack.c.b16 %v2507_v46, %v2506_v45  ;;  %v2467_v54 = vpack.c.bf16 %v2459_v47, %v2459_v47  ;;  %v2455_v56 = vmul.f32 %v4027_v48, %v2359_v44  ;;  %v2574_v3 = vunpack.c.l.b16 %v2468_v63  ;;  %2780 = vmatpush.bf16.msrb.mxu2 %v3616_v40  ;;  %v3595_v47 = vld [vmem:[%s5337_s7 + $0x50] sm:$0xf]  ;;  %v3760_v48 = vld [vmem:[%s5337_s7 + $0x54] sm:$0xf0]  ;;  %v3769_v39 = vld [vmem:[%s5338_s24 + $0x20] sm:$0xff] }
 0x7db   : > { %v3604_v45 = vor.u32 %v3762_v33, %v3603_v41  ;;  %v3608_v46 = vor.u32 %v3761_v42, %v3605_v43  ;;  %v3596_v44 = vor.u32 %v3760_v48, %v3595_v47 }
 0x7dc   : > { %v2541_v58 = vunpack.c.l.b16 %v2467_v54  ;;  %v2463_v59 = vpack.c.bf16 %v2455_v56, %v2455_v56  ;;  %3534 = vmatmul.msk.bf16.vlgmr.msra.gmra.mxu2 %vm1211_vm1, %v2508_v52  ;;  %v3597_v52 = vld [vmem:[%s5337_s7 + $0x58] sm:$0xf0]  ;;  %v3758_v56 = vld [vmem:[%s5337_s7 + $0x44] sm:$0xf0] }
 0x7dd   : > { %v2443_v61 = vpop.f32.mrf.mxu0  ;;  %v3600_v54 = vor.u32 %v3759_v51, %v3597_v52  ;;  %v2657_v51 = vperm.slane %v5053_v14, 6 }
 0x7de   : > { %v2542_v62 = vpack.c.b16 %v2541_v58, %v2540_v57  ;;  %v2473_v0 = vunpack.c.l.b16 %v2463_v59  ;;  %v2461_v1 = vmul.f32 %v4029_v60, %v2443_v61  ;;  %2781 = vmatpush.bf16.msrb.mxu2 %v3608_v46  ;;  %v3757_v57 = vld [vmem:[%s5337_s7 + $0x44] sm:$0xf]  ;;  %v3588_v58 = vor.u32 %v3758_v56, %v3587_v55  ;;  %v3589_v59 = vld [vmem:[%s5337_s7 + $0x48] sm:$0xf0]  ;;  %v3756_v61 = vld [vmem:[%s5337_s7 + $0x34] sm:$0xf0] }
 0x7df   : > { %v3592_v60 = vor.u32 %v3757_v57, %v3589_v59  ;;  %v2660_v56 = vperm.slane %v5053_v14, 7  ;;  %v3767_v14 = vld [vmem:[%s5338_s24 + $0x10] sm:$0xff] }
 0x7e0   : > { %v2474_v37 = vpack.c.b16 %v2473_v0, %v2472_v11  ;;  %v2469_v2 = vpack.c.bf16 %v2461_v1, %v2461_v1  ;;  %3543 = vmatmul.msk.bf16.vlgmr.msrb.gmra.mxu3 %vm1211_vm1, %v2542_v62  ;;  %v3579_v11 = vld [vmem:[%s5337_s7 + $0x30] sm:$0xf]  ;;  %v3755_v62 = vld [vmem:[%s5337_s7 + $0x34] sm:$0xf]  ;;  %v3581_v0 = vld [vmem:[%s5337_s7 + $0x38] sm:$0xf0] }
 0x7e1   : > { %v3580_v63 = vor.u32 %v3756_v61, %v3579_v11  ;;  %v3584_v1 = vor.u32 %v3755_v62, %v3581_v0  ;;  %v3777_v11 = vld [vmem:[%s5338_s24 + $0x60] sm:$0xff]  ;;  %v3766_v61 = vld [vmem:[%s5338_s24 + $0x8] sm:$0xff]  ;;  %v3775_v62 = vld [vmem:[%s5338_s24 + $0x50] sm:$0xff] }
 0x7e2   : > { %v2575_v8 = vunpack.c.l.b16 %v2469_v2  ;;  %3525 = vmatmul.msk.bf16.vlgmr.msra.gmra.mxu1 %vm1211_vm1, %v2474_v37  ;;  %2782 = vmatpush.bf16.msrb.mxu2 %v3600_v54  ;;  %v3571_v37 = vld [vmem:[%s5337_s7 + $0x20] sm:$0xf]  ;;  %v3754_v2 = vld [vmem:[%s5337_s7 + $0x24] sm:$0xf0] }
 0x7e3   : > { %v3774_v0 = vld [vmem:[%s5338_s24 + $0x48] sm:$0xff] }
 0x7e4   : > { %v2576_v5 = vpack.c.b16 %v2575_v8, %v2574_v3  ;;  %v3753_v3 = vld [vmem:[%s5337_s7 + $0x24] sm:$0xf]  ;;  %v3572_v8 = vor.u32 %v3754_v2, %v3571_v37  ;;  %v2680_v37 = vld [vmem:[%s5339_s11] sm:$0x3] }
 0x7e6   : > { %3552 = vmatmul.msk.bf16.vlgmr.msrb.gmra.mxu0 %vm1211_vm1, %v2576_v5  ;;  %2783 = vmatpush.bf16.msrb.mxu2 %v3592_v60  ;;  %v3573_v5 = vld [vmem:[%s5337_s7 + $0x28] sm:$0xf0] }
 0x7ea   : > { %2784 = vmatpush.bf16.msrb.mxu2 %v3584_v1  ;;  %v3773_v1 = vld [vmem:[%s5338_s24 + $0x40] sm:$0xff] }
 0x85f   : > { %v2499_v6 = vpop.f32.mrf.mxu1  ;;  %v2533_v7 = vpop.f32.mrf.mxu2 }
 0x860   : > { %v2606_v10 = vadd.f32 %v2533_v7, %v2499_v6  ;;  %v3576_v6 = vor.u32 %v3753_v3, %v3573_v5  ;;  %v3563_v7 = vld [vmem:[%s5337_s7 + $0x10] sm:$0xf]  ;;  %v2682_v3 = vperm.slane %v2680_v37, 0 }
 0x862   : > { %2785 = vmatpush.bf16.msrb.mxu2 %v3576_v6 }
 0x863   : > { %v2567_v9 = vpop.f32.mrf.mxu3  ;;  %v2601_v12 = vpop.f32.mrf.mxu0 }
 0x864   : > { %v2608_v13 = vadd.f32 %v2606_v10, %v2567_v9  ;;  %v3752_v10 = vld [vmem:[%s5337_s7 + $0x14] sm:$0xf0]  ;;  %v3751_v9 = vld [vmem:[%s5337_s7 + $0x14] sm:$0xf] }
 0x866   : > { %v2610_v16 = vadd.f32 %v2608_v13, %v2601_v12  ;;  %v3564_v12 = vor.u32 %v3752_v10, %v3563_v7  ;;  %v3565_v13 = vld [vmem:[%s5337_s7 + $0x18] sm:$0xf0]  ;;  %v2683_v7 = vperm.slane %v2680_v37, 1 }
 0x867   : > { %v2501_v17 = vpop.f32.mrf.mxu1  ;;  %v2535_v18 = vpop.f32.mrf.mxu2 }
 0x868   : > { %v2613_v19 = vadd.f32 %v2612_v15, %v2610_v16  ;;  %v2607_v20 = vadd.f32 %v2535_v18, %v2501_v17  ;;  %v3750_v16 = vld [vmem:[%s5337_s7 + $0x4] sm:$0xf0]  ;;  %v3568_v18 = vor.u32 %v3751_v9, %v3565_v13 }
 0x86a   : > { %v2615_v21 = vadd.f32 %v2613_v19, %v4911_v49  ;;  %v3749_v19 = vld [vmem:[%s5337_s7 + $0x4] sm:$0xf]  ;;  %2786 = vmatpush.bf16.msrb.mxu2 %v3568_v18 }
 0x86b   : > { %v2569_v23 = vpop.f32.mrf.mxu3  ;;  %v2603_v53 = vpop.f32.mrf.mxu0 }
 0x86c   : > { %v2609_v24 = vadd.f32 %v2607_v20, %v2569_v23  ;;  %2617 = vadd.xlane.f32.xlu1 %v2615_v21  ;;  %v3557_v20 = vld [vmem:[%s5337_s7 + $0x8] sm:$0xf0] }
 0x86e   : > { %v2611_v25 = vadd.f32 %v2609_v24, %v2603_v53  ;;  %v3560_v53 = vor.u32 %v3749_v19, %v3557_v20 }
 0x870   : > { %v2614_v26 = vadd.f32 %v2612_v15, %v2611_v25  ;;  %v3555_v15 = vld [vmem:[%s5337_s7] sm:$0xf]  ;;  %2787 = vmatpush.bf16.msrb.mxu2 %v3560_v53  ;;  %v3772_v25 = vld [vmem:[%s5338_s24 + $0x38] sm:$0xff] }
 0x871   : > { %v3556_v23 = vor.u32 %v3750_v16, %v3555_v15  ;;  %2929 = vmatpush.bf16.msra.mxu3 %v3772_v25 }
 0x872   : > { %v2616_v27 = vadd.f32 %v2614_v26, %v4913_v50  ;;  %v3611_v50 = vld [vmem:[%s5337_s7 + $0x70] sm:$0xf]  ;;  %v3780_v26 = vld [vmem:[%s5338_s24 + $0x78] sm:$0xff] }
 0x873   : > { %v3612_v38 = vor.u32 %v3764_v35, %v3611_v50  ;;  %2943 = vmatpush.bf16.msra.mxu0 %v3780_v26  ;;  %v3770_v50 = vld [vmem:[%s5338_s24 + $0x28] sm:$0xff] }
 0x874   : > { %2619 = vadd.xlane.f32.xlu0 %v2616_v27  ;;  %v3778_v35 = vld [vmem:[%s5338_s24 + $0x68] sm:$0xff] }
 0x875   : > { %2766 = vmatpush.bf16.msrb.mxu1 %v3612_v38 }
 0x879   : > { %2767 = vmatpush.bf16.msrb.mxu1 %v3604_v45 }
 0x87d   : > { %2768 = vmatpush.bf16.msrb.mxu1 %v3596_v44 }
 0x881   : > { %2769 = vmatpush.bf16.msrb.mxu1 %v3588_v58 }
 0x885   : > { %2770 = vmatpush.bf16.msrb.mxu1 %v3580_v63  ;;  %v3765_v63 = vld [vmem:[%s5338_s24] sm:$0xff] }
 0x889   : > { %2771 = vmatpush.bf16.msrb.mxu1 %v3572_v8 }
 0x88d   : > { %2772 = vmatpush.bf16.msrb.mxu1 %v3564_v12 }
 0x891   : > { %2773 = vmatpush.bf16.msrb.mxu1 %v3556_v23 }
 0x8df   : > { %v2618_v28 = vpop.xlane.xlu1 %2617 }
 0x8e0   : > { %v2621_v29 = vmul.f32 %v2618_v28, %v4903_v4 }
 0x8e2   : > { %v5059_v22 = vsub.f32 %v2615_v21, %v2621_v29  ;;  %v3771_v29 = vld [vmem:[%s5338_s24 + $0x30] sm:$0xff] }
 0x8e3   : > { %2930 = vmatpush.bf16.msra.mxu3 %v3771_v29 }
 0x8e4   : > { %v2625_v31 = vmul.f32 %v5059_v22, %v5059_v22 }
 0x8e6   : > { %2627 = vadd.xlane.f32.xlu2 %v2625_v31  ;;  %v3779_v31 = vld [vmem:[%s5338_s24 + $0x70] sm:$0xff] }
 0x8e7   : > { %v2620_v30 = vpop.xlane.xlu0 %2619  ;;  %2944 = vmatpush.bf16.msra.mxu0 %v3779_v31  ;;  %2931 = vmatpush.bf16.msra.mxu3 %v3770_v50 }
 0x8e8   : > { %v2622_v49 = vmul.f32 %v2620_v30, %v4903_v4 }
 0x8ea   : > { %v5064_v32 = vsub.f32 %v2616_v27, %v2622_v49 }
 0x8eb   : > { %2945 = vmatpush.bf16.msra.mxu0 %v3778_v35  ;;  %2932 = vmatpush.bf16.msra.mxu3 %v3769_v39 }
 0x8ec   : > { %v2626_v34 = vmul.f32 %v5064_v32, %v5064_v32 }
 0x8ee   : > { %2629 = vadd.xlane.f32.xlu1 %v2626_v34 }
 0x8ef   : > { %2946 = vmatpush.bf16.msra.mxu0 %v3777_v11 }
 0x959   : > { %v2628_v17 = vpop.xlane.xlu2 %2627 }
 0x95a   : > { %v2631_v21 = vmul.f32 %v2628_v17, %v4903_v4 }
 0x95c   : > { %v2633_v24 = vadd.f32 1e-05, %v2631_v21  ;;  %v5221_v21 = vld [vmem:[#allocation16 + $0x8] sm:$0x7] }
 0x95d   : > { %v2832_v23 = vperm.slane %v5221_v21, 0 }
 0x95e   : > { %4030 = vrsqrt.f32 %v2633_v24  ;;  %vm2641_vm11 = vweird.f32 %v2633_v24 }
 0x961   : > { %v2630_v27 = vpop.xlane.xlu1 %2629 }
 0x962   : > { %v2632_v28 = vmul.f32 %v2630_v27, %v4903_v4 }
 0x964   : > { %v4031_v30 = vpop.eup %4030  ;;  %v2634_v49 = vadd.f32 1e-05, %v2632_v28 }
 0x965   : > { %v2636_v34 = vmul.f32 %v4031_v30, %v2633_v24  ;;  %vm2642_vm10 = vweird.f32 %v4031_v30 }
 0x966   : > { %4032 = vrsqrt.f32 %v2634_v49  ;;  %vm2643_vm12 = vmor %vm2641_vm11, %vm2642_vm10  ;;  %vm2651_vm14 = vweird.f32 %v2634_v49 }
 0x967   : > { %v2637_v36 = vmul.f32 %v4031_v30, %v2636_v34 }
 0x969   : > { %v2638_v38 = vmul.f32 0.5, %v2637_v36 }
 0x96b   : > { %v2639_v40 = vsub.f32 1.5, %v2638_v38 }
 0x96c   : > { %v4033_v41 = vpop.eup %4032 }
 0x96d   : > { %v2640_v33 = vmul.f32 %v4031_v30, %v2639_v40  ;;  %v2646_v42 = vmul.f32 %v4033_v41, %v2634_v49  ;;  %vm2652_vm13 = vweird.f32 %v4033_v41 }
 0x96e   : > { %vm2653_vm15 = vmor %vm2651_vm14, %vm2652_vm13 }
 0x96f   : > { %v2647_v45 = vmul.f32 %v4033_v41, %v2646_v42  ;;  %v2644_v43 = vsel %vm2643_vm12, %v4031_v30, %v2640_v33 }
 0x970   : > { %v2655_v48 = vmul.f32 %v2644_v43, %v5059_v22  ;;  %v3768_v22 = vld [vmem:[%s5338_s24 + $0x18] sm:$0xff] }
 0x971   : > { %v2648_v46 = vmul.f32 0.5, %v2647_v45  ;;  %2933 = vmatpush.bf16.msra.mxu3 %v3768_v22 }
 0x972   : > { %v2658_v55 = vmul.f32 %v2657_v51, %v2655_v48 }
 0x973   : > { %v2649_v47 = vsub.f32 1.5, %v2648_v46 }
 0x974   : > { %v2661_v58 = vadd.f32 %v2660_v56, %v2658_v55 }
 0x975   : > { %v2650_v44 = vmul.f32 %v4033_v41, %v2649_v47  ;;  %2934 = vmatpush.bf16.msra.mxu3 %v3767_v14 }
 0x977   : > { %v2654_v52 = vsel %vm2653_vm15, %v4033_v41, %v2650_v44 }
 0x978   : > { %v2656_v54 = vmul.f32 %v2654_v52, %v5064_v32  ;;  %v3776_v32 = vld [vmem:[%s5338_s24 + $0x58] sm:$0xff] }
 0x979   : > { %2947 = vmatpush.bf16.msra.mxu0 %v3776_v32  ;;  %2935 = vmatpush.bf16.msra.mxu3 %v3766_v61 }
 0x97a   : > { %v2659_v57 = vmul.f32 %v2657_v51, %v2656_v54 }
 0x97c   : > { %v2662_v59 = vadd.f32 %v2660_v56, %v2659_v57 }
 0x97d   : > { %2948 = vmatpush.bf16.msra.mxu0 %v3775_v62  ;;  %2936 = vmatpush.bf16.msra.mxu3 %v3765_v63 }
 0x97e   : > { %v2663_v60 = vpack.c.bf16 %v2662_v59, %v2661_v58 }
 0x980   : > { %2774 = vmatmul.bf16.vlgmr.msrb.gmra.mxu1 %v2663_v60  ;;  %2788 = vmatmul.bf16.vlgmr.msrb.gmra.mxu2 %v2663_v60 }
 0x981   : > { %2949 = vmatpush.bf16.msra.mxu0 %v3774_v0 }
 0x985   : > { %2950 = vmatpush.bf16.msra.mxu0 %v3773_v1 }
 0x9fd   : > { %v2775_v2 = vpop.f32.mrf.mxu1 }
 0x9fe   : > { %v2776_v5 = vadd.f32 %v2775_v2, %v2682_v3 }
 0xa00   : > { %v2794_v9 = vmax.f32 %v2776_v5, 0.0 }
 0xa03   : > { %v2789_v8 = vpop.f32.mrf.mxu2 }
 0xa04   : > { %v2790_v13 = vadd.f32 %v2789_v8, %v2683_v7 }
 0xa05   : > { %v2777_v6 = vpop.f32.mrf.mxu1 }
 0xa06   : > { %v2778_v10 = vadd.f32 %v2777_v6, %v2682_v3  ;;  %v2795_v18 = vmax.f32 %v2790_v13, 0.0 }
 0xa08   : > { %v2796_v12 = vmax.f32 %v2778_v10, 0.0 }
 0xa0a   : > { %v2798_v15 = vpack.c.bf16 %v2796_v12, %v2794_v9 }
 0xa0b   : > { %v2791_v16 = vpop.f32.mrf.mxu2 }
 0xa0c   : > { %v2792_v17 = vadd.f32 %v2791_v16, %v2683_v7  ;;  %2937 = vmatmul.bf16.vlgmr.msra.gmra.mxu3 %v2798_v15 }
 0xa0e   : > { %v2797_v19 = vmax.f32 %v2792_v17, 0.0 }
 0xa10   : > { %v2799_v20 = vpack.c.bf16 %v2797_v19, %v2795_v18 }
 0xa12   : > { %2951 = vmatmul.bf16.vlgmr.msra.gmra.mxu0 %v2799_v20 }
 0xa8f   : > { %v2938_v53 = vpop.f32.mrf.mxu3  ;;  %v2952_v24 = vpop.f32.mrf.mxu0 }
 0xa90   : > { %v2939_v25 = vadd.f32 %v2938_v53, %v2832_v23 }
 0xa92   : > { %v2953_v26 = vadd.f32 %v2952_v24, %v2939_v25 }
 0xa94   : > { %v2957_v27 = vadd.f32 %v2953_v26, %v2661_v58  ;;  %v2999_v58 = vperm.slane %v5221_v21, 1 }
 0xa96   : > { %2959 = vadd.xlane.f32.xlu0 %v2957_v27 }
 0xa97   : > { %v2940_v28 = vpop.f32.mrf.mxu3  ;;  %v2954_v31 = vpop.f32.mrf.mxu0 }
 0xa98   : > { %v2941_v29 = vadd.f32 %v2940_v28, %v2832_v23 }
 0xa9a   : > { %v2955_v30 = vadd.f32 %v2954_v31, %v2941_v29 }
 0xa9c   : > { %v2958_v49 = vadd.f32 %v2955_v30, %v2662_v59 }
 0xa9e   : > { %2961 = vadd.xlane.f32.xlu2 %v2958_v49 }
 0xb09   : > { %v2960_v34 = vpop.xlane.xlu0 %2959 }
 0xb0a   : > { %v2963_v50 = vmul.f32 %v2960_v34, %v4903_v4 }
 0xb0c   : > { %v2965_v35 = vsub.f32 %v2957_v27, %v2963_v50 }
 0xb0e   : > { %v2967_v36 = vmul.f32 %v2965_v35, %v2965_v35 }
 0xb10   : > { %2969 = vadd.xlane.f32.xlu1 %v2967_v36 }
 0xb11   : > { %v2962_v38 = vpop.xlane.xlu2 %2961 }
 0xb12   : > { %v2964_v39 = vmul.f32 %v2962_v38, %v4903_v4 }
 0xb14   : > { %v2966_v40 = vsub.f32 %v2958_v49, %v2964_v39 }
 0xb16   : > { %v2968_v41 = vmul.f32 %v2966_v40, %v2966_v40 }
 0xb18   : > { %2971 = vadd.xlane.f32.xlu0 %v2968_v41 }
 0xb83   : > { %v2970_v33 = vpop.xlane.xlu1 %2969 }
 0xb84   : > { %v2973_v42 = vmul.f32 %v2970_v33, %v4903_v4 }
 0xb86   : > { %v2975_v45 = vadd.f32 1e-05, %v2973_v42 }
 0xb88   : > { %4034 = vrsqrt.f32 %v2975_v45  ;;  %vm2983_vm1 = vweird.f32 %v2975_v45 }
 0xb8b   : > { %v2972_v43 = vpop.xlane.xlu0 %2971 }
 0xb8c   : > { %v2974_v46 = vmul.f32 %v2972_v43, %v4903_v4  ;;  %v3002_v4 = vperm.slane %v5221_v21, 2 }
 0xb8e   : > { %v4035_v47 = vpop.eup %4034  ;;  %v2976_v48 = vadd.f32 1e-05, %v2974_v46 }
 0xb8f   : > { %v2978_v51 = vmul.f32 %v4035_v47, %v2975_v45  ;;  %vm2984_vm0 = vweird.f32 %v4035_v47 }
 0xb90   : > { %4036 = vrsqrt.f32 %v2976_v48  ;;  %vm2985_vm2 = vmor %vm2983_vm1, %vm2984_vm0  ;;  %vm2993_vm4 = vweird.f32 %v2976_v48 }
 0xb91   : > { %v2979_v44 = vmul.f32 %v4035_v47, %v2978_v51 }
 0xb93   : > { %v2980_v52 = vmul.f32 0.5, %v2979_v44 }
 0xb95   : > { %v2981_v54 = vsub.f32 1.5, %v2980_v52 }
 0xb96   : > { %v4037_v55 = vpop.eup %4036 }
 0xb97   : > { %v2982_v56 = vmul.f32 %v4035_v47, %v2981_v54  ;;  %v2988_v57 = vmul.f32 %v4037_v55, %v2976_v48  ;;  %vm2994_vm3 = vweird.f32 %v4037_v55 }
 0xb98   : > { %vm2995_vm5 = vmor %vm2993_vm4, %vm2994_vm3 }
 0xb99   : > { %v2986_v59 = vsel %vm2985_vm2, %v4035_v47, %v2982_v56  ;;  %v2989_v60 = vmul.f32 %v4037_v55, %v2988_v57 }
 0xb9a   : > { %v2997_v22 = vmul.f32 %v2986_v59, %v2965_v35 }
 0xb9b   : > { %v2990_v11 = vmul.f32 0.5, %v2989_v60 }
 0xb9c   : > { %v3000_v14 = vmul.f32 %v2999_v58, %v2997_v22 }
 0xb9d   : > { %v2991_v32 = vsub.f32 1.5, %v2990_v11 }
 0xb9e   : > { %v3003_v61 = vadd.f32 %v3002_v4, %v3000_v14 }
 0xb9f   : > { %v2992_v62 = vmul.f32 %v4037_v55, %v2991_v32 }
 0xba0   : > { %3005 = vst [vmem:[%s790_s4] sm:$0xff] %v3003_v61 }
 0xba1   : > { %v2996_v63 = vsel %vm2995_vm5, %v4037_v55, %v2992_v62 }
 0xba2   : > { %v2998_v0 = vmul.f32 %v2996_v63, %v2966_v40 }
 0xba4   : > { %v3001_v1 = vmul.f32 %v2999_v58, %v2998_v0 }
 0xba6   : > { %v3004_v37 = vadd.f32 %v3002_v4, %v3001_v1 }
 0xba8   : > { %3006 = vst [vmem:[%s790_s4 + $0x8] sm:$0xff] %v3004_v37 }
 0xba9   : > { %4336 = shalt.err (!%p4333_p13)
}
 0xbaa   : > { %s4428_s3 = smov 128   ;;  %s4429_s10 = smov 8  }
 0xbab   : > { %3818 = dma.vmem_to_hbm [thread:$0]  (%p4606_p5), %s3023_s29, 256, %s3025_s14, %s3008_s21, %s4428_s3, %s4428_s3, %s4429_s10  }
 0xbac PF: > { %s5343_s1 = sld [smem:[#allocation25_spill]]  ;;  %p5345_p0 = scmp.ge.s32.totalorder %s4411_s23, 2 }
 0xbae   : > { %p3850_p3 = pnand %p5345_p0, %p4555_p6 }
 0xbb0   : > { %p3851_p7 = pneg %p3850_p3 }
 0xbb2   : > { %s3039_s11 = sand.u32 1, %s5343_s1  }
 0xbb3   : > { %s3040_s2 = scalar_lea.sflag [#allocation4], %s3039_s11 }
 0xbb4   : > { %4386 = dma.done.wait (%p3851_p7), %s3040_s2, 256  }
 0xbb5   : > { %4388 = vsyncadd (%p3851_p7), %s3040_s2, 4294967040  ;;  %s39_s23 = sadd.s32 1, %s4411_s23   ;;  %s5346_s16 = sld [smem:[#allocation26_spill]] }
 0xbb6   : > { %p36_p9 = scmp.ge.s32.totalorder %s39_s23, 4   ;;  %s5347_s20 = sld [smem:[#allocation30_spill]] }
 0xbb7   : > { %s5348_s15 = sld [smem:[#allocation28_spill]]  ;;  %s5349_s18 = smov %s4395_s19 }
 0xbb8   : > { %s5351_s21 = smov %s4407_s22 }
 0xbb9   :  { %38 = sbr.rel (!%p36_p9) target bundleno = 26 (0x1a), region = 191 }
 0xbbb   : > { %s5350_s19 = smov %s5346_s16 }
 0xbbd   : > { %s5352_s22 = smov %s5348_s15 }
 0xbbe   :  { %3046 = vsyncpa [#allocation3], 1 }
 0xbbf   :  { %3048 = vsyncpa [#allocation3 + $0x1], 1 }
 0xbc0   :  { %3049 = vsyncpa [#allocation6], 1 }
 0xbc1   :  { %3051 = vsyncpa [#allocation6 + $0x1], 1 }
 0xbc2   :  { %3052 = vsyncpa [#allocation9], 1 }
 0xbc3   :  { %3054 = vsyncpa [#allocation9 + $0x1], 1 }
 0xbc4   :  { %3055 = vsyncpa [#allocation12], 1 }
 0xbc5   :  { %3056 = vsyncpa [#allocation15], 1 }
 0xbc6   :  { %3057 = vsyncpa [#allocation4], 1 }
 0xbc7   :  { %3059 = vsyncpa [#allocation4 + $0x1], 1 }

// kernel: tpu_custom_call.1
= control target key start
LH: loop header
LB: loop body
LE: loop exit
PB: predicated region body
PF: predicated region fallthrough
CT: control target
= control target key end

     0   :  { %s5270_s0 = inlined_call_operand.hbm [shape: f32[2,16,128], index: 0, kind: input, shape index: {}]   ;;  %s5271_s1 = inlined_call_operand.vmem [shape: bf16[2,4,32,16], index: 1, kind: input, shape index: {}]   ;;  %s5272_s2 = inlined_call_operand.vmem [shape: bf16[2,4,16,32], index: 2, kind: input, shape index: {}]   ;;  %s5273_s3 = inlined_call_operand.vmem [shape: bf16[2,4,32,16], index: 3, kind: input, shape index: {}]   ;;  %s5274_s4 = inlined_call_operand.hbm [shape: bf16[2,4,16,32], index: 4, kind: input, shape index: {}]   ;;  %s5275_s5 = inlined_call_operand.hbm [shape: bf16[2,16,16], index: 5, kind: input, shape index: {}]   ;;  %s5276_s6 = inlined_call_operand.hbm [shape: bf16[2,16,16], index: 6, kind: input, shape index: {}]   ;;  %s5277_s7 = inlined_call_operand.hbm [shape: bf16[128,128], index: 7, kind: input, shape index: {}]   ;;  %s5278_s8 = inlined_call_operand.hbm [shape: bf16[4,32,128], index: 8, kind: input, shape index: {}]   ;;  %s5279_s9 = inlined_call_operand.hbm [shape: bf16[128,128], index: 9, kind: input, shape index: {}]   ;;  %s5280_s10 = inlined_call_operand.hbm [shape: bf16[4,32,128], index: 10, kind: input, shape index: {}]   ;;  %s5281_s11 = inlined_call_operand.vmem [shape: bf16[128,256], index: 11, kind: input, shape index: {}]   ;;  %s5282_s12 = inlined_call_operand.vmem [shape: bf16[256,128], index: 12, kind: input, shape index: {}]   ;;  %s5283_s13 = inlined_call_operand.hbm [shape: f32[11,128], index: 13, kind: input, shape index: {}]   ;;  %s5284_s14 = inlined_call_operand.vmem [shape: f32[1,256], index: 14, kind: input, shape index: {}]   ;;  %s5285_s15 = inlined_call_operand.hbm [shape: f32[2,16,128], index: 15, kind: output, shape index: {}]  }
   0x1   :  { %5300 = sst [smem:[#allocation31_spill]] %s5271_s1 }
   0x2   :  { %5301 = sst [smem:[#allocation32_spill]] %s5272_s2 }
   0x3   :  { %5302 = sst [smem:[#allocation33_spill]] %s5273_s3 }
   0x4   :  { %5303 = sst [smem:[#allocation34_spill]] %s5274_s4 }
   0x5   :  { %5304 = sst [smem:[#allocation35_spill]] %s5277_s7 }
   0x6   :  { %5305 = sst [smem:[#allocation36_spill]] %s5278_s8 }
   0x7   :  { %5306 = sst [smem:[#allocation37_spill]] %s5279_s9 }
   0x8   :  { %5307 = sst [smem:[#allocation38_spill]] %s5280_s10 }
   0x9   :  { %5308 = sst [smem:[#allocation39_spill]] %s5281_s11 }
   0xa   :  { %5309 = sst [smem:[#allocation40_spill]] %s5282_s12 }
   0xb   :  { %5310 = sst [smem:[#allocation41_spill]] %s5283_s13 }
   0xc   :  { %5311 = sst [smem:[#allocation42_spill]] %s5284_s14 }
   0xd   :  { %5312 = sst [smem:[#allocation43_spill]] %s5285_s15 }
   0xe   :  { %20 = vsyncpa [#allocation3], 0 }
   0xf   :  { %22 = vsyncpa [#allocation3 + $0x1], 0 }
  0x10   :  { %23 = vsyncpa [#allocation6], 0 }
  0x11   :  { %25 = vsyncpa [#allocation6 + $0x1], 0 }
  0x12   :  { %26 = vsyncpa [#allocation9], 0 }
  0x13   :  { %28 = vsyncpa [#allocation9 + $0x1], 0 }
  0x14   :  { %29 = vsyncpa [#allocation12], 0 }
  0x15   :  { %30 = vsyncpa [#allocation15], 0 }
  0x16   :  { %31 = vsyncpa [#allocation4], 0 }
  0x17   :  { %33 = vsyncpa [#allocation4 + $0x1], 0  ;;  %s4510_s18 = smov 0   ;;  %s4512_s19 = smov 0  }
  0x18   :  { %s4514_s20 = smov 0   ;;  %s4516_s21 = smov 0  }
  0x19   :  { %s4518_s22 = smov 0   ;;  %s4520_s23 = smov 0  }
  0x1a LB: > { %5313 = sst [smem:[#allocation25_spill]] %s4391_s18  ;;  %s4541_s24 = sadd.s32 4294967295, %s4411_s23   ;;  %s4411_s23 = sphi %s4520_s23, %s39_s23   ;;  %s4407_s22 = sphi %s4518_s22, %s5352_s22   ;;  %s4403_s21 = sphi %s4516_s21, %s5351_s21   ;;  %s4399_s20 = sphi %s4514_s20, %s5347_s20   ;;  %s4395_s19 = sphi %s4512_s19, %s5350_s19   ;;  %s4391_s18 = sphi %s4510_s18, %s5349_s18  }
  0x1b   : > { %5314 = sst [smem:[#allocation26_spill]] %s4399_s20  ;;  %s3268_s25 = sadd.s32 4294967294, %s4411_s23  }
  0x1c   : > { %p73_p0 = scmp.ne.s32.totalorder %s4395_s19, %s4391_s18  ;;  %p74_p1 = scmp.eq.s32.totalorder %s4541_s24, 0 }
  0x1d   : > { %p427_p2 = scmp.eq.s32.totalorder %s4541_s24, 1  ;;  %p433_p3 = scmp.eq.s32.totalorder %s3268_s25, 1 }
  0x1e   : > { %p4550_p4 = por %p74_p1, %p73_p0  ;;  %p3269_p5 = scmp.ge.s32.totalorder %s4411_s23, 1 }
  0x1f   : > { %p4555_p6 = por %p433_p3, %p73_p0  ;;  %p440_p7 = scmp.lt.s32.totalorder %s4411_s23, 3 }
  0x20   : > { %s5318_s7 = sld [smem:[#allocation35_spill]]  ;;  %s4413_s17 = smov [#allocation10]  }
  0x21   : > { %s5316_s27 = scalar_select %p4555_p6, 1, 0 }
  0x22   : > { %p4563_p8 = pnand %p3269_p5, %p440_p7  ;;  %s453_s25 = sshll.u32 %s4413_s17, 4  ;;  %s454_s25 = int_to_ptr.vmem [resolvable:$true] %s453_s25 }
  0x23   : > { %5317 = sst [smem:[#allocation27_spill]] %s5316_s27  ;;  %s5291_s27 = smov 64  }
  0x24   : > { %p3820_p9 = pneg %p4563_p8  ;;  %s5321_s8 = sld [smem:[#allocation36_spill]] }
  0x25   : > { %s5293_s17 = smov 4   ;;  %s4416_s15 = smov [#allocation11]  }
  0x26   : > { %s451_s30 = sshll.u32 %s5318_s7, 4  ;;  %p4571_p10 = pnand %p3820_p9, %p74_p1  ;;  %s452_s30 = int_to_ptr.hbm [resolvable:$true] %s451_s30 }
  0x27   : > { %s467_s14 = sshll.u32 %s4416_s15, 4  ;;  %s5322_s10 = sld [smem:[#allocation38_spill]]  ;;  %s468_s14 = int_to_ptr.vmem [resolvable:$true] %s467_s14 }
  0x28   : > { %3823 = dma.hbm_to_vmem [thread:$0]  (!%p4571_p10), %s452_s30, 1024, %s454_s25, [#allocation9], %s5291_s27, %s5291_s27, %s5293_s17  }
  0x29   : > { %s4417_s29 = smov [#allocation14]   ;;  %s51_s11 = sadd.s32 1, %s4407_s22 }
  0x2a   : > { %s465_s7 = sshll.u32 %s5321_s8, 4  ;;  %s495_s8 = sshll.u32 %s4417_s29, 4  ;;  %s466_s7 = int_to_ptr.hbm [resolvable:$true] %s465_s7  ;;  %s496_s8 = int_to_ptr.vmem [resolvable:$true] %s495_s8 }
  0x2b   : > { %3826 = dma.hbm_to_vmem [thread:$0]  (!%p4571_p10), %s466_s7, 1024, %s468_s14, [#allocation12], %s5291_s27, %s5291_s27, %s5293_s17  }
  0x2c   : > { %p53_p12 = scmp.ge.s32.totalorder %s51_s11, 2  ;;  %s60_s12 = sadd.s32 1, %s4399_s20 }
  0x2d   : > { %s493_s28 = sshll.u32 %s5322_s10, 4  ;;  %p67_p13 = scmp.ne.s32.totalorder %s4399_s20, %s4395_s19  ;;  %s494_s28 = int_to_ptr.hbm [resolvable:$true] %s493_s28 }
  0x2e   : > { %3832 = dma.hbm_to_vmem [thread:$0]  (!%p4571_p10), %s494_s28, 1024, %s496_s8, [#allocation15], %s5291_s27, %s5291_s27, %s5293_s17  }
  0x2f   : > { %p68_p0 = scmp.eq.s32.totalorder %s4411_s23, 0  ;;  %s5354_s11 = smov (%p53_p12, %s51_s11), 0 }
  0x30   : > { %5323 = sst [smem:[#allocation28_spill]] %s5354_s11  ;;  %p4606_p5 = por %p427_p2, %p67_p13 }
  0x31   : > { %p69_p3 = por %p68_p0, %p67_p13  ;;  %s55_s14 = ssub.s32 %s4407_s22, %s5354_s11 }
  0x32   : > { %s5324_s7 = scalar_select %p4606_p5, 1, 0 }
  0x33   : > { %p3858_p7 = scmp.lt.s32.totalorder %s4411_s23, 2  ;;  %p58_p9 = scmp.eq.s32.totalorder %s55_s14, 0 }
  0x34   : > { %5325 = sst [smem:[#allocation29_spill]] %s5324_s7  ;;  %s4614_s8 = sand.u32 1, %s4399_s20  }
  0x35   : > { %p4616_p11 = pnand %p3858_p7, %p69_p3  ;;  %s5298_s30 = sand.u32 1, %s4411_s23  }
  0x36   : > { %s4622_s25 = scalar_select %p58_p9, %s4399_s20, %s60_s12  }
  0x37   : > { %s3279_s28 = sshll.u32 %s4614_s8, 5  ;;  %s3687_s29 = sshll.u32 %s4407_s22, 5 }
  0x38   : > { %5327 = sst [smem:[#allocation30_spill]] %s4622_s25  ;;  %s584_s14 = scalar_lea.vmem [#allocation5], %s3279_s28 }
  0x39   : > { %s5328_s4 = sld [smem:[#allocation34_spill]]  ;;  %s592_s7 = sshll.u32 %s584_s14, 4  ;;  %s593_s7 = int_to_ptr.vmem [resolvable:$true] %s592_s7 }
  0x3a   : > { %s4631_s3 = scalar_lea.sflag [#allocation6], %s5298_s30  ;;  %s5329_s2 = smov 4  }
  0x3b   : > { %s5330_s12 = smov 64   ;;  %s5331_s9 = sld [smem:[#allocation37_spill]] }
  0x3c   : > { %s4418_s17 = smov [#allocation13]   ;;  %s5332_s13 = sld [smem:[#allocation41_spill]] }
  0x3d   : > { %s481_s28 = sshll.u32 %s4418_s17, 4  ;;  %s4420_s25 = smov 128   ;;  %s482_s28 = int_to_ptr.vmem [resolvable:$true] %s481_s28 }
  0x3e   : > { %s4421_s27 = smov 8   ;;  %s3276_s17 = sshll.u32 %s4614_s8, 4 }
  0x3f   : > { %s589_s10 = scalar_lea.hbm %s5328_s4, %s3687_s29  ;;  %s3686_s29 = sshll.u32 %s4407_s22, 4 }
  0x40   : > { %s590_s11 = sshll.u32 %s589_s10, 4  ;;  %s3282_s20 = sshll.u32 %s4614_s8, 3  ;;  %s591_s11 = int_to_ptr.hbm [resolvable:$true] %s590_s11 }
  0x41   : > { %3842 = dma.hbm_to_vmem [thread:$0]  (!%p4616_p11), %s591_s11, 512, %s593_s7, %s4631_s3, %s5330_s12, %s5330_s12, %s5329_s2  }
  0x42   : > { %s479_s10 = sshll.u32 %s5331_s9, 4  ;;  %s513_s30 = sshll.u32 %s5332_s13, 4  ;;  %s480_s10 = int_to_ptr.hbm [resolvable:$true] %s479_s10  ;;  %s514_s30 = int_to_ptr.hbm [resolvable:$true] %s513_s30 }
  0x43   : > { %3829 = dma.hbm_to_vmem [thread:$0]  (!%p4571_p10), %s480_s10, 1024, %s482_s28, [#allocation12], %s5330_s12, %s5330_s12, %s5329_s2  }
  0x44   : > { %s4419_s11 = smov [#allocation16]   ;;  %s543_s9 = scalar_lea.hbm %s5270_s0, %s3686_s29 }
  0x45   : > { %s515_s7 = sshll.u32 %s4419_s11, 4  ;;  %s544_s13 = sshll.u32 %s543_s9, 4  ;;  %s516_s7 = int_to_ptr.vmem [resolvable:$true] %s515_s7  ;;  %s545_s13 = int_to_ptr.hbm [resolvable:$true] %s544_s13 }
  0x46   : > { %3835 = dma.hbm_to_vmem [thread:$0]  (!%p4571_p10), %s514_s30, 256, %s516_s7, [#allocation15], %s4420_s25, %s4420_s25, %s4421_s27  }
  0x47   : > { %s536_s10 = scalar_lea.vmem [#allocation2], %s3276_s17  ;;  %s533_s11 = scalar_lea.sflag [#allocation3], %s4614_s8 }
  0x48   : > { %s546_s28 = sshll.u32 %s536_s10, 4  ;;  %s3688_s18 = sshll.u32 %s4407_s22, 3  ;;  %s547_s28 = int_to_ptr.vmem [resolvable:$true] %s546_s28 }
  0x49   : > { %3839 = dma.hbm_to_vmem [thread:$0]  (!%p4616_p11), %s545_s13, 256, %s547_s28, %s533_s11, %s4420_s25, %s4420_s25, %s4421_s27  }
  0x4a   : > { %s613_s1 = scalar_lea.hbm %s5275_s5, %s3688_s18  ;;  %s606_s29 = scalar_lea.vmem [#allocation7], %s3282_s20 }
  0x4b   : > { %s614_s4 = sshll.u32 %s613_s1, 4  ;;  %s616_s14 = sshll.u32 %s606_s29, 4  ;;  %s615_s4 = int_to_ptr.hbm [resolvable:$true] %s614_s4  ;;  %s617_s14 = int_to_ptr.vmem [resolvable:$true] %s616_s14 }
  0x4c   : > { %3845 = dma.hbm_to_vmem [thread:$0]  (!%p4616_p11), %s615_s4, 128, %s617_s14, %s4631_s3, %s5330_s12, %s5330_s12, %s5329_s2  }
  0x4d   : > { %s637_s8 = scalar_lea.hbm %s5276_s6, %s3688_s18  ;;  %s630_s27 = scalar_lea.vmem [#allocation8], %s3282_s20 }
  0x4e   : > { %s638_s25 = sshll.u32 %s637_s8, 4  ;;  %s640_s17 = sshll.u32 %s630_s27, 4  ;;  %s639_s25 = int_to_ptr.hbm [resolvable:$true] %s638_s25  ;;  %s641_s17 = int_to_ptr.vmem [resolvable:$true] %s640_s17 }
  0x4f   : > { %s5333_s10 = sand.u32 1, %s4411_s23   ;;  %652 = sbr.rel (%p4563_p8) target bundleno = 2988 (0xbac), region = 80 }
  0x50   : > { %s627_s1 = scalar_lea.sflag [#allocation9], %s5333_s10  ;;  %s4684_s3 = sand.u32 (!%p4563_p8), 1, %s4395_s19  }
  0x51   : > { %3848 = dma.hbm_to_vmem [thread:$0]  (!%p4616_p11), %s639_s25, 128, %s641_s17, %s627_s1, %s5330_s12, %s5330_s12, %s5329_s2  }
  0x52   : > { %s3289_s20 = sshll.u32 (!%p4563_p8), %s4684_s3, 4  ;;  %s655_s28 = scalar_lea.sflag (!%p4563_p8), [#allocation3], %s4684_s3 }
  0x53   : > { %s4690_s11 = scalar_lea.vmem (!%p4563_p8), [#allocation2], %s3289_s20 }
  0x54   : > { %4362 = dma.done.wait (%p4550_p4), %s655_s28, 256  }
  0x55   : > { %4364 = vsyncadd (%p4550_p4), %s655_s28, 4294967040  ;;  %s664_s2 = sand.u32 1, %s4541_s24   ;;  %s3290_s16 = sshll.u32 %s4684_s3, 5 }
  0x56   : > { %s665_s15 = scalar_lea.sflag [#allocation6], %s664_s2  ;;  %s4698_s12 = scalar_lea.vmem [#allocation5], %s3290_s16 }
  0x57   : > { %4366 = dma.done.wait (%p4550_p4), %s665_s15, 640  }
  0x58   : > { %4368 = vsyncadd (%p4550_p4), %s665_s15, 4294966656  ;;  %s3291_s18 = sshll.u32 %s4684_s3, 3  ;;  %s685_s7 = scalar_lea.sflag [#allocation9], %s664_s2 }
  0x59   : > { %s4705_s30 = scalar_lea.vmem [#allocation7], %s3291_s18  ;;  %s4707_s4 = scalar_lea.vmem [#allocation8], %s3291_s18 }
  0x5a   : > { %4370 = dma.done.wait (%p4550_p4), %s685_s7, 128  }
  0x5b   : > { %4372 = vsyncadd (%p4550_p4), %s685_s7, 4294967168 }
  0x5c   : > { %4374 = dma.done.wait (%p74_p1), [#allocation9], 1024  }
  0x5d   : > { %4376 = vsyncadd (%p74_p1), [#allocation9], 4294966272 }
  0x5e   : > { %4378 = dma.done.wait (%p74_p1), [#allocation12], 2048  }
  0x5f   : > { %4380 = vsyncadd (%p74_p1), [#allocation12], 4294965248 }
  0x60   : > { %4382 = dma.done.wait (%p74_p1), [#allocation15], 1280  }
  0x61   : > { %4384 = vsyncadd (%p74_p1), [#allocation15], 4294966016  ;;  %v3712_v0 = vld [vmem:[#allocation10 + $0x38] sm:$0xff]  ;;  %v3711_v1 = vld [vmem:[#allocation10 + $0x30] sm:$0xff]  ;;  %s4422_s24 = smov 32   ;;  %s4423_s26 = smov 96  }
  0x62   : > { %929 = vmatpush.bf16.msra.mxu0 %v3712_v0  ;;  %v3710_v2 = vld [vmem:[#allocation10 + $0x28] sm:$0xff]  ;;  %v3709_v3 = vld [vmem:[#allocation10 + $0x20] sm:$0xff]  ;;  %v3708_v4 = vld [vmem:[#allocation10 + $0x18] sm:$0xff]  ;;  %s4424_s29 = smov 64   ;;  %p792_p1 = scmp.lt.s32.totalorder %s4403_s21, 1  ;;  %vm966_vm0 = vcmask 1047556  }
  0x63   : > { %v3707_v5 = vld [vmem:[#allocation10 + $0x10] sm:$0xff]  ;;  %v3706_v6 = vld [vmem:[#allocation10 + $0x8] sm:$0xff]  ;;  %v3705_v7 = vld [vmem:[#allocation10] sm:$0xff]  ;;  %s5334_s25 = sld [smem:[#allocation31_spill]]  ;;  %v4425_v26 = vmov 1983009808  }
  0x64   : > { %v4726_v8 = vld [vmem:[%s4690_s11] sm:$0xff]  ;;  %v4729_v9 = vld [vmem:[%s4690_s11 + $0x8] sm:$0xff]  ;;  %s4747_s14 = scalar_select %p792_p1, %s4403_s21, 1  ;;  %v971_v27 = vunpack.c.l.s4 %v4425_v26  ;;  %v4426_v42 = vmov 1934713408   ;;  %vm1211_vm1 = vcmask 261120  }
  0x65   : > { %v879_v10 = vpack.c.bf16 %v4729_v9, %v4726_v8  ;;  %v4733_v11 = vld [vmem:[#allocation16] sm:$0xff]  ;;  %v995_v43 = vunpack.c.l.s4 %v4426_v42  ;;  %vm1331_vm2 = vcmask 130048   ;;  %s5335_s28 = sld [smem:[#allocation32_spill]]  ;;  %s3781_s2 = sshll.u32 %s4403_s21, 4 }
  0x66   : > { %930 = vmatpush.bf16.msra.mxu0 %v3711_v1  ;;  %v880_v13 = vperm.slane %v4733_v11, 0  ;;  %s3690_s9 = sshll.u32 %s4747_s14, 6  ;;  %v4762_v37 = vunpack.c.0.s8 %v971_v27  ;;  %s3691_s17 = sshll.u32 %s4747_s14, 5 }
  0x67   : > { %v4774_v53 = vunpack.c.0.s8 %v995_v43  ;;  %s5336_s15 = sld [smem:[#allocation33_spill]]  ;;  %s3008_s21 = scalar_lea.sflag [#allocation4], %s4684_s3 }
  0x68   : > { %s5337_s7 = sld [smem:[#allocation39_spill]] }
  0x69   : > { %s4755_s27 = scalar_lea.vmem %s5334_s25, %s3690_s9 }
  0x6a   : > { %931 = vmatpush.bf16.msra.mxu0 %v3710_v2  ;;  %v3698_v20 = vld [vmem:[%s4755_s27 + $0x28] sm:$0xff]  ;;  %v3696_v22 = vld [vmem:[%s4755_s27 + $0x18] sm:$0xff]  ;;  %v3697_v23 = vld [vmem:[%s4755_s27 + $0x20] sm:$0xff] }
  0x6b   : > { %v3694_v21 = vld [vmem:[%s4755_s27 + $0x8] sm:$0xff]  ;;  %1289 = vmatpush.bf16.msra.mxu3 %v3698_v20  ;;  %v3693_v24 = vld [vmem:[%s4755_s27] sm:$0xff]  ;;  %1255 = vmatpush.bf16.msra.mxu2 %v3696_v22  ;;  %v3695_v58 = vld [vmem:[%s4755_s27 + $0x10] sm:$0xff]  ;;  %s4876_s11 = scalar_lea.vmem %s5335_s28, %s3691_s17 }
  0x6c   : > { %1221 = vmatpush.bf16.msra.mxu1 %v3694_v21  ;;  %v3699_v26 = vld [vmem:[%s4755_s27 + $0x30] sm:$0xff] }
  0x6d   : > { %s4926_s18 = scalar_lea.vmem %s5336_s15, %s3690_s9 }
  0x6e   : > { %932 = vmatpush.bf16.msra.mxu0 %v3709_v3 }
  0x6f   : > { %1290 = vmatpush.bf16.msra.mxu3 %v3697_v23  ;;  %1256 = vmatpush.bf16.msra.mxu2 %v3695_v58 }
  0x70   : > { %1222 = vmatpush.bf16.msra.mxu1 %v3693_v24 }
  0x72   : > { %933 = vmatpush.bf16.msra.mxu0 %v3708_v4 }
  0x76   : > { %934 = vmatpush.bf16.msra.mxu0 %v3707_v5 }
  0x7a   : > { %935 = vmatpush.bf16.msra.mxu0 %v3706_v6 }
  0x7e   : > { %936 = vmatpush.bf16.msra.mxu0 %v3705_v7 }
  0x81   : > { %937 = vmatmul.bf16.vlgmr.msra.gmra.mxu0 %v879_v10 }
  0xfe   : > { %v938_v12 = vpop.f32.mrf.mxu0 }
  0xff   : > { %v939_v14 = vadd.f32 %v938_v12, %v880_v13 }
 0x101   : > { %v4736_v17 = vmul.f32 0.17677669, %v939_v14 }
 0x103   : > { %v968_v48 = vrot.slane %v4736_v17, 4 }
 0x106   : > { %v940_v15 = vpop.f32.mrf.mxu0 }
 0x107   : > { %v941_v16 = vadd.f32 %v940_v15, %v880_v13 }
 0x109   : > { %v4738_v18 = vmul.f32 0.17677669, %v941_v16 }
 0x10b   : > { %v3940_v19 = vpack.i.bf16 %v4738_v18, %v4736_v17  ;;  %v1024_v46 = vrot.slane %v4738_v18, 4 }
 0x10d   : > { %3941 = vrot.lane.b32.xlu1 %v3940_v19, %s4422_s24  ;;  %3931 = vrot.lane.b32.xlu0 %v3940_v19, %s4423_s26 }
 0x115   : > { %3936 = vrot.lane.b32.xlu0 %v3940_v19, %s4424_s29 }
 0x17f   : > { %v3942_v25 = vpop.permute.xlu1 %3941  ;;  %v3932_v28 = vpop.permute.xlu0 %3931 }
 0x180   : > { %v3944_v29 = vunpack.i.h.bf16 %v3942_v25  ;;  %v3943_v30 = vunpack.i.l.bf16 %v3942_v25  ;;  %v3934_v31 = vunpack.i.h.bf16 %v3932_v28  ;;  %v3933_v32 = vunpack.i.l.bf16 %v3932_v28 }
 0x182   : > { %v1034_v33 = vrot.slane %v3944_v29, 4  ;;  %v978_v34 = vrot.slane %v3943_v30, 4  ;;  %v1036_v35 = vrot.slane %v3934_v31, 4  ;;  %v980_v36 = vrot.slane %v3933_v32, 4 }
 0x184   : > { %v1035_v38 = vsel %vm966_vm0, %v1034_v33, %v3934_v31  ;;  %v981_v39 = vsel %vm966_vm0, %v3943_v30, %v980_v36  ;;  %v1037_v40 = vsel %vm966_vm0, %v3944_v29, %v1036_v35  ;;  %v979_v41 = vsel %vm966_vm0, %v978_v34, %v3933_v32 }
 0x185   : > { %v1041_v44 = vperm.slane %v1035_v38, %v4762_v37  ;;  %v989_v45 = vperm.slane %v981_v39, %v4762_v37  ;;  %v1045_v49 = vperm.slane %v1037_v40, %v4762_v37  ;;  %v985_v50 = vperm.slane %v979_v41, %v4762_v37 }
 0x187   : > { %v3937_v47 = vpop.permute.xlu0 %3936  ;;  %v1046_v59 = vrot.slane %v1041_v44, 4  ;;  %v1002_v60 = vrot.slane %v989_v45, 4  ;;  %v1058_v63 = vrot.slane %v1045_v49, 4  ;;  %v990_v0 = vrot.slane %v985_v50, 4 }
 0x188   : > { %v3939_v51 = vunpack.i.h.bf16 %v3937_v47  ;;  %v3938_v52 = vunpack.i.l.bf16 %v3937_v47 }
 0x18a   : > { %v1022_v54 = vrot.slane %v3939_v51, 4  ;;  %v1025_v55 = vsel %vm966_vm0, %v3939_v51, %v1024_v46  ;;  %v965_v56 = vrot.slane %v3938_v52, 4  ;;  %v969_v57 = vsel %vm966_vm0, %v3938_v52, %v968_v48 }
 0x18b   : > { %v1033_v61 = vperm.slane %v1025_v55, %v4762_v37  ;;  %v977_v62 = vperm.slane %v969_v57, %v4762_v37 }
 0x18c   : > { %v1023_v1 = vsel %vm966_vm0, %v1022_v54, %v4738_v18  ;;  %v967_v2 = vsel %vm966_vm0, %v965_v56, %v4736_v17  ;;  %v3700_v17 = vld [vmem:[%s4755_s27 + $0x38] sm:$0xff] }
 0x18d   : > { %v1029_v3 = vperm.slane %v1023_v1, %v4762_v37  ;;  %v1060_v4 = vrot.slane %v1033_v61, 4  ;;  %v973_v5 = vperm.slane %v967_v2, %v4762_v37  ;;  %v1003_v6 = vsel %vm966_vm0, %v1002_v60, %v977_v62  ;;  %1323 = vmatpush.bf16.msrb.mxu1 %v3700_v17 }
 0x18e   : > { %v1004_v7 = vrot.slane %v977_v62, 4  ;;  %v1009_v10 = vperm.slane %v1003_v6, %v4774_v53  ;;  %v1059_v12 = vsel %vm966_vm0, %v1058_v63, %v1033_v61 }
 0x18f   : > { %v1048_v13 = vrot.slane %v1029_v3, 4  ;;  %v991_v14 = vsel %vm966_vm0, %v990_v0, %v973_v5  ;;  %v992_v15 = vrot.slane %v973_v5, 4  ;;  %v1047_v16 = vsel %vm966_vm0, %v1046_v59, %v1029_v3 }
 0x190   : > { %v997_v18 = vperm.slane %v991_v14, %v4774_v53  ;;  %v1005_v19 = vsel %vm966_vm0, %v989_v45, %v1004_v7  ;;  %v1018_v20 = vrot.slane %v1009_v10, 4  ;;  %v1053_v21 = vperm.slane %v1047_v16, %v4774_v53 }
 0x191   : > { %v993_v22 = vsel %vm966_vm0, %v985_v50, %v992_v15  ;;  %v1013_v23 = vperm.slane %v1005_v19, %v4774_v53  ;;  %v1049_v24 = vsel %vm966_vm0, %v1041_v44, %v1048_v13  ;;  %v1061_v25 = vsel %vm966_vm0, %v1045_v49, %v1060_v4  ;;  %1324 = vmatpush.bf16.msrb.mxu1 %v3699_v26 }
 0x192   : > { %v1001_v27 = vperm.slane %v993_v22, %v4774_v53  ;;  %v1014_v28 = vrot.slane %v997_v18, 4  ;;  %v1057_v29 = vperm.slane %v1049_v24, %v4774_v53  ;;  %v1065_v31 = vperm.slane %v1059_v12, %v4774_v53 }
 0x193   : > { %v1020_v30 = vrot.slane %v1013_v23, 4  ;;  %v1069_v32 = vperm.slane %v1061_v25, %v4774_v53  ;;  %v1070_v33 = vrot.slane %v1053_v21, 4  ;;  %v1019_v36 = vsel %vm966_vm0, 0.0, %v1018_v20 }
 0x194   : > { %v1015_v34 = vsel %vm966_vm0, 0.0, %v1014_v28  ;;  %v1016_v35 = vrot.slane %v1001_v27, 4  ;;  %v1072_v38 = vrot.slane %v1057_v29, 4  ;;  %v1074_v41 = vrot.slane %v1065_v31, 4 }
 0x195   : > { %v1021_v39 = vsel %vm966_vm0, 0.0, %v1020_v30  ;;  %v1071_v40 = vsel %vm966_vm0, 0.0, %v1070_v33  ;;  %v1076_v42 = vrot.slane %v1069_v32, 4  ;;  %v1089_v46 = vsel %vm966_vm0, %v1020_v30, %v1009_v10 }
 0x196   : > { %v1017_v43 = vsel %vm966_vm0, 0.0, %v1016_v35  ;;  %v1073_v44 = vsel %vm966_vm0, 0.0, %v1072_v38  ;;  %v1078_v45 = vsel %vm966_vm0, %v1016_v35, %v997_v18  ;;  %v1075_v47 = vsel %vm966_vm0, 0.0, %v1074_v41 }
 0x197   : > { %v1077_v48 = vsel %vm966_vm0, 0.0, %v1076_v42  ;;  %v1083_v49 = vrot.slane %v1017_v43, 4  ;;  %v1093_v50 = vperm.slane %v1089_v46, %v4762_v37  ;;  %v1094_v51 = vrot.slane %v1021_v39, 4 }
 0x198   : > { %v1132_v52 = vsel %vm966_vm0, %v1072_v38, %v1053_v21  ;;  %v1137_v54 = vrot.slane %v1073_v44, 4  ;;  %v1143_v55 = vsel %vm966_vm0, %v1076_v42, %v1065_v31  ;;  %v1148_v57 = vrot.slane %v1077_v48, 4 }
 0x199   : > { %v1147_v56 = vperm.slane %v1143_v55, %v4762_v37  ;;  %v1082_v58 = vperm.slane %v1078_v45, %v4762_v37  ;;  %v1084_v59 = vsel %vm966_vm0, %v1083_v49, %v1015_v34  ;;  %v1095_v60 = vsel %vm966_vm0, %v1094_v51, %v1019_v36 }
 0x19a   : > { %v1088_v61 = vperm.slane %v1084_v59, %v4762_v37  ;;  %v1114_v62 = vrot.slane %v1093_v50, 4  ;;  %v1136_v63 = vperm.slane %v1132_v52, %v4762_v37  ;;  %v1149_v0 = vsel %vm966_vm0, %v1148_v57, %v1075_v47 }
 0x19b   : > { %v1099_v1 = vperm.slane %v1095_v60, %v4762_v37  ;;  %v1102_v2 = vrot.slane %v1082_v58, 4  ;;  %v1138_v3 = vsel %vm966_vm0, %v1137_v54, %v1071_v40  ;;  %v1153_v5 = vperm.slane %v1149_v0, %v4762_v37 }
 0x19c   : > { %v1142_v4 = vperm.slane %v1138_v3, %v4762_v37  ;;  %v1156_v6 = vrot.slane %v1136_v63, 4  ;;  %v1168_v7 = vrot.slane %v1147_v56, 4  ;;  %v1100_v13 = vrot.slane %v1088_v61, 4 }
 0x19d   : > { %v1103_v10 = vsel %vm966_vm0, %v1088_v61, %v1102_v2  ;;  %v1115_v12 = vsel %vm966_vm0, %v1099_v1, %v1114_v62  ;;  %v1112_v14 = vrot.slane %v1099_v1, 4  ;;  %v1166_v28 = vrot.slane %v1153_v5, 4 }
 0x19e   : > { %v1111_v15 = vperm.slane %v1103_v10, %v4774_v53  ;;  %v1123_v16 = vperm.slane %v1115_v12, %v4774_v53  ;;  %v1157_v17 = vsel %vm966_vm0, %v1142_v4, %v1156_v6  ;;  %v1169_v18 = vsel %vm966_vm0, %v1153_v5, %v1168_v7  ;;  %v3783_v5 = vld [vmem:[%s4705_s30] sm:$0xff]  }
 0x19f   : > { %v1165_v19 = vperm.slane %v1157_v17, %v4774_v53  ;;  %v1177_v20 = vperm.slane %v1169_v18, %v4774_v53  ;;  %v1101_v21 = vsel %vm966_vm0, %v1100_v13, %v1082_v58  ;;  %v1113_v22 = vsel %vm966_vm0, %v1112_v14, %v1093_v50 }
 0x1a0   : > { %v1128_v23 = vrot.slane %v1123_v16, 4  ;;  %v1107_v24 = vperm.slane %v1101_v21, %v4774_v53  ;;  %v1119_v25 = vperm.slane %v1113_v22, %v4774_v53  ;;  %v1154_v27 = vrot.slane %v1142_v4, 4 }
 0x1a1   : > { %v1182_v26 = vrot.slane %v1177_v20, 4  ;;  %v1167_v35 = vsel %vm966_vm0, %v1166_v28, %v1147_v56  ;;  %v1130_v60 = vrot.slane %v1111_v15, 4  ;;  %v1184_v61 = vrot.slane %v1165_v19, 4 }
 0x1a2   : > { %v1129_v29 = vsel %vm966_vm0, %v1128_v23, %v1111_v15  ;;  %v1124_v30 = vrot.slane %v1119_v25, 4  ;;  %v1126_v31 = vrot.slane %v1107_v24, 4  ;;  %v1155_v34 = vsel %vm966_vm0, %v1154_v27, %v1136_v63 }
 0x1a3   : > { %v1183_v32 = vsel %vm966_vm0, %v1182_v26, %v1165_v19  ;;  %v1190_v33 = vpack.c.bf16 %v1129_v29, %v1129_v29  ;;  %v1161_v39 = vperm.slane %v1155_v34, %v4774_v53  ;;  %v1173_v40 = vperm.slane %v1167_v35, %v4774_v53  ;;  %v3701_v35 = vld [vmem:[%s4876_s11] sm:$0xff] }
 0x1a4   : > { %v1191_v36 = vpack.c.bf16 %v1183_v32, %v1183_v32  ;;  %v1125_v38 = vsel %vm966_vm0, %v1124_v30, %v1107_v24  ;;  %v1127_v43 = vsel %vm966_vm0, %v1119_v25, %v1126_v31  ;;  %v1131_v62 = vsel %vm966_vm0, %v1123_v16, %v1130_v60  ;;  %1433 = vmatpush.bf16.msrb.mxu2 %v3701_v35 }
 0x1a5   : > { %v1265_v41 = vunpack.c.l.b16 %v1190_v33  ;;  %v1186_v42 = vpack.c.bf16 %v1125_v38, %v1125_v38  ;;  %v1178_v45 = vrot.slane %v1173_v40, 4  ;;  %v1180_v46 = vrot.slane %v1161_v39, 4 }
 0x1a6   : > { %v1266_v44 = vunpack.c.l.b16 %v1191_v36  ;;  %v1188_v47 = vpack.c.bf16 %v1127_v43, %v1127_v43  ;;  %v1185_v63 = vsel %vm966_vm0, %v1177_v20, %v1184_v61  ;;  %v1192_v0 = vpack.c.bf16 %v1131_v62, %v1131_v62 }
 0x1a7   : > { %v1179_v49 = vsel %vm966_vm0, %v1178_v45, %v1161_v39  ;;  %v1181_v50 = vsel %vm966_vm0, %v1173_v40, %v1180_v46  ;;  %v1196_v52 = vunpack.c.l.b16 %v1186_v42  ;;  %v1193_v1 = vpack.c.bf16 %v1185_v63, %v1185_v63  ;;  %v3704_v40 = vld [vmem:[%s4876_s11 + $0x18] sm:$0xff]  ;;  %v3702_v46 = vld [vmem:[%s4876_s11 + $0x8] sm:$0xff] }
 0x1a8   : > { %v1267_v48 = vpack.c.b16 %v1266_v44, %v1265_v41  ;;  %v1187_v51 = vpack.c.bf16 %v1179_v49, %v1179_v49  ;;  %v1189_v54 = vpack.c.bf16 %v1181_v50, %v1181_v50  ;;  %v1231_v55 = vunpack.c.l.b16 %v1188_v47  ;;  %1461 = vmatpush.bf16.msrb.mxu3 %v3702_v46 }
 0x1a9   : > { %v1299_v2 = vunpack.c.l.b16 %v1192_v0  ;;  %v1300_v3 = vunpack.c.l.b16 %v1193_v1  ;;  %v3784_v6 = vunpack.c.l.bf16 %v3783_v5  ;;  %v3785_v13 = vunpack.c.h.bf16 %v3783_v5 }
 0x1aa   : > { %3363 = vmatmul.msk.bf16.vlgmr.msra.gmra.mxu3 %vm1211_vm1, %v1267_v48  ;;  %v1197_v56 = vunpack.c.l.b16 %v1187_v51  ;;  %v1232_v57 = vunpack.c.l.b16 %v1189_v54 }
 0x1ab   : > { %v1301_v4 = vpack.c.b16 %v1300_v3, %v1299_v2  ;;  %v3703_v2 = vld [vmem:[%s4876_s11 + $0x10] sm:$0xff]  ;;  %s5339_s11 = sld [smem:[#allocation42_spill]] }
 0x1ac   : > { %v1198_v58 = vpack.c.b16 %v1197_v56, %v1196_v52  ;;  %v1233_v59 = vpack.c.b16 %v1232_v57, %v1231_v55 }
 0x1ae   : > { %3345 = vmatmul.msk.bf16.vlgmr.msra.gmra.mxu1 %vm1211_vm1, %v1198_v58  ;;  %3354 = vmatmul.msk.bf16.vlgmr.msra.gmra.mxu2 %vm1211_vm1, %v1233_v59 }
 0x1af   : > { %1517 = vmatpush.bf16.msra.mxu2 %v3704_v40  ;;  %1489 = vmatpush.bf16.msra.mxu1 %v3703_v2 }
 0x1be   : > { %3372 = vmatmul.msk.bf16.vlgmr.msrb.gmra.mxu1 %vm1211_vm1, %v1301_v4 }
 0x22b   : > { %v1224_v7 = vpop.f32.mrf.mxu1 }
 0x22c   : > { %v1225_v10 = vadd.f32 %v3784_v6, %v1224_v7 }
 0x22d   : > { %v1292_v28 = vpop.f32.mrf.mxu3 }
 0x22e   : > { %v1332_v12 = vsel %vm1331_vm2, %v1225_v10, -inf  ;;  %v4864_v30 = vadd.f32 %v3784_v6, %v1292_v28 }
 0x22f   : > { %1333 = vmax.xlane.f32.xlu1 %v1332_v12 }
 0x230   : > { %v1344_v31 = vsel %vm1331_vm2, %v4864_v30, -inf }
 0x231   : > { %v1258_v19 = vpop.f32.mrf.mxu2 }
 0x232   : > { %v1259_v21 = vadd.f32 %v3784_v6, %v1258_v19 }
 0x233   : > { %v1226_v14 = vpop.f32.mrf.mxu1 }
 0x234   : > { %v1227_v15 = vadd.f32 %v3785_v13, %v1226_v14  ;;  %v1338_v25 = vsel %vm1331_vm2, %v1259_v21, -inf }
 0x235   : > { %v1294_v32 = vpop.f32.mrf.mxu3 }
 0x236   : > { %v1335_v16 = vsel %vm1331_vm2, %v1227_v15, -inf  ;;  %v4868_v33 = vadd.f32 %v3785_v13, %v1294_v32 }
 0x237   : > { %1336 = vmax.xlane.f32.xlu2 %v1335_v16 }
 0x238   : > { %v1347_v34 = vsel %vm1331_vm2, %v4868_v33, -inf }
 0x239   : > { %v1260_v26 = vpop.f32.mrf.mxu2 }
 0x23a   : > { %v1261_v27 = vadd.f32 %v3785_v13, %v1260_v26 }
 0x23b   : > { %v1326_v17 = vpop.f32.mrf.mxu1 }
 0x23c   : > { %v1327_v18 = vadd.f32 %v3784_v6, %v1326_v17  ;;  %v1341_v29 = vsel %vm1331_vm2, %v1261_v27, -inf }
 0x23e   : > { %v1350_v20 = vsel %vm1331_vm2, %v1327_v18, -inf }
 0x23f   : > { %1351 = vmax.xlane.f32.xlu2 %v1350_v20 }
 0x243   : > { %v1328_v22 = vpop.f32.mrf.mxu1 }
 0x244   : > { %v1329_v23 = vadd.f32 %v3785_v13, %v1328_v22 }
 0x246   : > { %v1353_v24 = vsel %vm1331_vm2, %v1329_v23, -inf }
 0x247   : > { %1354 = vmax.xlane.f32.xlu0 %v1353_v24  ;;  %1339 = vmax.xlane.f32.xlu2 %v1338_v25 }
 0x24f   : > { %1342 = vmax.xlane.f32.xlu2 %v1341_v29 }
 0x257   : > { %1345 = vmax.xlane.f32.xlu2 %v1344_v31 }
 0x25f   : > { %1348 = vmax.xlane.f32.xlu2 %v1347_v34 }
 0x2a2   : > { %v1334_v36 = vpop.xlane.xlu1 %1333 }
 0x2a3   : > { %v1356_v38 = vsub.f32 %v1225_v10, %v1334_v36 }
 0x2a5   : > { %v1364_v39 = vmul.f32 1.442695, %v1356_v38 }
 0x2a7   : > { %3960 = vpow2.f32 %v1364_v39 }
 0x2aa   : > { %v1337_v41 = vpop.xlane.xlu2 %1336 }
 0x2ab   : > { %v1357_v42 = vsub.f32 %v1227_v15, %v1337_v41 }
 0x2ad   : > { %v3961_v43 = vpop.eup %3960  ;;  %v1366_v44 = vmul.f32 1.442695, %v1357_v42  ;;  %v3713_v42 = vld [vmem:[#allocation11] sm:$0xff] }
 0x2ae   : > { %v1380_v45 = vsel %vm1331_vm2, %v3961_v43, 0.0  ;;  %v1404_v49 = vpack.c.bf16 %v3961_v43, %v3961_v43  ;;  %v3720_v43 = vld [vmem:[#allocation11 + $0x38] sm:$0xff] }
 0x2af   : > { %3962 = vpow2.f32 %v1366_v44  ;;  %1381 = vadd.xlane.f32.xlu2 %v1380_v45  ;;  %v3719_v45 = vld [vmem:[#allocation11 + $0x30] sm:$0xff] }
 0x2b0   : > { %v1414_v55 = vunpack.c.l.b16 %v1404_v49 }
 0x2b2   : > { %v1352_v47 = vpop.xlane.xlu2 %1351 }
 0x2b3   : > { %v1362_v48 = vsub.f32 %v1327_v18, %v1352_v47 }
 0x2b5   : > { %v3963_v50 = vpop.eup %3962  ;;  %v1376_v51 = vmul.f32 1.442695, %v1362_v48  ;;  %v3716_v48 = vld [vmem:[#allocation11 + $0x18] sm:$0xff] }
 0x2b6   : > { %v1405_v52 = vpack.c.bf16 %v3963_v50, %v3963_v50  ;;  %v1383_v54 = vsel %vm1331_vm2, %v3963_v50, 0.0  ;;  %1608 = vmatpush.bf16.msrb.mxu0 %v3716_v48  ;;  %v1690_v48 = vperm.slane %v4733_v11, 1 }
 0x2b7   : > { %3964 = vpow2.f32 %v1376_v51  ;;  %1384 = vadd.xlane.f32.xlu1 %v1383_v54  ;;  %v3715_v51 = vld [vmem:[#allocation11 + $0x10] sm:$0xff] }
 0x2b8   : > { %v1415_v56 = vunpack.c.l.b16 %v1405_v52  ;;  %v3718_v52 = vld [vmem:[#allocation11 + $0x28] sm:$0xff] }
 0x2b9   : > { %1642 = vmatpush.bf16.msrb.mxu1 %v3718_v52 }
 0x2ba   : > { %v1355_v57 = vpop.xlane.xlu0 %1354  ;;  %v1340_v58 = vpop.xlane.xlu2 %1339  ;;  %v1416_v59 = vpack.c.b16 %v1415_v56, %v1414_v55  ;;  %1609 = vmatpush.bf16.msrb.mxu0 %v3715_v51 }
 0x2bb   : > { %v1363_v60 = vsub.f32 %v1329_v23, %v1355_v57  ;;  %v1358_v61 = vsub.f32 %v1259_v21, %v1340_v58 }
 0x2bc   : > { %3377 = vmatmul.msk.bf16.vlgmr.msrb.gmra.mxu2 %vm1331_vm2, %v1416_v59 }
 0x2bd   : > { %v3965_v62 = vpop.eup %3964  ;;  %v1378_v63 = vmul.f32 1.442695, %v1363_v60  ;;  %v1368_v0 = vmul.f32 1.442695, %v1358_v61  ;;  %1676 = vmatpush.bf16.msrb.mxu2 %v3720_v43 }
 0x2be   : > { %v1398_v1 = vsel %vm1331_vm2, %v3965_v62, 0.0  ;;  %v1410_v5 = vpack.c.bf16 %v3965_v62, %v3965_v62 }
 0x2bf   : > { %3966 = vpow2.f32 %v1378_v63  ;;  %1399 = vadd.xlane.f32.xlu2 %v1398_v1 }
 0x2c0   : > { %3968 = vpow2.f32 %v1368_v0  ;;  %v1498_v15 = vunpack.c.l.b16 %v1410_v5  ;;  %v3717_v0 = vld [vmem:[#allocation11 + $0x20] sm:$0xff] }
 0x2c1   : > { %1677 = vmatpush.bf16.msrb.mxu2 %v3719_v45  ;;  %1643 = vmatpush.bf16.msrb.mxu1 %v3717_v0 }
 0x2c2   : > { %v1343_v3 = vpop.xlane.xlu2 %1342 }
 0x2c3   : > { %v1359_v4 = vsub.f32 %v1261_v27, %v1343_v3 }
 0x2c5   : > { %v3967_v6 = vpop.eup %3966  ;;  %v1370_v7 = vmul.f32 1.442695, %v1359_v4 }
 0x2c6   : > { %v3969_v10 = vpop.eup %3968  ;;  %v1411_v12 = vpack.c.bf16 %v3967_v6, %v3967_v6  ;;  %v1401_v13 = vsel %vm1331_vm2, %v3967_v6, 0.0 }
 0x2c7   : > { %3970 = vpow2.f32 %v1370_v7  ;;  %1402 = vadd.xlane.f32.xlu0 %v1401_v13  ;;  %v1386_v14 = vsel %vm1331_vm2, %v3969_v10, 0.0  ;;  %v1406_v20 = vpack.c.bf16 %v3969_v10, %v3969_v10 }
 0x2c8   : > { %v1499_v16 = vunpack.c.l.b16 %v1411_v12  ;;  %1387 = vadd.xlane.f32.xlu1 %v1386_v14 }
 0x2c9   : > { %v1442_v25 = vunpack.c.l.b16 %v1406_v20 }
 0x2ca   : > { %v1500_v17 = vpack.c.b16 %v1499_v16, %v1498_v15  ;;  %v1346_v18 = vpop.xlane.xlu2 %1345 }
 0x2cb   : > { %v1360_v19 = vsub.f32 %v4864_v30, %v1346_v18 }
 0x2cc   : > { %3392 = vmatmul.msk.bf16.vlgmr.msra.gmra.mxu2 %vm1331_vm2, %v1500_v17 }
 0x2cd   : > { %v3971_v21 = vpop.eup %3970  ;;  %v1372_v22 = vmul.f32 1.442695, %v1360_v19 }
 0x2ce   : > { %v1407_v23 = vpack.c.bf16 %v3971_v21, %v3971_v21  ;;  %v1389_v24 = vsel %vm1331_vm2, %v3971_v21, 0.0 }
 0x2cf   : > { %3972 = vpow2.f32 %v1372_v22  ;;  %1390 = vadd.xlane.f32.xlu2 %v1389_v24 }
 0x2d0   : > { %v1443_v26 = vunpack.c.l.b16 %v1407_v23 }
 0x2d2   : > { %v1349_v27 = vpop.xlane.xlu2 %1348  ;;  %v1444_v28 = vpack.c.b16 %v1443_v26, %v1442_v25 }
 0x2d3   : > { %v1361_v29 = vsub.f32 %v4868_v33, %v1349_v27  ;;  %v3714_v33 = vld [vmem:[#allocation11 + $0x8] sm:$0xff] }
 0x2d4   : > { %3382 = vmatmul.msk.bf16.vlgmr.msrb.gmra.mxu3 %vm1331_vm2, %v1444_v28 }
 0x2d5   : > { %v3973_v31 = vpop.eup %3972  ;;  %v1374_v30 = vmul.f32 1.442695, %v1361_v29  ;;  %1574 = vmatpush.bf16.msra.mxu3 %v3714_v33 }
 0x2d6   : > { %v1392_v32 = vsel %vm1331_vm2, %v3973_v31, 0.0  ;;  %v1408_v34 = vpack.c.bf16 %v3973_v31, %v3973_v31 }
 0x2d7   : > { %3974 = vpow2.f32 %v1374_v30  ;;  %1393 = vadd.xlane.f32.xlu0 %v1392_v32 }
 0x2d8   : > { %v1470_v39 = vunpack.c.l.b16 %v1408_v34 }
 0x2d9   : > { %1575 = vmatpush.bf16.msra.mxu3 %v3713_v42 }
 0x2dd   : > { %v3975_v35 = vpop.eup %3974 }
 0x2de   : > { %v1409_v36 = vpack.c.bf16 %v3975_v35, %v3975_v35  ;;  %v1395_v38 = vsel %vm1331_vm2, %v3975_v35, 0.0 }
 0x2df   : > { %1396 = vadd.xlane.f32.xlu1 %v1395_v38 }
 0x2e0   : > { %v1471_v40 = vunpack.c.l.b16 %v1409_v36 }
 0x2e2   : > { %v1472_v41 = vpack.c.b16 %v1471_v40, %v1470_v39 }
 0x2e4   : > { %3387 = vmatmul.msk.bf16.vlgmr.msra.gmra.mxu1 %vm1331_vm2, %v1472_v41 }
 0x322   : > { %v1382_v44 = vpop.xlane.xlu2 %1381 }
 0x323   : > { %3976 = vrcp.f32 %v1382_v44 }
 0x329   : > { %v3977_v49 = vpop.eup %3976 }
 0x32a   : > { %v1385_v46 = vpop.xlane.xlu1 %1384 }
 0x32b   : > { %3978 = vrcp.f32 %v1385_v46 }
 0x331   : > { %v3979_v54 = vpop.eup %3978 }
 0x332   : > { %v1400_v58 = vpop.xlane.xlu2 %1399 }
 0x333   : > { %3980 = vrcp.f32 %v1400_v58 }
 0x339   : > { %v3981_v3 = vpop.eup %3980 }
 0x33a   : > { %v1403_v62 = vpop.xlane.xlu0 %1402 }
 0x33b   : > { %3982 = vrcp.f32 %v1403_v62  ;;  %v1388_v2 = vpop.xlane.xlu1 %1387  ;;  %v4427_v62 = vmov 128.0  }
 0x33c   : > { %3984 = vrcp.f32 %v1388_v2 }
 0x33f   : > { %v1435_v47 = vpop.f32.mrf.mxu2 }
 0x340   : > { %v1532_v50 = vmul.f32 %v3977_v49, %v1435_v47 }
 0x341   : > { %v3983_v6 = vpop.eup %3982 }
 0x342   : > { %v1540_v56 = vpack.c.bf16 %v1532_v50, %v1532_v50  ;;  %v1391_v5 = vpop.xlane.xlu2 %1390  ;;  %v3985_v15 = vpop.eup %3984 }
 0x343   : > { %3986 = vrcp.f32 %v1391_v5 }
 0x344   : > { %v1550_v60 = vunpack.c.l.b16 %v1540_v56 }
 0x347   : > { %v1437_v55 = vpop.f32.mrf.mxu2 }
 0x348   : > { %v1533_v57 = vmul.f32 %v3979_v54, %v1437_v55 }
 0x349   : > { %v3987_v21 = vpop.eup %3986 }
 0x34a   : > { %v1541_v59 = vpack.c.bf16 %v1533_v57, %v1533_v57  ;;  %v1394_v16 = vpop.xlane.xlu0 %1393 }
 0x34b   : > { %3988 = vrcp.f32 %v1394_v16  ;;  %v3738_v16 = vld [vmem:[#allocation13 + $0x28] sm:$0xff] }
 0x34c   : > { %v1551_v61 = vunpack.c.l.b16 %v1541_v59 }
 0x34e   : > { %v1552_v63 = vpack.c.b16 %v1551_v61, %v1550_v60 }
 0x34f   : > { %v1519_v1 = vpop.f32.mrf.mxu2 }
 0x350   : > { %3401 = vmatmul.msk.bf16.vlgmr.msra.gmra.mxu3 %vm1211_vm1, %v1552_v63  ;;  %v1538_v4 = vmul.f32 %v3981_v3, %v1519_v1 }
 0x351   : > { %v3989_v31 = vpop.eup %3988 }
 0x352   : > { %v1546_v12 = vpack.c.bf16 %v1538_v4, %v1538_v4  ;;  %v1397_v23 = vpop.xlane.xlu1 %1396 }
 0x353   : > { %3990 = vrcp.f32 %v1397_v23  ;;  %v3733_v23 = vld [vmem:[#allocation13] sm:$0xff] }
 0x354   : > { %v1652_v17 = vunpack.c.l.b16 %v1546_v12  ;;  %3992 = vrcp.f32 %v4427_v62  ;;  %v3722_v62 = vld [vmem:[%s4926_s18 + $0x8] sm:$0xff] }
 0x355   : > { %2144 = vmatpush.bf16.msra.mxu0 %v3722_v62 }
 0x357   : > { %v1463_v7 = vpop.f32.mrf.mxu3  ;;  %v1521_v10 = vpop.f32.mrf.mxu2 }
 0x358   : > { %v1539_v13 = vmul.f32 %v3983_v6, %v1521_v10  ;;  %v1534_v18 = vmul.f32 %v3985_v15, %v1463_v7  ;;  %v3739_v15 = vld [vmem:[#allocation13 + $0x30] sm:$0xff] }
 0x359   : > { %v3991_v34 = vpop.eup %3990 }
 0x35a   : > { %v1547_v14 = vpack.c.bf16 %v1539_v13, %v1539_v13  ;;  %v1542_v24 = vpack.c.bf16 %v1534_v18, %v1534_v18  ;;  %v3993_v63 = vpop.eup %3992  ;;  %v3736_v18 = vld [vmem:[#allocation13 + $0x18] sm:$0xff] }
 0x35b   : > { %v1700_v0 = vmul.f32 128.0, %v3993_v63  ;;  %vm1704_vm3 = vweird.f32 %v3993_v63 }
 0x35c   : > { %v1653_v19 = vunpack.c.l.b16 %v1547_v14  ;;  %v1584_v28 = vunpack.c.l.b16 %v1542_v24  ;;  %v3740_v14 = vld [vmem:[#allocation13 + $0x38] sm:$0xff] }
 0x35d   : > { %v1701_v1 = vsub.f32 1.0, %v1700_v0  ;;  %1854 = vmatpush.bf16.msrb.mxu3 %v3740_v14 }
 0x35e   : > { %v1654_v20 = vpack.c.b16 %v1653_v19, %v1652_v17  ;;  %v3737_v17 = vld [vmem:[#allocation13 + $0x20] sm:$0xff]  ;;  %v3735_v19 = vld [vmem:[#allocation13 + $0x10] sm:$0xff] }
 0x35f   : > { %v1465_v22 = vpop.f32.mrf.mxu3  ;;  %v1702_v2 = vmul.f32 %v3993_v63, %v1701_v1 }
 0x360   : > { %v1535_v25 = vmul.f32 %v3987_v21, %v1465_v22  ;;  %3428 = vmatmul.msk.bf16.vlgmr.msrb.gmra.mxu2 %vm1211_vm1, %v1654_v20  ;;  %v3734_v20 = vld [vmem:[#allocation13 + $0x8] sm:$0xff] }
 0x361   : > { %v1491_v26 = vpop.f32.mrf.mxu1  ;;  %v1703_v3 = vadd.f32 %v3993_v63, %v1702_v2  ;;  %1855 = vmatpush.bf16.msrb.mxu3 %v3739_v15  ;;  %v3725_v2 = vld [vmem:[%s4926_s18 + $0x20] sm:$0xff] }
 0x362   : > { %v1543_v27 = vpack.c.bf16 %v1535_v25, %v1535_v25  ;;  %v1536_v32 = vmul.f32 %v3989_v31, %v1491_v26 }
 0x363   : > { %v4903_v4 = vsel %vm1704_vm3, %v3993_v63, %v1703_v3  ;;  %v3724_v63 = vld [vmem:[%s4926_s18 + $0x18] sm:$0xff]  ;;  %v3721_v3 = vld [vmem:[%s4926_s18] sm:$0xff] }
 0x364   : > { %v1585_v29 = vunpack.c.l.b16 %v1543_v27  ;;  %v1544_v36 = vpack.c.bf16 %v1536_v32, %v1536_v32  ;;  %2178 = vmatpush.bf16.msra.mxu1 %v3724_v63  ;;  %2145 = vmatpush.bf16.msra.mxu0 %v3721_v3 }
 0x365   : > { %1856 = vmatpush.bf16.msrb.mxu3 %v3738_v16 }
 0x366   : > { %v1586_v30 = vpack.c.b16 %v1585_v29, %v1584_v28  ;;  %v1618_v40 = vunpack.c.l.b16 %v1544_v36 }
 0x368   : > { %3410 = vmatmul.msk.bf16.vlgmr.msrb.gmra.mxu0 %vm1211_vm1, %v1586_v30 }
 0x369   : > { %v1493_v35 = vpop.f32.mrf.mxu1  ;;  %1857 = vmatpush.bf16.msrb.mxu3 %v3737_v17 }
 0x36a   : > { %v1537_v38 = vmul.f32 %v3991_v34, %v1493_v35 }
 0x36c   : > { %v1545_v39 = vpack.c.bf16 %v1537_v38, %v1537_v38 }
 0x36d   : > { %1858 = vmatpush.bf16.msrb.mxu3 %v3736_v18 }
 0x36e   : > { %v1619_v41 = vunpack.c.l.b16 %v1545_v39 }
 0x370   : > { %v1620_v33 = vpack.c.b16 %v1619_v41, %v1618_v40 }
 0x371   : > { %1859 = vmatpush.bf16.msrb.mxu3 %v3735_v19 }
 0x372   : > { %3419 = vmatmul.msk.bf16.vlgmr.msrb.gmra.mxu1 %vm1211_vm1, %v1620_v33 }
 0x375   : > { %1860 = vmatpush.bf16.msrb.mxu3 %v3734_v20 }
 0x379   : > { %1861 = vmatpush.bf16.msrb.mxu3 %v3733_v23 }
 0x3d3   : > { %v1577_v43 = vpop.f32.mrf.mxu3 }
 0x3db   : > { %v1579_v52 = vpop.f32.mrf.mxu3 }
 0x3e3   : > { %v1679_v45 = vpop.f32.mrf.mxu2 }
 0x3e5   : > { %v1611_v42 = vpop.f32.mrf.mxu0 }
 0x3e6   : > { %v1684_v44 = vadd.f32 %v1611_v42, %v1577_v43  ;;  %v1742_v42 = vperm.slane %v4733_v11, 2 }
 0x3eb   : > { %v1681_v58 = vpop.f32.mrf.mxu2 }
 0x3ed   : > { %v1613_v50 = vpop.f32.mrf.mxu0 }
 0x3ee   : > { %v1685_v54 = vadd.f32 %v1613_v50, %v1579_v52 }
 0x3ef   : > { %v1645_v46 = vpop.f32.mrf.mxu1 }
 0x3f0   : > { %v1686_v47 = vadd.f32 %v1684_v44, %v1645_v46 }
 0x3f2   : > { %v1688_v49 = vadd.f32 %v1686_v47, %v1679_v45  ;;  %v1745_v47 = vperm.slane %v4733_v11, 3 }
 0x3f4   : > { %v1691_v51 = vadd.f32 %v1690_v48, %v1688_v49 }
 0x3f6   : > { %v1693_v55 = vadd.f32 %v1691_v51, %v4726_v8 }
 0x3f7   : > { %v1647_v56 = vpop.f32.mrf.mxu1 }
 0x3f8   : > { %v1687_v57 = vadd.f32 %v1685_v54, %v1647_v56  ;;  %1695 = vadd.xlane.f32.xlu2 %v1693_v55  ;;  %v1805_v54 = vperm.slane %v4733_v11, 4 }
 0x3fa   : > { %v1689_v59 = vadd.f32 %v1687_v57, %v1681_v58 }
 0x3fc   : > { %v1692_v60 = vadd.f32 %v1690_v48, %v1689_v59 }
 0x3fe   : > { %v1694_v61 = vadd.f32 %v1692_v60, %v4729_v9 }
 0x400   : > { %1697 = vadd.xlane.f32.xlu0 %v1694_v61 }
 0x46b   : > { %v1696_v8 = vpop.xlane.xlu2 %1695 }
 0x46c   : > { %v1706_v5 = vmul.f32 %v4903_v4, %v1696_v8  ;;  %v3723_v8 = vld [vmem:[%s4926_s18 + $0x10] sm:$0xff] }
 0x46d   : > { %2179 = vmatpush.bf16.msra.mxu1 %v3723_v8 }
 0x46e   : > { %v1708_v6 = vsub.f32 %v1693_v55, %v1706_v5 }
 0x470   : > { %v1710_v7 = vmul.f32 %v1708_v6, %v1708_v6 }
 0x472   : > { %1712 = vadd.xlane.f32.xlu1 %v1710_v7 }
 0x473   : > { %v1698_v10 = vpop.xlane.xlu0 %1697 }
 0x474   : > { %v1707_v9 = vmul.f32 %v4903_v4, %v1698_v10 }
 0x476   : > { %v1709_v12 = vsub.f32 %v1694_v61, %v1707_v9  ;;  %v3726_v61 = vld [vmem:[%s4926_s18 + $0x28] sm:$0xff] }
 0x477   : > { %2212 = vmatpush.bf16.msra.mxu2 %v3726_v61 }
 0x478   : > { %v1711_v13 = vmul.f32 %v1709_v12, %v1709_v12 }
 0x47a   : > { %1714 = vadd.xlane.f32.xlu2 %v1711_v13 }
 0x47b   : > { %2213 = vmatpush.bf16.msra.mxu2 %v3725_v2 }
 0x4e5   : > { %v1713_v21 = vpop.xlane.xlu1 %1712 }
 0x4e6   : > { %v1716_v22 = vmul.f32 %v1713_v21, %v4903_v4 }
 0x4e8   : > { %v1718_v24 = vadd.f32 1e-05, %v1716_v22 }
 0x4ea   : > { %3994 = vrsqrt.f32 %v1718_v24  ;;  %vm1726_vm5 = vweird.f32 %v1718_v24 }
 0x4ed   : > { %v1715_v25 = vpop.xlane.xlu2 %1714 }
 0x4ee   : > { %v1717_v26 = vmul.f32 %v1715_v25, %v4903_v4 }
 0x4f0   : > { %v3995_v27 = vpop.eup %3994  ;;  %v1719_v28 = vadd.f32 1e-05, %v1717_v26 }
 0x4f1   : > { %v1721_v29 = vmul.f32 %v3995_v27, %v1718_v24  ;;  %vm1727_vm4 = vweird.f32 %v3995_v27 }
 0x4f2   : > { %3996 = vrsqrt.f32 %v1719_v28  ;;  %vm1728_vm6 = vmor %vm1726_vm5, %vm1727_vm4  ;;  %vm1736_vm8 = vweird.f32 %v1719_v28 }
 0x4f3   : > { %v1722_v31 = vmul.f32 %v3995_v27, %v1721_v29 }
 0x4f5   : > { %v1723_v30 = vmul.f32 0.5, %v1722_v31 }
 0x4f7   : > { %v1724_v32 = vsub.f32 1.5, %v1723_v30 }
 0x4f8   : > { %v3997_v34 = vpop.eup %3996 }
 0x4f9   : > { %v1725_v35 = vmul.f32 %v3995_v27, %v1724_v32  ;;  %v1731_v36 = vmul.f32 %v3997_v34, %v1719_v28  ;;  %vm1737_vm7 = vweird.f32 %v3997_v34 }
 0x4fa   : > { %vm1738_vm9 = vmor %vm1736_vm8, %vm1737_vm7 }
 0x4fb   : > { %v1732_v38 = vmul.f32 %v3997_v34, %v1731_v36  ;;  %v1729_v39 = vsel %vm1728_vm6, %v3995_v27, %v1725_v35 }
 0x4fc   : > { %v1740_v33 = vmul.f32 %v1729_v39, %v1708_v6 }
 0x4fd   : > { %v1733_v40 = vmul.f32 0.5, %v1732_v38 }
 0x4fe   : > { %v1743_v46 = vmul.f32 %v1742_v42, %v1740_v33 }
 0x4ff   : > { %v1734_v41 = vsub.f32 1.5, %v1733_v40 }
 0x500   : > { %v4911_v49 = vadd.f32 %v1745_v47, %v1743_v46 }
 0x501   : > { %v1735_v43 = vmul.f32 %v3997_v34, %v1734_v41 }
 0x503   : > { %v1739_v44 = vsel %vm1738_vm9, %v3997_v34, %v1735_v43 }
 0x504   : > { %v1741_v45 = vmul.f32 %v1739_v44, %v1709_v12 }
 0x506   : > { %v1744_v48 = vmul.f32 %v1742_v42, %v1741_v45 }
 0x508   : > { %v4913_v50 = vadd.f32 %v1745_v47, %v1744_v48  ;;  %v3728_v48 = vld [vmem:[%s4926_s18 + $0x38] sm:$0xff] }
 0x509   : > { %2246 = vmatpush.bf16.msrb.mxu0 %v3728_v48 }
 0x50a   : > { %v1804_v51 = vpack.c.bf16 %v4913_v50, %v4911_v49 }
 0x50c   : > { %1862 = vmatmul.bf16.vlgmr.msrb.gmra.mxu3 %v1804_v51 }
 0x58f   : > { %v1863_v52 = vpop.f32.mrf.mxu3 }
 0x590   : > { %v1864_v55 = vadd.f32 %v1863_v52, %v1805_v54 }
 0x592   : > { %v1868_v58 = vmul.f32 0.17677669, %v1864_v55 }
 0x594   : > { %v1892_v9 = vrot.slane %v1868_v58, 4 }
 0x597   : > { %v1865_v56 = vpop.f32.mrf.mxu3 }
 0x598   : > { %v1866_v57 = vadd.f32 %v1865_v56, %v1805_v54 }
 0x59a   : > { %v1869_v59 = vmul.f32 0.17677669, %v1866_v57 }
 0x59c   : > { %v3955_v60 = vpack.i.bf16 %v1869_v59, %v1868_v58  ;;  %v1948_v6 = vrot.slane %v1869_v59, 4 }
 0x59e   : > { %3956 = vrot.lane.b32.xlu2 %v3955_v60, %s4422_s24  ;;  %3951 = vrot.lane.b32.xlu1 %v3955_v60, %s4424_s29  ;;  %s5338_s24 = sld [smem:[#allocation40_spill]] }
 0x59f   : > { %3946 = vrot.lane.b32.xlu0 %v3955_v60, %s4423_s26  ;;  %v3727_v60 = vld [vmem:[%s4926_s18 + $0x30] sm:$0xff]  ;;  %s5340_s18 = sld [smem:[#allocation43_spill]] }
 0x5a0   : > { %2247 = vmatpush.bf16.msrb.mxu0 %v3727_v60 }
 0x5a5   : > { %s3021_s30 = scalar_lea.hbm %s5340_s18, %s3781_s2 }
 0x5a6   : > { %s3024_s14 = sshll.u32 %s3021_s30, 4  ;;  %s3025_s14 = int_to_ptr.hbm [resolvable:$true] %s3024_s14 }
 0x5a7   : > { %s4323_s9 = sshra.s32 %s3025_s14, 4  ;;  %s4324_s9 = int_to_ptr.hbm [resolvable:$true] %s4323_s9 }
 0x5a8   : > { %s4325_s13 = scalar_lea.hbm %s4324_s9, 16 }
 0x5a9   : > { %p4326_p2 = scmp.ne.s32.totalorder %s4324_s9, %s4325_s13 }
 0x5ab   : > { %p4327_p4 = pnand %p4326_p2, %p4606_p5 }
 0x5ad   : > { %p4328_p8 = pneg %p4327_p4 }
 0x5f8   : > { %v3957_v11 = vpop.permute.xlu2 %3956 }
 0x5f9   : > { %v3959_v0 = vunpack.i.h.bf16 %v3957_v11  ;;  %v3958_v1 = vunpack.i.l.bf16 %v3957_v11 }
 0x5fb   : > { %v1958_v13 = vrot.slane %v3959_v0, 4  ;;  %v1902_v14 = vrot.slane %v3958_v1, 4 }
 0x610   : > { %v3952_v5 = vpop.permute.xlu1 %3951 }
 0x611   : > { %v3954_v7 = vunpack.i.h.bf16 %v3952_v5  ;;  %v3953_v10 = vunpack.i.l.bf16 %v3952_v5  ;;  %v3947_v12 = vpop.permute.xlu0 %3946 }
 0x612   : > { %v3949_v15 = vunpack.i.h.bf16 %v3947_v12  ;;  %v3948_v16 = vunpack.i.l.bf16 %v3947_v12 }
 0x613   : > { %v1946_v17 = vrot.slane %v3954_v7, 4  ;;  %v1949_v18 = vsel %vm966_vm0, %v3954_v7, %v1948_v6  ;;  %v1890_v19 = vrot.slane %v3953_v10, 4  ;;  %v1893_v20 = vsel %vm966_vm0, %v3953_v10, %v1892_v9 }
 0x614   : > { %v1957_v21 = vperm.slane %v1949_v18, %v4762_v37  ;;  %v1901_v22 = vperm.slane %v1893_v20, %v4762_v37  ;;  %v1959_v23 = vsel %vm966_vm0, %v1958_v13, %v3949_v15  ;;  %v1960_v24 = vrot.slane %v3949_v15, 4 }
 0x615   : > { %v1947_v25 = vsel %vm966_vm0, %v1946_v17, %v1869_v59  ;;  %v1891_v26 = vsel %vm966_vm0, %v1890_v19, %v1868_v58  ;;  %v1965_v27 = vperm.slane %v1959_v23, %v4762_v37  ;;  %v1903_v28 = vsel %vm966_vm0, %v1902_v14, %v3948_v16 }
 0x616   : > { %v1953_v29 = vperm.slane %v1947_v25, %v4762_v37  ;;  %v1984_v31 = vrot.slane %v1957_v21, 4  ;;  %v1897_v30 = vperm.slane %v1891_v26, %v4762_v37  ;;  %v1961_v32 = vsel %vm966_vm0, %v3959_v0, %v1960_v24 }
 0x617   : > { %v1970_v34 = vrot.slane %v1965_v27, 4  ;;  %v1904_v35 = vrot.slane %v3948_v16, 4  ;;  %v1909_v36 = vperm.slane %v1903_v28, %v4762_v37  ;;  %v1969_v40 = vperm.slane %v1961_v32, %v4762_v37 }
 0x618   : > { %v1972_v38 = vrot.slane %v1953_v29, 4  ;;  %v1916_v39 = vrot.slane %v1897_v30, 4  ;;  %v1928_v41 = vrot.slane %v1901_v22, 4 }
 0x619   : > { %v1971_v33 = vsel %vm966_vm0, %v1970_v34, %v1953_v29  ;;  %v1905_v42 = vsel %vm966_vm0, %v3958_v1, %v1904_v35  ;;  %v1914_v43 = vrot.slane %v1909_v36, 4  ;;  %v1982_v46 = vrot.slane %v1969_v40, 4 }
 0x61a   : > { %v1973_v44 = vsel %vm966_vm0, %v1965_v27, %v1972_v38  ;;  %v1977_v45 = vperm.slane %v1971_v33, %v4774_v53  ;;  %v1985_v47 = vsel %vm966_vm0, %v1969_v40, %v1984_v31  ;;  %v1913_v54 = vperm.slane %v1905_v42, %v4762_v37 }
 0x61b   : > { %v1981_v51 = vperm.slane %v1973_v44, %v4774_v53  ;;  %v1993_v52 = vperm.slane %v1985_v47, %v4774_v53  ;;  %v1915_v55 = vsel %vm966_vm0, %v1914_v43, %v1897_v30  ;;  %v1983_v56 = vsel %vm966_vm0, %v1982_v46, %v1957_v21 }
 0x61c   : > { %v1994_v57 = vrot.slane %v1977_v45, 4  ;;  %v1917_v58 = vsel %vm966_vm0, %v1909_v36, %v1916_v39  ;;  %v1921_v59 = vperm.slane %v1915_v55, %v4774_v53  ;;  %v1989_v11 = vperm.slane %v1983_v56, %v4774_v53 }
 0x61d   : > { %v1996_v61 = vrot.slane %v1981_v51, 4  ;;  %v2000_v62 = vrot.slane %v1993_v52, 4  ;;  %v1925_v63 = vperm.slane %v1917_v58, %v4774_v53  ;;  %v1926_v1 = vrot.slane %v1913_v54, 4 }
 0x61e   : > { %v1995_v0 = vsel %vm966_vm0, 0.0, %v1994_v57  ;;  %v1929_v2 = vsel %vm966_vm0, %v1913_v54, %v1928_v41  ;;  %v1938_v3 = vrot.slane %v1921_v59, 4  ;;  %v1998_v5 = vrot.slane %v1989_v11, 4 }
 0x61f   : > { %v1997_v8 = vsel %vm966_vm0, 0.0, %v1996_v61  ;;  %v2001_v6 = vsel %vm966_vm0, 0.0, %v2000_v62  ;;  %v2056_v7 = vsel %vm966_vm0, %v1996_v61, %v1977_v45  ;;  %v2067_v12 = vsel %vm966_vm0, %v2000_v62, %v1989_v11 }
 0x620   : > { %v2060_v10 = vperm.slane %v2056_v7, %v4762_v37  ;;  %v2061_v9 = vrot.slane %v1997_v8, 4  ;;  %v2072_v13 = vrot.slane %v2001_v6, 4  ;;  %v1999_v14 = vsel %vm966_vm0, 0.0, %v1998_v5 }
 0x621   : > { %v2071_v15 = vperm.slane %v2067_v12, %v4762_v37  ;;  %v1927_v16 = vsel %vm966_vm0, %v1926_v1, %v1901_v22  ;;  %v1937_v17 = vperm.slane %v1929_v2, %v4774_v53  ;;  %v1939_v26 = vsel %vm966_vm0, 0.0, %v1938_v3 }
 0x622   : > { %v2062_v18 = vsel %vm966_vm0, %v2061_v9, %v1995_v0  ;;  %v2073_v19 = vsel %vm966_vm0, %v2072_v13, %v1999_v14  ;;  %v2080_v20 = vrot.slane %v2060_v10, 4  ;;  %v1933_v21 = vperm.slane %v1927_v16, %v4774_v53 }
 0x623   : > { %v2066_v23 = vperm.slane %v2062_v18, %v4762_v37  ;;  %v2077_v24 = vperm.slane %v2073_v19, %v4762_v37  ;;  %v2092_v25 = vrot.slane %v2071_v15, 4  ;;  %v1940_v27 = vrot.slane %v1925_v63, 4 }
 0x624   : > { %v1942_v28 = vrot.slane %v1933_v21, 4  ;;  %v1944_v29 = vrot.slane %v1937_v17, 4 }
 0x625   : > { %v2078_v22 = vrot.slane %v2066_v23, 4  ;;  %v2090_v31 = vrot.slane %v2077_v24, 4  ;;  %v2081_v30 = vsel %vm966_vm0, %v2066_v23, %v2080_v20  ;;  %v2093_v32 = vsel %vm966_vm0, %v2077_v24, %v2092_v25 }
 0x626   : > { %v1941_v34 = vsel %vm966_vm0, 0.0, %v1940_v27  ;;  %v1943_v35 = vsel %vm966_vm0, 0.0, %v1942_v28  ;;  %v1945_v36 = vsel %vm966_vm0, 0.0, %v1944_v29  ;;  %v2002_v38 = vsel %vm966_vm0, %v1940_v27, %v1921_v59 }
 0x627   : > { %v2006_v39 = vperm.slane %v2002_v38, %v4762_v37  ;;  %v2007_v40 = vrot.slane %v1941_v34, 4  ;;  %v2013_v41 = vsel %vm966_vm0, %v1944_v29, %v1933_v21  ;;  %v2018_v33 = vrot.slane %v1945_v36, 4 }
 0x628   : > { %v2017_v42 = vperm.slane %v2013_v41, %v4762_v37  ;;  %v2089_v43 = vperm.slane %v2081_v30, %v4774_v53  ;;  %v2101_v44 = vperm.slane %v2093_v32, %v4774_v53  ;;  %v2079_v45 = vsel %vm966_vm0, %v2078_v22, %v2060_v10  ;;  %v3787_v41 = vld [vmem:[%s4707_s4] sm:$0xff]   ;;  %s790_s4 = scalar_lea.vmem [#allocation17], %s3289_s20 }
 0x629   : > { %v2008_v46 = vsel %vm966_vm0, %v2007_v40, %v1939_v26  ;;  %v2019_v47 = vsel %vm966_vm0, %v2018_v33, %v1943_v35  ;;  %v2026_v48 = vrot.slane %v2006_v39, 4  ;;  %v2085_v51 = vperm.slane %v2079_v45, %v4774_v53  ;;  %s3022_s29 = sshll.u32 %s790_s4, 4  ;;  %s3023_s29 = int_to_ptr.vmem [resolvable:$true] %s3022_s29 }
 0x62a   : > { %v2012_v52 = vperm.slane %v2008_v46, %v4762_v37  ;;  %v2023_v54 = vperm.slane %v2019_v47, %v4762_v37  ;;  %v2038_v55 = vrot.slane %v2017_v42, 4  ;;  %v2106_v56 = vrot.slane %v2101_v44, 4 }
 0x62b   : > { %v2091_v57 = vsel %vm966_vm0, %v2090_v31, %v2071_v15  ;;  %v2104_v58 = vrot.slane %v2085_v51, 4  ;;  %v2108_v30 = vrot.slane %v2089_v43, 4  ;;  %v3788_v33 = vunpack.c.l.bf16 %v3787_v41 }
 0x62c   : > { %v2024_v59 = vrot.slane %v2012_v52, 4  ;;  %v2036_v60 = vrot.slane %v2023_v54, 4  ;;  %v2027_v11 = vsel %vm966_vm0, %v2012_v52, %v2026_v48  ;;  %v2039_v61 = vsel %vm966_vm0, %v2023_v54, %v2038_v55 }
 0x62d   : > { %v2035_v62 = vperm.slane %v2027_v11, %v4774_v53  ;;  %v2047_v63 = vperm.slane %v2039_v61, %v4774_v53  ;;  %v2107_v0 = vsel %vm966_vm0, %v2106_v56, %v2089_v43  ;;  %v2097_v1 = vperm.slane %v2091_v57, %v4774_v53 }
 0x62e   : > { %v2115_v37 = vpack.c.bf16 %v2107_v0, %v2107_v0  ;;  %v2025_v2 = vsel %vm966_vm0, %v2024_v59, %v2006_v39  ;;  %v2037_v3 = vsel %vm966_vm0, %v2036_v60, %v2017_v42  ;;  %v2109_v34 = vsel %vm966_vm0, %v2101_v44, %v2108_v30 }
 0x62f   : > { %v2052_v8 = vrot.slane %v2047_v63, 4  ;;  %v2031_v5 = vperm.slane %v2025_v2, %v4774_v53  ;;  %v2043_v6 = vperm.slane %v2037_v3, %v4774_v53  ;;  %v2102_v7 = vrot.slane %v2097_v1, 4 }
 0x630   : > { %v2105_v10 = vsel %vm966_vm0, %v2097_v1, %v2104_v58  ;;  %v2189_v16 = vunpack.c.l.b16 %v2115_v37  ;;  %v2054_v31 = vrot.slane %v2035_v62, 4  ;;  %v2117_v36 = vpack.c.bf16 %v2109_v34, %v2109_v34 }
 0x631   : > { %v2053_v9 = vsel %vm966_vm0, %v2052_v8, %v2035_v62  ;;  %v2048_v12 = vrot.slane %v2043_v6, 4  ;;  %v2103_v13 = vsel %vm966_vm0, %v2102_v7, %v2085_v51  ;;  %v2050_v14 = vrot.slane %v2031_v5, 4  ;;  %v3730_v8 = vld [vmem:[%s4698_s12 + $0x8] sm:$0xff] }
 0x632   : > { %v2114_v15 = vpack.c.bf16 %v2053_v9, %v2053_v9  ;;  %v2111_v17 = vpack.c.bf16 %v2103_v13, %v2103_v13  ;;  %v2113_v18 = vpack.c.bf16 %v2105_v10, %v2105_v10  ;;  %v2055_v32 = vsel %vm966_vm0, %v2047_v63, %v2054_v31  ;;  %2383 = vmatpush.bf16.msrb.mxu2 %v3730_v8  ;;  %v3729_v10 = vld [vmem:[%s4698_s12] sm:$0xff] }
 0x633   : > { %v2049_v19 = vsel %vm966_vm0, %v2048_v12, %v2031_v5  ;;  %v2051_v20 = vsel %vm966_vm0, %v2043_v6, %v2050_v14  ;;  %v2116_v35 = vpack.c.bf16 %v2055_v32, %v2055_v32  ;;  %v2223_v39 = vunpack.c.l.b16 %v2117_v36  ;;  %v3731_v5 = vld [vmem:[%s4698_s12 + $0x10] sm:$0xff]  ;;  %2355 = vmatpush.bf16.msrb.mxu1 %v3729_v10  ;;  %v3746_v10 = vld [vmem:[#allocation14 + $0x28] sm:$0xff] }
 0x634   : > { %v2188_v21 = vunpack.c.l.b16 %v2114_v15  ;;  %v2110_v23 = vpack.c.bf16 %v2049_v19, %v2049_v19  ;;  %v2121_v53 = vunpack.c.l.b16 %v2111_v17  ;;  %v2112_v24 = vpack.c.bf16 %v2051_v20, %v2051_v20  ;;  %2411 = vmatpush.bf16.msra.mxu3 %v3731_v5 }
 0x635   : > { %v2155_v25 = vunpack.c.l.b16 %v2113_v18  ;;  %v2222_v38 = vunpack.c.l.b16 %v2116_v35  ;;  %v3789_v44 = vunpack.c.h.bf16 %v3787_v41 }
 0x636   : > { %v2190_v26 = vpack.c.b16 %v2189_v16, %v2188_v21  ;;  %v2120_v27 = vunpack.c.l.b16 %v2110_v23  ;;  %v2154_v28 = vunpack.c.l.b16 %v2112_v24  ;;  %v3732_v16 = vld [vmem:[%s4698_s12 + $0x18] sm:$0xff]  ;;  %s5341_s12 = smov %s5340_s18 }
 0x637   : > { %v2224_v40 = vpack.c.b16 %v2223_v39, %v2222_v38  ;;  %s4329_s25 = scalar_lea.hbm %s5341_s12, 32  ;;  %p4330_p10 = scmp.lt.s32.totalorder %s4324_s9, %s5341_s12 }
 0x638   : > { %3487 = vmatmul.msk.bf16.vlgmr.msra.gmra.mxu2 %vm1211_vm1, %v2190_v26  ;;  %v2122_v29 = vpack.c.b16 %v2121_v53, %v2120_v27  ;;  %v2156_v22 = vpack.c.b16 %v2155_v25, %v2154_v28  ;;  %2564 = vmatpush.bf16.msrb.mxu3 %v3746_v10  ;;  %p4331_p11 = scmp.lt.s32.totalorder %s4329_s25, %s4325_s13 }
 0x63a   : > { %3469 = vmatmul.msk.bf16.vlgmr.msra.gmra.mxu0 %vm1211_vm1, %v2122_v29  ;;  %3478 = vmatmul.msk.bf16.vlgmr.msra.gmra.mxu1 %vm1211_vm1, %v2156_v22  ;;  %p4332_p12 = por %p4331_p11, %p4330_p10 }
 0x63b   : > { %2439 = vmatpush.bf16.msra.mxu0 %v3732_v16  ;;  %v3741_v16 = vld [vmem:[#allocation14] sm:$0xff] }
 0x63c   : > { %p4333_p13 = pnand %p4332_p12, %p4328_p8 }
 0x64a   : > { %3496 = vmatmul.msk.bf16.vlgmr.msrb.gmra.mxu0 %vm1211_vm1, %v2224_v40 }
 0x6b7   : > { %v2147_v42 = vpop.f32.mrf.mxu0  ;;  %v2181_v45 = vpop.f32.mrf.mxu1 }
 0x6b8   : > { %v2182_v43 = vadd.f32 %v3788_v33, %v2181_v45  ;;  %v2148_v59 = vadd.f32 %v3788_v33, %v2147_v42 }
 0x6ba   : > { %v2260_v46 = vsel %vm1331_vm2, %v2182_v43, -inf  ;;  %v2254_v0 = vsel %vm1331_vm2, %v2148_v59, -inf }
 0x6bb   : > { %v2215_v47 = vpop.f32.mrf.mxu2  ;;  %2261 = vmax.xlane.f32.xlu0 %v2260_v46 }
 0x6bc   : > { %v2216_v48 = vadd.f32 %v3788_v33, %v2215_v47 }
 0x6be   : > { %v2266_v51 = vsel %vm1331_vm2, %v2216_v48, -inf }
 0x6bf   : > { %2267 = vmax.xlane.f32.xlu2 %v2266_v51  ;;  %v2149_v52 = vpop.f32.mrf.mxu0  ;;  %v2183_v54 = vpop.f32.mrf.mxu1 }
 0x6c0   : > { %v2184_v55 = vadd.f32 %v3789_v44, %v2183_v54  ;;  %v2150_v62 = vadd.f32 %v3789_v44, %v2149_v52 }
 0x6c2   : > { %v2263_v56 = vsel %vm1331_vm2, %v2184_v55, -inf  ;;  %v2257_v1 = vsel %vm1331_vm2, %v2150_v62, -inf }
 0x6c3   : > { %v2217_v57 = vpop.f32.mrf.mxu2  ;;  %2264 = vmax.xlane.f32.xlu1 %v2263_v56 }
 0x6c4   : > { %v2218_v58 = vadd.f32 %v3789_v44, %v2217_v57 }
 0x6c6   : > { %v2269_v60 = vsel %vm1331_vm2, %v2218_v58, -inf }
 0x6c7   : > { %2270 = vmax.xlane.f32.xlu0 %v2269_v60  ;;  %v2249_v11 = vpop.f32.mrf.mxu0 }
 0x6c8   : > { %v2250_v61 = vadd.f32 %v3788_v33, %v2249_v11 }
 0x6ca   : > { %v2272_v63 = vsel %vm1331_vm2, %v2250_v61, -inf }
 0x6cb   : > { %2273 = vmax.xlane.f32.xlu2 %v2272_v63  ;;  %2255 = vmax.xlane.f32.xlu1 %v2254_v0 }
 0x6cf   : > { %v2251_v37 = vpop.f32.mrf.mxu0  ;;  %2258 = vmax.xlane.f32.xlu0 %v2257_v1 }
 0x6d0   : > { %v5028_v2 = vadd.f32 %v3789_v44, %v2251_v37 }
 0x6d2   : > { %v2275_v3 = vsel %vm1331_vm2, %v5028_v2, -inf }
 0x6d3   : > { %2276 = vmax.xlane.f32.xlu1 %v2275_v3 }
 0x72e   : > { %v2262_v6 = vpop.xlane.xlu0 %2261 }
 0x72f   : > { %v2280_v7 = vsub.f32 %v2182_v43, %v2262_v6 }
 0x731   : > { %v2290_v9 = vmul.f32 1.442695, %v2280_v7  ;;  %v3744_v7 = vld [vmem:[#allocation14 + $0x18] sm:$0xff] }
 0x732   : > { %v2268_v12 = vpop.xlane.xlu2 %2267  ;;  %2530 = vmatpush.bf16.msra.mxu2 %v3744_v7 }
 0x733   : > { %3998 = vpow2.f32 %v2290_v9  ;;  %v2282_v13 = vsub.f32 %v2216_v48, %v2268_v12  ;;  %v3742_v9 = vld [vmem:[#allocation14 + $0x8] sm:$0xff]  ;;  %v3743_v12 = vld [vmem:[#allocation14 + $0x10] sm:$0xff] }
 0x734   : > { %2496 = vmatpush.bf16.msra.mxu1 %v3742_v9 }
 0x735   : > { %v2294_v14 = vmul.f32 1.442695, %v2282_v13  ;;  %v3745_v13 = vld [vmem:[#allocation14 + $0x20] sm:$0xff] }
 0x736   : > { %v2265_v15 = vpop.xlane.xlu1 %2264  ;;  %2531 = vmatpush.bf16.msra.mxu2 %v3743_v12  ;;  %2565 = vmatpush.bf16.msrb.mxu3 %v3745_v13 }
 0x737   : > { %4000 = vpow2.f32 %v2294_v14  ;;  %v2281_v17 = vsub.f32 %v2184_v55, %v2265_v15  ;;  %v3748_v15 = vld [vmem:[#allocation14 + $0x38] sm:$0xff] }
 0x738   : > { %2598 = vmatpush.bf16.msrb.mxu0 %v3748_v15  ;;  %2497 = vmatpush.bf16.msra.mxu1 %v3741_v16 }
 0x739   : > { %v3999_v18 = vpop.eup %3998  ;;  %v2292_v19 = vmul.f32 1.442695, %v2281_v17 }
 0x73a   : > { %v2271_v20 = vpop.xlane.xlu0 %2270  ;;  %v2308_v21 = vsel %vm1331_vm2, %v3999_v18, 0.0  ;;  %v2328_v22 = vpack.c.bf16 %v3999_v18, %v3999_v18  ;;  %v3747_v18 = vld [vmem:[#allocation14 + $0x30] sm:$0xff] }
 0x73b   : > { %4002 = vpow2.f32 %v2292_v19  ;;  %v2283_v23 = vsub.f32 %v2218_v58, %v2271_v20  ;;  %2309 = vadd.xlane.f32.xlu0 %v2308_v21 }
 0x73c   : > { %v2364_v39 = vunpack.c.l.b16 %v2328_v22  ;;  %2599 = vmatpush.bf16.msrb.mxu0 %v3747_v18 }
 0x73d   : > { %v4001_v53 = vpop.eup %4000  ;;  %v2296_v24 = vmul.f32 1.442695, %v2283_v23 }
 0x73e   : > { %v2274_v25 = vpop.xlane.xlu2 %2273  ;;  %v2314_v26 = vsel %vm1331_vm2, %v4001_v53, 0.0  ;;  %v2256_v27 = vpop.xlane.xlu1 %2255  ;;  %v2330_v40 = vpack.c.bf16 %v4001_v53, %v4001_v53 }
 0x73f   : > { %4004 = vpow2.f32 %v2296_v24  ;;  %v2284_v28 = vsub.f32 %v2250_v61, %v2274_v25  ;;  %2315 = vadd.xlane.f32.xlu1 %v2314_v26  ;;  %v2278_v29 = vsub.f32 %v2148_v59, %v2256_v27 }
 0x740   : > { %v2392_v51 = vunpack.c.l.b16 %v2330_v40 }
 0x741   : > { %v4003_v31 = vpop.eup %4002  ;;  %v2298_v30 = vmul.f32 1.442695, %v2284_v28  ;;  %v2286_v32 = vmul.f32 1.442695, %v2278_v29 }
 0x742   : > { %v2329_v34 = vpack.c.bf16 %v4003_v31, %v4003_v31  ;;  %v2259_v35 = vpop.xlane.xlu0 %2258  ;;  %v2311_v36 = vsel %vm1331_vm2, %v4003_v31, 0.0 }
 0x743   : > { %v2279_v38 = vsub.f32 %v2150_v62, %v2259_v35  ;;  %2312 = vadd.xlane.f32.xlu2 %v2311_v36  ;;  %4006 = vpow2.f32 %v2286_v32 }
 0x744   : > { %v2365_v41 = vunpack.c.l.b16 %v2329_v34  ;;  %4008 = vpow2.f32 %v2298_v30 }
 0x745   : > { %v4005_v33 = vpop.eup %4004  ;;  %v2288_v42 = vmul.f32 1.442695, %v2279_v38 }
 0x746   : > { %v2366_v45 = vpack.c.b16 %v2365_v41, %v2364_v39  ;;  %v2331_v43 = vpack.c.bf16 %v4005_v33, %v4005_v33  ;;  %v2317_v46 = vsel %vm1331_vm2, %v4005_v33, 0.0  ;;  %v2277_v47 = vpop.xlane.xlu1 %2276 }
 0x747   : > { %4010 = vpow2.f32 %v2288_v42  ;;  %2318 = vadd.xlane.f32.xlu0 %v2317_v46  ;;  %v2285_v48 = vsub.f32 %v5028_v2, %v2277_v47 }
 0x748   : > { %v2393_v44 = vunpack.c.l.b16 %v2331_v43  ;;  %3506 = vmatmul.msk.bf16.vlgmr.msrb.gmra.mxu2 %vm1331_vm2, %v2366_v45 }
 0x749   : > { %v2300_v52 = vmul.f32 1.442695, %v2285_v48  ;;  %v4007_v54 = vpop.eup %4006 }
 0x74a   : > { %v2394_v55 = vpack.c.b16 %v2393_v44, %v2392_v51  ;;  %v4009_v56 = vpop.eup %4008  ;;  %v2302_v57 = vsel %vm1331_vm2, %v4007_v54, 0.0  ;;  %v2326_v58 = vpack.c.bf16 %v4007_v54, %v4007_v54 }
 0x74b   : > { %4012 = vpow2.f32 %v2300_v52  ;;  %2303 = vadd.xlane.f32.xlu2 %v2302_v57  ;;  %v2320_v11 = vsel %vm1331_vm2, %v4009_v56, 0.0  ;;  %v2332_v62 = vpack.c.bf16 %v4009_v56, %v4009_v56 }
 0x74c   : > { %3511 = vmatmul.msk.bf16.vlgmr.msra.gmra.mxu3 %vm1331_vm2, %v2394_v55  ;;  %v2336_v63 = vunpack.c.l.b16 %v2326_v58 }
 0x74d   : > { %v4011_v59 = vpop.eup %4010  ;;  %v2420_v8 = vunpack.c.l.b16 %v2332_v62 }
 0x74e   : > { %v2327_v60 = vpack.c.bf16 %v4011_v59, %v4011_v59  ;;  %v2305_v61 = vsel %vm1331_vm2, %v4011_v59, 0.0 }
 0x74f   : > { %2321 = vadd.xlane.f32.xlu0 %v2320_v11  ;;  %2306 = vadd.xlane.f32.xlu1 %v2305_v61 }
 0x750   : > { %v2337_v0 = vunpack.c.l.b16 %v2327_v60 }
 0x751   : > { %v4013_v1 = vpop.eup %4012 }
 0x752   : > { %v2338_v37 = vpack.c.b16 %v2337_v0, %v2336_v63  ;;  %v2333_v2 = vpack.c.bf16 %v4013_v1, %v4013_v1  ;;  %v2323_v3 = vsel %vm1331_vm2, %v4013_v1, 0.0 }
 0x753   : > { %2324 = vadd.xlane.f32.xlu2 %v2323_v3 }
 0x754   : > { %v2421_v5 = vunpack.c.l.b16 %v2333_v2  ;;  %3501 = vmatmul.msk.bf16.vlgmr.msrb.gmra.mxu1 %vm1331_vm2, %v2338_v37 }
 0x756   : > { %v2422_v6 = vpack.c.b16 %v2421_v5, %v2420_v8 }
 0x758   : > { %3516 = vmatmul.msk.bf16.vlgmr.msra.gmra.mxu0 %vm1331_vm2, %v2422_v6 }
 0x7ae   : > { %v2310_v14 = vpop.xlane.xlu0 %2309 }
 0x7af   : > { %4014 = vrcp.f32 %v2310_v14  ;;  %v5053_v14 = vld [vmem:[#allocation16] sm:$0xff] }
 0x7b0   : > { %v2612_v15 = vperm.slane %v5053_v14, 5 }
 0x7b2   : > { %v2316_v20 = vpop.xlane.xlu1 %2315 }
 0x7b3   : > { %4016 = vrcp.f32 %v2316_v20 }
 0x7b5   : > { %v4015_v53 = vpop.eup %4014 }
 0x7b6   : > { %v2313_v17 = vpop.xlane.xlu2 %2312 }
 0x7b7   : > { %4018 = vrcp.f32 %v2313_v17 }
 0x7b9   : > { %v4017_v29 = vpop.eup %4016 }
 0x7ba   : > { %v2319_v19 = vpop.xlane.xlu0 %2318 }
 0x7bd   : > { %v4019_v22 = vpop.eup %4018 }
 0x7be   : > { %v2304_v21 = vpop.xlane.xlu2 %2303 }
 0x7bf   : > { %4020 = vrcp.f32 %v2304_v21 }
 0x7c0   : > { %4022 = vrcp.f32 %v2319_v19 }
 0x7c2   : > { %v2322_v24 = vpop.xlane.xlu0 %2321  ;;  %v2307_v26 = vpop.xlane.xlu1 %2306 }
 0x7c3   : > { %4024 = vrcp.f32 %v2322_v24 }
 0x7c4   : > { %4026 = vrcp.f32 %v2307_v26 }
 0x7c5   : > { %v4021_v30 = vpop.eup %4020 }
 0x7c6   : > { %v2325_v32 = vpop.xlane.xlu2 %2324  ;;  %v4023_v41 = vpop.eup %4022 }
 0x7c7   : > { %4028 = vrcp.f32 %v2325_v32 }
 0x7c9   : > { %v4025_v42 = vpop.eup %4024 }
 0x7ca   : > { %v4027_v48 = vpop.eup %4026 }
 0x7cb   : > { %v2385_v23 = vpop.f32.mrf.mxu2 }
 0x7cc   : > { %v2456_v27 = vmul.f32 %v4015_v53, %v2385_v23 }
 0x7cd   : > { %v4029_v60 = vpop.eup %4028 }
 0x7ce   : > { %v2464_v34 = vpack.c.bf16 %v2456_v27, %v2456_v27 }
 0x7cf   : > { %v2413_v25 = vpop.f32.mrf.mxu3 }
 0x7d0   : > { %v2458_v35 = vmul.f32 %v4017_v29, %v2413_v25  ;;  %v2506_v45 = vunpack.c.l.b16 %v2464_v34 }
 0x7d1   : > { %v2357_v28 = vpop.f32.mrf.mxu1 }
 0x7d2   : > { %v2454_v38 = vmul.f32 %v4021_v30, %v2357_v28  ;;  %v2466_v43 = vpack.c.bf16 %v2458_v35, %v2458_v35  ;;  %v3764_v35 = vld [vmem:[%s5337_s7 + $0x74] sm:$0xf0] }
 0x7d3   : > { %v2387_v31 = vpop.f32.mrf.mxu2 }
 0x7d4   : > { %v2457_v36 = vmul.f32 %v4019_v22, %v2387_v31  ;;  %v2462_v51 = vpack.c.bf16 %v2454_v38, %v2454_v38  ;;  %v2540_v57 = vunpack.c.l.b16 %v2466_v43  ;;  %v3605_v43 = vld [vmem:[%s5337_s7 + $0x68] sm:$0xf0] }
 0x7d5   : > { %v2441_v39 = vpop.f32.mrf.mxu0 }
 0x7d6   : > { %v2465_v40 = vpack.c.bf16 %v2457_v36, %v2457_v36  ;;  %v2460_v55 = vmul.f32 %v4025_v42, %v2441_v39  ;;  %v2472_v11 = vunpack.c.l.b16 %v2462_v51  ;;  %v3763_v36 = vld [vmem:[%s5337_s7 + $0x74] sm:$0xf]  ;;  %v3613_v39 = vld [vmem:[%s5337_s7 + $0x78] sm:$0xf0]  ;;  %v3761_v42 = vld [vmem:[%s5337_s7 + $0x64] sm:$0xf] }
 0x7d7   : > { %v2415_v33 = vpop.f32.mrf.mxu3  ;;  %v3759_v51 = vld [vmem:[%s5337_s7 + $0x54] sm:$0xf] }
 0x7d8   : > { %v2507_v46 = vunpack.c.l.b16 %v2465_v40  ;;  %v2459_v47 = vmul.f32 %v4023_v41, %v2415_v33  ;;  %v2468_v63 = vpack.c.bf16 %v2460_v55, %v2460_v55  ;;  %v3616_v40 = vor.u32 %v3763_v36, %v3613_v39  ;;  %v3603_v41 = vld [vmem:[%s5337_s7 + $0x60] sm:$0xf]  ;;  %v3762_v33 = vld [vmem:[%s5337_s7 + $0x64] sm:$0xf0] }
 0x7d9   : > { %v2359_v44 = vpop.f32.mrf.mxu1  ;;  %v3587_v55 = vld [vmem:[%s5337_s7 + $0x40] sm:$0xf] }
 0x7da   : > { %v2508_v52 = vpack.c.b16 %v2507_v46, %v2506_v45  ;;  %v2467_v54 = vpack.c.bf16 %v2459_v47, %v2459_v47  ;;  %v2455_v56 = vmul.f32 %v4027_v48, %v2359_v44  ;;  %v2574_v3 = vunpack.c.l.b16 %v2468_v63  ;;  %2780 = vmatpush.bf16.msrb.mxu2 %v3616_v40  ;;  %v3595_v47 = vld [vmem:[%s5337_s7 + $0x50] sm:$0xf]  ;;  %v3760_v48 = vld [vmem:[%s5337_s7 + $0x54] sm:$0xf0]  ;;  %v3769_v39 = vld [vmem:[%s5338_s24 + $0x20] sm:$0xff] }
 0x7db   : > { %v3604_v45 = vor.u32 %v3762_v33, %v3603_v41  ;;  %v3608_v46 = vor.u32 %v3761_v42, %v3605_v43  ;;  %v3596_v44 = vor.u32 %v3760_v48, %v3595_v47 }
 0x7dc   : > { %v2541_v58 = vunpack.c.l.b16 %v2467_v54  ;;  %v2463_v59 = vpack.c.bf16 %v2455_v56, %v2455_v56  ;;  %3534 = vmatmul.msk.bf16.vlgmr.msra.gmra.mxu2 %vm1211_vm1, %v2508_v52  ;;  %v3597_v52 = vld [vmem:[%s5337_s7 + $0x58] sm:$0xf0]  ;;  %v3758_v56 = vld [vmem:[%s5337_s7 + $0x44] sm:$0xf0] }
 0x7dd   : > { %v2443_v61 = vpop.f32.mrf.mxu0  ;;  %v3600_v54 = vor.u32 %v3759_v51, %v3597_v52  ;;  %v2657_v51 = vperm.slane %v5053_v14, 6 }
 0x7de   : > { %v2542_v62 = vpack.c.b16 %v2541_v58, %v2540_v57  ;;  %v2473_v0 = vunpack.c.l.b16 %v2463_v59  ;;  %v2461_v1 = vmul.f32 %v4029_v60, %v2443_v61  ;;  %2781 = vmatpush.bf16.msrb.mxu2 %v3608_v46  ;;  %v3757_v57 = vld [vmem:[%s5337_s7 + $0x44] sm:$0xf]  ;;  %v3588_v58 = vor.u32 %v3758_v56, %v3587_v55  ;;  %v3589_v59 = vld [vmem:[%s5337_s7 + $0x48] sm:$0xf0]  ;;  %v3756_v61 = vld [vmem:[%s5337_s7 + $0x34] sm:$0xf0] }
 0x7df   : > { %v3592_v60 = vor.u32 %v3757_v57, %v3589_v59  ;;  %v2660_v56 = vperm.slane %v5053_v14, 7  ;;  %v3767_v14 = vld [vmem:[%s5338_s24 + $0x10] sm:$0xff] }
 0x7e0   : > { %v2474_v37 = vpack.c.b16 %v2473_v0, %v2472_v11  ;;  %v2469_v2 = vpack.c.bf16 %v2461_v1, %v2461_v1  ;;  %3543 = vmatmul.msk.bf16.vlgmr.msrb.gmra.mxu3 %vm1211_vm1, %v2542_v62  ;;  %v3579_v11 = vld [vmem:[%s5337_s7 + $0x30] sm:$0xf]  ;;  %v3755_v62 = vld [vmem:[%s5337_s7 + $0x34] sm:$0xf]  ;;  %v3581_v0 = vld [vmem:[%s5337_s7 + $0x38] sm:$0xf0] }
 0x7e1   : > { %v3580_v63 = vor.u32 %v3756_v61, %v3579_v11  ;;  %v3584_v1 = vor.u32 %v3755_v62, %v3581_v0  ;;  %v3777_v11 = vld [vmem:[%s5338_s24 + $0x60] sm:$0xff]  ;;  %v3766_v61 = vld [vmem:[%s5338_s24 + $0x8] sm:$0xff]  ;;  %v3775_v62 = vld [vmem:[%s5338_s24 + $0x50] sm:$0xff] }
 0x7e2   : > { %v2575_v8 = vunpack.c.l.b16 %v2469_v2  ;;  %3525 = vmatmul.msk.bf16.vlgmr.msra.gmra.mxu1 %vm1211_vm1, %v2474_v37  ;;  %2782 = vmatpush.bf16.msrb.mxu2 %v3600_v54  ;;  %v3571_v37 = vld [vmem:[%s5337_s7 + $0x20] sm:$0xf]  ;;  %v3754_v2 = vld [vmem:[%s5337_s7 + $0x24] sm:$0xf0] }
 0x7e3   : > { %v3774_v0 = vld [vmem:[%s5338_s24 + $0x48] sm:$0xff] }
 0x7e4   : > { %v2576_v5 = vpack.c.b16 %v2575_v8, %v2574_v3  ;;  %v3753_v3 = vld [vmem:[%s5337_s7 + $0x24] sm:$0xf]  ;;  %v3572_v8 = vor.u32 %v3754_v2, %v3571_v37  ;;  %v2680_v37 = vld [vmem:[%s5339_s11] sm:$0x3] }
 0x7e6   : > { %3552 = vmatmul.msk.bf16.vlgmr.msrb.gmra.mxu0 %vm1211_vm1, %v2576_v5  ;;  %2783 = vmatpush.bf16.msrb.mxu2 %v3592_v60  ;;  %v3573_v5 = vld [vmem:[%s5337_s7 + $0x28] sm:$0xf0] }
 0x7ea   : > { %2784 = vmatpush.bf16.msrb.mxu2 %v3584_v1  ;;  %v3773_v1 = vld [vmem:[%s5338_s24 + $0x40] sm:$0xff] }
 0x85f   : > { %v2499_v6 = vpop.f32.mrf.mxu1  ;;  %v2533_v7 = vpop.f32.mrf.mxu2 }
 0x860   : > { %v2606_v10 = vadd.f32 %v2533_v7, %v2499_v6  ;;  %v3576_v6 = vor.u32 %v3753_v3, %v3573_v5  ;;  %v3563_v7 = vld [vmem:[%s5337_s7 + $0x10] sm:$0xf]  ;;  %v2682_v3 = vperm.slane %v2680_v37, 0 }
 0x862   : > { %2785 = vmatpush.bf16.msrb.mxu2 %v3576_v6 }
 0x863   : > { %v2567_v9 = vpop.f32.mrf.mxu3  ;;  %v2601_v12 = vpop.f32.mrf.mxu0 }
 0x864   : > { %v2608_v13 = vadd.f32 %v2606_v10, %v2567_v9  ;;  %v3752_v10 = vld [vmem:[%s5337_s7 + $0x14] sm:$0xf0]  ;;  %v3751_v9 = vld [vmem:[%s5337_s7 + $0x14] sm:$0xf] }
 0x866   : > { %v2610_v16 = vadd.f32 %v2608_v13, %v2601_v12  ;;  %v3564_v12 = vor.u32 %v3752_v10, %v3563_v7  ;;  %v3565_v13 = vld [vmem:[%s5337_s7 + $0x18] sm:$0xf0]  ;;  %v2683_v7 = vperm.slane %v2680_v37, 1 }
 0x867   : > { %v2501_v17 = vpop.f32.mrf.mxu1  ;;  %v2535_v18 = vpop.f32.mrf.mxu2 }
 0x868   : > { %v2613_v19 = vadd.f32 %v2612_v15, %v2610_v16  ;;  %v2607_v20 = vadd.f32 %v2535_v18, %v2501_v17  ;;  %v3750_v16 = vld [vmem:[%s5337_s7 + $0x4] sm:$0xf0]  ;;  %v3568_v18 = vor.u32 %v3751_v9, %v3565_v13 }
 0x86a   : > { %v2615_v21 = vadd.f32 %v2613_v19, %v4911_v49  ;;  %v3749_v19 = vld [vmem:[%s5337_s7 + $0x4] sm:$0xf]  ;;  %2786 = vmatpush.bf16.msrb.mxu2 %v3568_v18 }
 0x86b   : > { %v2569_v23 = vpop.f32.mrf.mxu3  ;;  %v2603_v53 = vpop.f32.mrf.mxu0 }
 0x86c   : > { %v2609_v24 = vadd.f32 %v2607_v20, %v2569_v23  ;;  %2617 = vadd.xlane.f32.xlu1 %v2615_v21  ;;  %v3557_v20 = vld [vmem:[%s5337_s7 + $0x8] sm:$0xf0] }
 0x86e   : > { %v2611_v25 = vadd.f32 %v2609_v24, %v2603_v53  ;;  %v3560_v53 = vor.u32 %v3749_v19, %v3557_v20 }
 0x870   : > { %v2614_v26 = vadd.f32 %v2612_v15, %v2611_v25  ;;  %v3555_v15 = vld [vmem:[%s5337_s7] sm:$0xf]  ;;  %2787 = vmatpush.bf16.msrb.mxu2 %v3560_v53  ;;  %v3772_v25 = vld [vmem:[%s5338_s24 + $0x38] sm:$0xff] }
 0x871   : > { %v3556_v23 = vor.u32 %v3750_v16, %v3555_v15  ;;  %2929 = vmatpush.bf16.msra.mxu3 %v3772_v25 }
 0x872   : > { %v2616_v27 = vadd.f32 %v2614_v26, %v4913_v50  ;;  %v3611_v50 = vld [vmem:[%s5337_s7 + $0x70] sm:$0xf]  ;;  %v3780_v26 = vld [vmem:[%s5338_s24 + $0x78] sm:$0xff] }
 0x873   : > { %v3612_v38 = vor.u32 %v3764_v35, %v3611_v50  ;;  %2943 = vmatpush.bf16.msra.mxu0 %v3780_v26  ;;  %v3770_v50 = vld [vmem:[%s5338_s24 + $0x28] sm:$0xff] }
 0x874   : > { %2619 = vadd.xlane.f32.xlu0 %v2616_v27  ;;  %v3778_v35 = vld [vmem:[%s5338_s24 + $0x68] sm:$0xff] }
 0x875   : > { %2766 = vmatpush.bf16.msrb.mxu1 %v3612_v38 }
 0x879   : > { %2767 = vmatpush.bf16.msrb.mxu1 %v3604_v45 }
 0x87d   : > { %2768 = vmatpush.bf16.msrb.mxu1 %v3596_v44 }
 0x881   : > { %2769 = vmatpush.bf16.msrb.mxu1 %v3588_v58 }
 0x885   : > { %2770 = vmatpush.bf16.msrb.mxu1 %v3580_v63  ;;  %v3765_v63 = vld [vmem:[%s5338_s24] sm:$0xff] }
 0x889   : > { %2771 = vmatpush.bf16.msrb.mxu1 %v3572_v8 }
 0x88d   : > { %2772 = vmatpush.bf16.msrb.mxu1 %v3564_v12 }
 0x891   : > { %2773 = vmatpush.bf16.msrb.mxu1 %v3556_v23 }
 0x8df   : > { %v2618_v28 = vpop.xlane.xlu1 %2617 }
 0x8e0   : > { %v2621_v29 = vmul.f32 %v2618_v28, %v4903_v4 }
 0x8e2   : > { %v5059_v22 = vsub.f32 %v2615_v21, %v2621_v29  ;;  %v3771_v29 = vld [vmem:[%s5338_s24 + $0x30] sm:$0xff] }
 0x8e3   : > { %2930 = vmatpush.bf16.msra.mxu3 %v3771_v29 }
 0x8e4   : > { %v2625_v31 = vmul.f32 %v5059_v22, %v5059_v22 }
 0x8e6   : > { %2627 = vadd.xlane.f32.xlu2 %v2625_v31  ;;  %v3779_v31 = vld [vmem:[%s5338_s24 + $0x70] sm:$0xff] }
 0x8e7   : > { %v2620_v30 = vpop.xlane.xlu0 %2619  ;;  %2944 = vmatpush.bf16.msra.mxu0 %v3779_v31  ;;  %2931 = vmatpush.bf16.msra.mxu3 %v3770_v50 }
 0x8e8   : > { %v2622_v49 = vmul.f32 %v2620_v30, %v4903_v4 }
 0x8ea   : > { %v5064_v32 = vsub.f32 %v2616_v27, %v2622_v49 }
 0x8eb   : > { %2945 = vmatpush.bf16.msra.mxu0 %v3778_v35  ;;  %2932 = vmatpush.bf16.msra.mxu3 %v3769_v39 }
 0x8ec   : > { %v2626_v34 = vmul.f32 %v5064_v32, %v5064_v32 }
 0x8ee   : > { %2629 = vadd.xlane.f32.xlu1 %v2626_v34 }
 0x8ef   : > { %2946 = vmatpush.bf16.msra.mxu0 %v3777_v11 }
 0x959   : > { %v2628_v17 = vpop.xlane.xlu2 %2627 }
 0x95a   : > { %v2631_v21 = vmul.f32 %v2628_v17, %v4903_v4 }
 0x95c   : > { %v2633_v24 = vadd.f32 1e-05, %v2631_v21  ;;  %v5221_v21 = vld [vmem:[#allocation16 + $0x8] sm:$0x7] }
 0x95d   : > { %v2832_v23 = vperm.slane %v5221_v21, 0 }
 0x95e   : > { %4030 = vrsqrt.f32 %v2633_v24  ;;  %vm2641_vm11 = vweird.f32 %v2633_v24 }
 0x961   : > { %v2630_v27 = vpop.xlane.xlu1 %2629 }
 0x962   : > { %v2632_v28 = vmul.f32 %v2630_v27, %v4903_v4 }
 0x964   : > { %v4031_v30 = vpop.eup %4030  ;;  %v2634_v49 = vadd.f32 1e-05, %v2632_v28 }
 0x965   : > { %v2636_v34 = vmul.f32 %v4031_v30, %v2633_v24  ;;  %vm2642_vm10 = vweird.f32 %v4031_v30 }
 0x966   : > { %4032 = vrsqrt.f32 %v2634_v49  ;;  %vm2643_vm12 = vmor %vm2641_vm11, %vm2642_vm10  ;;  %vm2651_vm14 = vweird.f32 %v2634_v49 }
 0x967   : > { %v2637_v36 = vmul.f32 %v4031_v30, %v2636_v34 }
 0x969   : > { %v2638_v38 = vmul.f32 0.5, %v2637_v36 }
 0x96b   : > { %v2639_v40 = vsub.f32 1.5, %v2638_v38 }
 0x96c   : > { %v4033_v41 = vpop.eup %4032 }
 0x96d   : > { %v2640_v33 = vmul.f32 %v4031_v30, %v2639_v40  ;;  %v2646_v42 = vmul.f32 %v4033_v41, %v2634_v49  ;;  %vm2652_vm13 = vweird.f32 %v4033_v41 }
 0x96e   : > { %vm2653_vm15 = vmor %vm2651_vm14, %vm2652_vm13 }
 0x96f   : > { %v2647_v45 = vmul.f32 %v4033_v41, %v2646_v42  ;;  %v2644_v43 = vsel %vm2643_vm12, %v4031_v30, %v2640_v33 }
 0x970   : > { %v2655_v48 = vmul.f32 %v2644_v43, %v5059_v22  ;;  %v3768_v22 = vld [vmem:[%s5338_s24 + $0x18] sm:$0xff] }
 0x971   : > { %v2648_v46 = vmul.f32 0.5, %v2647_v45  ;;  %2933 = vmatpush.bf16.msra.mxu3 %v3768_v22 }
 0x972   : > { %v2658_v55 = vmul.f32 %v2657_v51, %v2655_v48 }
 0x973   : > { %v2649_v47 = vsub.f32 1.5, %v2648_v46 }
 0x974   : > { %v2661_v58 = vadd.f32 %v2660_v56, %v2658_v55 }
 0x975   : > { %v2650_v44 = vmul.f32 %v4033_v41, %v2649_v47  ;;  %2934 = vmatpush.bf16.msra.mxu3 %v3767_v14 }
 0x977   : > { %v2654_v52 = vsel %vm2653_vm15, %v4033_v41, %v2650_v44 }
 0x978   : > { %v2656_v54 = vmul.f32 %v2654_v52, %v5064_v32  ;;  %v3776_v32 = vld [vmem:[%s5338_s24 + $0x58] sm:$0xff] }
 0x979   : > { %2947 = vmatpush.bf16.msra.mxu0 %v3776_v32  ;;  %2935 = vmatpush.bf16.msra.mxu3 %v3766_v61 }
 0x97a   : > { %v2659_v57 = vmul.f32 %v2657_v51, %v2656_v54 }
 0x97c   : > { %v2662_v59 = vadd.f32 %v2660_v56, %v2659_v57 }
 0x97d   : > { %2948 = vmatpush.bf16.msra.mxu0 %v3775_v62  ;;  %2936 = vmatpush.bf16.msra.mxu3 %v3765_v63 }
 0x97e   : > { %v2663_v60 = vpack.c.bf16 %v2662_v59, %v2661_v58 }
 0x980   : > { %2774 = vmatmul.bf16.vlgmr.msrb.gmra.mxu1 %v2663_v60  ;;  %2788 = vmatmul.bf16.vlgmr.msrb.gmra.mxu2 %v2663_v60 }
 0x981   : > { %2949 = vmatpush.bf16.msra.mxu0 %v3774_v0 }
 0x985   : > { %2950 = vmatpush.bf16.msra.mxu0 %v3773_v1 }
 0x9fd   : > { %v2775_v2 = vpop.f32.mrf.mxu1 }
 0x9fe   : > { %v2776_v5 = vadd.f32 %v2775_v2, %v2682_v3 }
 0xa00   : > { %v2794_v9 = vmax.f32 %v2776_v5, 0.0 }
 0xa03   : > { %v2789_v8 = vpop.f32.mrf.mxu2 }
 0xa04   : > { %v2790_v13 = vadd.f32 %v2789_v8, %v2683_v7 }
 0xa05   : > { %v2777_v6 = vpop.f32.mrf.mxu1 }
 0xa06   : > { %v2778_v10 = vadd.f32 %v2777_v6, %v2682_v3  ;;  %v2795_v18 = vmax.f32 %v2790_v13, 0.0 }
 0xa08   : > { %v2796_v12 = vmax.f32 %v2778_v10, 0.0 }
 0xa0a   : > { %v2798_v15 = vpack.c.bf16 %v2796_v12, %v2794_v9 }
 0xa0b   : > { %v2791_v16 = vpop.f32.mrf.mxu2 }
 0xa0c   : > { %v2792_v17 = vadd.f32 %v2791_v16, %v2683_v7  ;;  %2937 = vmatmul.bf16.vlgmr.msra.gmra.mxu3 %v2798_v15 }
 0xa0e   : > { %v2797_v19 = vmax.f32 %v2792_v17, 0.0 }
 0xa10   : > { %v2799_v20 = vpack.c.bf16 %v2797_v19, %v2795_v18 }
 0xa12   : > { %2951 = vmatmul.bf16.vlgmr.msra.gmra.mxu0 %v2799_v20 }
 0xa8f   : > { %v2938_v53 = vpop.f32.mrf.mxu3  ;;  %v2952_v24 = vpop.f32.mrf.mxu0 }
 0xa90   : > { %v2939_v25 = vadd.f32 %v2938_v53, %v2832_v23 }
 0xa92   : > { %v2953_v26 = vadd.f32 %v2952_v24, %v2939_v25 }
 0xa94   : > { %v2957_v27 = vadd.f32 %v2953_v26, %v2661_v58  ;;  %v2999_v58 = vperm.slane %v5221_v21, 1 }
 0xa96   : > { %2959 = vadd.xlane.f32.xlu0 %v2957_v27 }
 0xa97   : > { %v2940_v28 = vpop.f32.mrf.mxu3  ;;  %v2954_v31 = vpop.f32.mrf.mxu0 }
 0xa98   : > { %v2941_v29 = vadd.f32 %v2940_v28, %v2832_v23 }
 0xa9a   : > { %v2955_v30 = vadd.f32 %v2954_v31, %v2941_v29 }
 0xa9c   : > { %v2958_v49 = vadd.f32 %v2955_v30, %v2662_v59 }
 0xa9e   : > { %2961 = vadd.xlane.f32.xlu2 %v2958_v49 }
 0xb09   : > { %v2960_v34 = vpop.xlane.xlu0 %2959 }
 0xb0a   : > { %v2963_v50 = vmul.f32 %v2960_v34, %v4903_v4 }
 0xb0c   : > { %v2965_v35 = vsub.f32 %v2957_v27, %v2963_v50 }
 0xb0e   : > { %v2967_v36 = vmul.f32 %v2965_v35, %v2965_v35 }
 0xb10   : > { %2969 = vadd.xlane.f32.xlu1 %v2967_v36 }
 0xb11   : > { %v2962_v38 = vpop.xlane.xlu2 %2961 }
 0xb12   : > { %v2964_v39 = vmul.f32 %v2962_v38, %v4903_v4 }
 0xb14   : > { %v2966_v40 = vsub.f32 %v2958_v49, %v2964_v39 }
 0xb16   : > { %v2968_v41 = vmul.f32 %v2966_v40, %v2966_v40 }
 0xb18   : > { %2971 = vadd.xlane.f32.xlu0 %v2968_v41 }
 0xb83   : > { %v2970_v33 = vpop.xlane.xlu1 %2969 }
 0xb84   : > { %v2973_v42 = vmul.f32 %v2970_v33, %v4903_v4 }
 0xb86   : > { %v2975_v45 = vadd.f32 1e-05, %v2973_v42 }
 0xb88   : > { %4034 = vrsqrt.f32 %v2975_v45  ;;  %vm2983_vm1 = vweird.f32 %v2975_v45 }
 0xb8b   : > { %v2972_v43 = vpop.xlane.xlu0 %2971 }
 0xb8c   : > { %v2974_v46 = vmul.f32 %v2972_v43, %v4903_v4  ;;  %v3002_v4 = vperm.slane %v5221_v21, 2 }
 0xb8e   : > { %v4035_v47 = vpop.eup %4034  ;;  %v2976_v48 = vadd.f32 1e-05, %v2974_v46 }
 0xb8f   : > { %v2978_v51 = vmul.f32 %v4035_v47, %v2975_v45  ;;  %vm2984_vm0 = vweird.f32 %v4035_v47 }
 0xb90   : > { %4036 = vrsqrt.f32 %v2976_v48  ;;  %vm2985_vm2 = vmor %vm2983_vm1, %vm2984_vm0  ;;  %vm2993_vm4 = vweird.f32 %v2976_v48 }
 0xb91   : > { %v2979_v44 = vmul.f32 %v4035_v47, %v2978_v51 }
 0xb93   : > { %v2980_v52 = vmul.f32 0.5, %v2979_v44 }
 0xb95   : > { %v2981_v54 = vsub.f32 1.5, %v2980_v52 }
 0xb96   : > { %v4037_v55 = vpop.eup %4036 }
 0xb97   : > { %v2982_v56 = vmul.f32 %v4035_v47, %v2981_v54  ;;  %v2988_v57 = vmul.f32 %v4037_v55, %v2976_v48  ;;  %vm2994_vm3 = vweird.f32 %v4037_v55 }
 0xb98   : > { %vm2995_vm5 = vmor %vm2993_vm4, %vm2994_vm3 }
 0xb99   : > { %v2986_v59 = vsel %vm2985_vm2, %v4035_v47, %v2982_v56  ;;  %v2989_v60 = vmul.f32 %v4037_v55, %v2988_v57 }
 0xb9a   : > { %v2997_v22 = vmul.f32 %v2986_v59, %v2965_v35 }
 0xb9b   : > { %v2990_v11 = vmul.f32 0.5, %v2989_v60 }
 0xb9c   : > { %v3000_v14 = vmul.f32 %v2999_v58, %v2997_v22 }
 0xb9d   : > { %v2991_v32 = vsub.f32 1.5, %v2990_v11 }
 0xb9e   : > { %v3003_v61 = vadd.f32 %v3002_v4, %v3000_v14 }
 0xb9f   : > { %v2992_v62 = vmul.f32 %v4037_v55, %v2991_v32 }
 0xba0   : > { %3005 = vst [vmem:[%s790_s4] sm:$0xff] %v3003_v61 }
 0xba1   : > { %v2996_v63 = vsel %vm2995_vm5, %v4037_v55, %v2992_v62 }
 0xba2   : > { %v2998_v0 = vmul.f32 %v2996_v63, %v2966_v40 }
 0xba4   : > { %v3001_v1 = vmul.f32 %v2999_v58, %v2998_v0 }
 0xba6   : > { %v3004_v37 = vadd.f32 %v3002_v4, %v3001_v1 }
 0xba8   : > { %3006 = vst [vmem:[%s790_s4 + $0x8] sm:$0xff] %v3004_v37 }
 0xba9   : > { %4336 = shalt.err (!%p4333_p13)
}
 0xbaa   : > { %s4428_s3 = smov 128   ;;  %s4429_s10 = smov 8  }
 0xbab   : > { %3818 = dma.vmem_to_hbm [thread:$0]  (%p4606_p5), %s3023_s29, 256, %s3025_s14, %s3008_s21, %s4428_s3, %s4428_s3, %s4429_s10  }
 0xbac PF: > { %s5343_s1 = sld [smem:[#allocation25_spill]]  ;;  %p5345_p0 = scmp.ge.s32.totalorder %s4411_s23, 2 }
 0xbae   : > { %p3850_p3 = pnand %p5345_p0, %p4555_p6 }
 0xbb0   : > { %p3851_p7 = pneg %p3850_p3 }
 0xbb2   : > { %s3039_s11 = sand.u32 1, %s5343_s1  }
 0xbb3   : > { %s3040_s2 = scalar_lea.sflag [#allocation4], %s3039_s11 }
 0xbb4   : > { %4386 = dma.done.wait (%p3851_p7), %s3040_s2, 256  }
 0xbb5   : > { %4388 = vsyncadd (%p3851_p7), %s3040_s2, 4294967040  ;;  %s39_s23 = sadd.s32 1, %s4411_s23   ;;  %s5346_s16 = sld [smem:[#allocation26_spill]] }
 0xbb6   : > { %p36_p9 = scmp.ge.s32.totalorder %s39_s23, 4   ;;  %s5347_s20 = sld [smem:[#allocation30_spill]] }
 0xbb7   : > { %s5348_s15 = sld [smem:[#allocation28_spill]]  ;;  %s5349_s18 = smov %s4395_s19 }
 0xbb8   : > { %s5351_s21 = smov %s4407_s22 }
 0xbb9   :  { %38 = sbr.rel (!%p36_p9) target bundleno = 26 (0x1a), region = 191 }
 0xbbb   : > { %s5350_s19 = smov %s5346_s16 }
 0xbbd   : > { %s5352_s22 = smov %s5348_s15 }
 0xbbe   :  { %3046 = vsyncpa [#allocation3], 1 }
 0xbbf   :  { %3048 = vsyncpa [#allocation3 + $0x1], 1 }
 0xbc0   :  { %3049 = vsyncpa [#allocation6], 1 }
 0xbc1   :  { %3051 = vsyncpa [#allocation6 + $0x1], 1 }
 0xbc2   :  { %3052 = vsyncpa [#allocation9], 1 }
 0xbc3   :  { %3054 = vsyncpa [#allocation9 + $0x1], 1 }
 0xbc4   :  { %3055 = vsyncpa [#allocation12], 1 }
 0xbc5   :  { %3056 = vsyncpa [#allocation15], 1 }
 0xbc6   :  { %3057 = vsyncpa [#allocation4], 1 }
 0xbc7   :  { %3059 = vsyncpa [#allocation4 + $0x1], 1 }

</bundles_post_ra>
